<compile_context>
chip_gen: v7x
topology: tpu7x:2x2x1
jax: 0.10.0
libtpu: 0.0.40
codegen_flags: <defaults>
</compile_context>

<pallas_src>
import functools
import math

import jax
import jax.numpy as jnp
from jax.experimental import pallas as pl
from jax.experimental.pallas import tpu as pltpu


# -----------------------------------------------------------------------------
# Host-side weight packing.
#
# Packed gate/column layout over 8H lanes (per layer), PyTorch gate order (i,f,g,o):
#   [ i_fwd | i_bwd | f_fwd | f_bwd | g_fwd | g_bwd | o_fwd | o_bwd ]   (each H)
# so each gate slice of the packed preactivations is (Bp, 2H) = [fwd | bwd] and
# acts directly on the packed cell/hidden state [c_fwd | c_bwd], [h_fwd | h_bwd].
# -----------------------------------------------------------------------------
def _pack_gate_cols(wf, wb, H):
    cols = []
    for g in range(4):
        cols.append(wf[..., g * H:(g + 1) * H])
        cols.append(wb[..., g * H:(g + 1) * H])
    return jnp.concatenate(cols, axis=-1)            # (..., 8H)


def _pack_whh(whhT_f, whhT_b, H):
    """Block-diagonal recurrent weight (2H, 8H): rows = [h_fwd | h_bwd];
    h_fwd feeds only fwd gate columns, h_bwd only bwd gate columns."""
    z = jnp.zeros((H, H), whhT_f.dtype)
    cols = []
    for g in range(4):
        cols.append(jnp.concatenate([whhT_f[:, g * H:(g + 1) * H], z], axis=0))
        cols.append(jnp.concatenate([z, whhT_b[:, g * H:(g + 1) * H]], axis=0))
    return jnp.concatenate(cols, axis=-1)            # (2H, 8H)


def _fwd_col_mask(H):
    """1.0 on fwd-gate columns of the packed 8H layout, 0.0 on bwd-gate cols."""
    return (((jnp.arange(8 * H) // H) % 2) == 0).astype(jnp.float32)


# -----------------------------------------------------------------------------
# Fused forward kernel (single invocation, no grid, everything VMEM-resident).
#
# h-history layout: row block s of the history buffer holds the packed state
# produced at fused step s, i.e. [h_fwd(time s) | h_bwd(time T-1-s)].
# -----------------------------------------------------------------------------
def _fused_bilstm_kernel(*refs, T, Bp, H, num_layers):
    f32 = jnp.float32
    n_in = 4 + 5 + 4 * (num_layers - 1) + 3
    in_refs = refs[:n_in]
    out_ref = refs[n_in]
    gx_sc, hA_sc, hB_sc = refs[n_in + 1:]

    ps_ref, mf_ref, w1T_ref, fc1b_ref = in_refs[0:4]
    wpre_ref, wmfA_ref, wmfB_ref, b0_ref, whh0_ref = in_refs[4:9]
    fc2_off = 9 + 4 * (num_layers - 1)
    w2f_ref, w2b_ref, b2_ref = in_refs[fc2_off:fc2_off + 3]

    def run_layer(whh_ref, h_out):
        """Fused fwd+bwd recurrence over the routed preactivations in gx_sc.

        Per step: one (Bp,8H) load, one (Bp,2H)@(2H,8H) MXU matmul, gate math,
        one (Bp,2H) store.  gx_sc is already direction-routed and has the
        time-invariant constant folded in, so nothing else sits on the chain.
        """
        whh = whh_ref[...]                           # (2H, 8H), VMEM-resident
        h = jnp.zeros((Bp, 2 * H), f32)
        c = jnp.zeros((Bp, 2 * H), f32)
        for s in range(T):                           # T small & static -> unrolled
            r0, r1 = s * Bp, (s + 1) * Bp
            gates = gx_sc[r0:r1, :] + jnp.dot(h, whh, preferred_element_type=f32)
            i_g = jax.nn.sigmoid(gates[:, 0:2 * H])
            f_g = jax.nn.sigmoid(gates[:, 2 * H:4 * H])
            g_g = jnp.tanh(gates[:, 4 * H:6 * H])
            o_g = jax.nn.sigmoid(gates[:, 6 * H:8 * H])
            c = f_g * c + i_g * g_g
            h = o_g * jnp.tanh(c)
            h_out[r0:r1, :] = h                      # single full-width store

    # ---- layer 0 bulk: fc1 + ReLU fused; routed, constant-folded projection ---
    pre_feat = jnp.maximum(
        jnp.dot(ps_ref[...], w1T_ref[...], preferred_element_type=f32)
        + fc1b_ref[...], 0.0)                                           # (Bp, H)
    g_const0 = (jnp.dot(pre_feat, wpre_ref[...], preferred_element_type=f32)
                + b0_ref[...])                                          # (Bp, 8H)
    wmfA = wmfA_ref[...]                              # fwd-gate cols only (I, 8H)
    wmfB = wmfB_ref[...]                              # bwd-gate cols only (I, 8H)
    for s in range(T):
        r0, r1 = s * Bp, (s + 1) * Bp
        q0, q1 = (T - 1 - s) * Bp, (T - s) * Bp
        gx_sc[r0:r1, :] = (
            jnp.dot(mf_ref[r0:r1, :], wmfA, preferred_element_type=f32)
            + jnp.dot(mf_ref[q0:q1, :], wmfB, preferred_element_type=f32)
            + g_const0)
    run_layer(whh0_ref, hA_sc)

    # ---- layers 1..L-1: routed bulk projection straight from the packed -------
    # h-history (A consumes aligned rows, B consumes time-reversed rows; both
    # are column-masked on the host so no in-kernel select is needed).
    prev, cur = hA_sc, hB_sc
    for l in range(1, num_layers):
        off = 9 + 4 * (l - 1)
        wA_ref, wB_ref, bl_ref, whhl_ref = in_refs[off:off + 4]
        wA = wA_ref[...]                              # (2H, 8H)
        wB = wB_ref[...]                              # (2H, 8H)
        bl = bl_ref[...]                              # (1, 8H)
        for s in range(T):
            r0, r1 = s * Bp, (s + 1) * Bp
            q0, q1 = (T - 1 - s) * Bp, (T - s) * Bp
            gx_sc[r0:r1, :] = (
                jnp.dot(prev[r0:r1, :], wA, preferred_element_type=f32)
                + jnp.dot(prev[q0:q1, :], wB, preferred_element_type=f32)
                + bl)
        run_layer(whhl_ref, cur)
        prev, cur = cur, prev

    # ---- fc (2H -> 1): VPU multiply + lane reduction; lane-dense stores -------
    w2f = w2f_ref[...]                                # (1, 2H), zeros in bwd half
    w2b = w2b_ref[...]                                # (1, 2H), zeros in fwd half
    b2 = b2_ref[...]
    for s in range(T):
        r0, r1 = s * Bp, (s + 1) * Bp
        q0, q1 = (T - 1 - s) * Bp, (T - s) * Bp
        y = (jnp.sum(prev[r0:r1, :] * w2f, axis=-1, keepdims=True)
             + jnp.sum(prev[q0:q1, :] * w2b, axis=-1, keepdims=True)
             + b2)                                                      # (Bp, 1)
        out_ref[r0:r1, :] = jnp.broadcast_to(y, (Bp, 128)).astype(out_ref.dtype)


# -----------------------------------------------------------------------------
# Model wrapper (matches BiLSTMModel.forward, eval mode). Returns (B, T).
# -----------------------------------------------------------------------------
def bilstm_model(params, pre_sample_features, multi_factors):
    B, T, I = multi_factors.shape
    P = pre_sample_features.shape[1]
    H = params["fc1_b"].shape[1]
    num_layers = len(params["lstm"])
    Bp = ((B + 7) // 8) * 8                          # pad batch to full sublanes

    ps = jnp.zeros((Bp, P), jnp.float32).at[:B].set(pre_sample_features)
    mf = jnp.zeros((Bp, T, I), jnp.float32).at[:B].set(multi_factors)
    mf_flat = jnp.transpose(mf, (1, 0, 2)).reshape(T * Bp, I)   # time-major rows

    maskF = _fwd_col_mask(H)                          # (8H,) fwd-gate columns
    maskB = 1.0 - maskF

    inputs = [ps, mf_flat, params["fc1_wT"], params["fc1_b"]]

    # layer 0: split the input weight into the multi-factor part (routed A/B) and
    # the time-invariant pre_sample part (folded into the constant in-kernel).
    lp = params["lstm"][0]
    wf, wb = lp["fwd"], lp["bwd"]
    wih_p = _pack_gate_cols(wf["wihT"], wb["wihT"], H)          # (I+H, 8H)
    b_p = _pack_gate_cols(wf["b"], wb["b"], H)                  # (1, 8H)
    whh_p = _pack_whh(wf["whhT"], wb["whhT"], H)                # (2H, 8H)
    wih_mf, wih_pre = wih_p[:I], wih_p[I:]
    inputs += [wih_pre, wih_mf * maskF, wih_mf * maskB, b_p, whh_p]

    # layers >= 1: A consumes the packed h-history aligned rows, B the reversed
    # rows; column masking on the host makes the routing a pure matmul sum.
    for l in range(1, num_layers):
        lp = params["lstm"][l]
        wf, wb = lp["fwd"], lp["bwd"]
        wih_p = _pack_gate_cols(wf["wihT"], wb["wihT"], H)      # (2H, 8H)
        b_p = _pack_gate_cols(wf["b"], wb["b"], H)
        whh_p = _pack_whh(wf["whhT"], wb["whhT"], H)
        w_A = jnp.concatenate([wih_p[:H] * maskF, wih_p[H:] * maskB], axis=0)
        w_B = jnp.concatenate([wih_p[:H] * maskB, wih_p[H:] * maskF], axis=0)
        inputs += [w_A, w_B, b_p, whh_p]

    w2 = params["fc2_w"]                                        # (1, 2H)
    zH = jnp.zeros((1, H), jnp.float32)
    inputs += [jnp.concatenate([w2[:, :H], zH], axis=1),        # fwd half padded
               jnp.concatenate([zH, w2[:, H:]], axis=1),        # bwd half padded
               params["fc2_b"]]

    out = pl.pallas_call(
        functools.partial(_fused_bilstm_kernel, T=T, Bp=Bp, H=H,
                          num_layers=num_layers),
        out_shape=jax.ShapeDtypeStruct((T * Bp, 128), jnp.float32),
        scratch_shapes=[
            pltpu.VMEM((T * Bp, 8 * H), jnp.float32),   # routed gate preactivations
            pltpu.VMEM((T * Bp, 2 * H), jnp.float32),   # packed h-history (ping)
            pltpu.VMEM((T * Bp, 2 * H), jnp.float32),   # packed h-history (pong)
        ],
    )(*inputs)

    # lane 0 holds the fc2 result; rows are time-major (t * Bp + b).
    return out[:, 0].reshape(T, Bp)[:, :B].T                    # (B, T)


# -----------------------------------------------------------------------------
# Deterministic parameter init (PyTorch-style uniform bounds)
# -----------------------------------------------------------------------------
def init_params(key, pre_size, input_size, hidden_size, num_layers, output_size=1):
    n_keys = 4 + 8 * num_layers
    keys = iter(jax.random.split(key, n_keys))

    def unif(k, shape, bound):
        return jax.random.uniform(k, shape, jnp.float32, -bound, bound)

    b1 = 1.0 / math.sqrt(pre_size)
    fc1_wT = unif(next(keys), (pre_size, hidden_size), b1)
    fc1_b = unif(next(keys), (1, hidden_size), b1)

    bH = 1.0 / math.sqrt(hidden_size)
    lstm = []
    for layer in range(num_layers):
        din = input_size + hidden_size if layer == 0 else 2 * hidden_size
        layer_d = {}
        for direction in ("fwd", "bwd"):
            wihT = unif(next(keys), (din, 4 * hidden_size), bH)
            whhT = unif(next(keys), (hidden_size, 4 * hidden_size), bH)
            bih = unif(next(keys), (1, 4 * hidden_size), bH)
            bhh = unif(next(keys), (1, 4 * hidden_size), bH)
            layer_d[direction] = {"wihT": wihT, "whhT": whhT, "b": bih + bhh}
        lstm.append(layer_d)

    b2 = 1.0 / math.sqrt(2 * hidden_size)
    fc2_w = unif(next(keys), (1, 2 * hidden_size), b2)   # PyTorch Linear layout (out,in)
    fc2_b = unif(next(keys), (1, 1), b2)

    return {"fc1_wT": fc1_wT, "fc1_b": fc1_b, "lstm": lstm,
            "fc2_w": fc2_w, "fc2_b": fc2_b}


# -----------------------------------------------------------------------------
# Pure-JAX (non-Pallas) reference with PyTorch eval-mode semantics, used to
# validate the fused kernel's weight packing / direction routing.
# -----------------------------------------------------------------------------
def bilstm_reference(params, pre_sample_features, multi_factors):
    hi = jax.lax.Precision.HIGHEST
    B, T, _ = multi_factors.shape
    H = params["fc1_b"].shape[1]
    pre = jax.nn.relu(jnp.dot(pre_sample_features, params["fc1_wT"], precision=hi)
                      + params["fc1_b"])
    x = jnp.concatenate(
        [multi_factors, jnp.broadcast_to(pre[:, None, :], (B, T, H))], axis=2)
    for lp in params["lstm"]:
        outs = []
        for name, reverse in (("fwd", False), ("bwd", True)):
            w = lp[name]
            h = jnp.zeros((B, H), jnp.float32)
            c = jnp.zeros((B, H), jnp.float32)
            hs = [None] * T
            order = range(T - 1, -1, -1) if reverse else range(T)
            for t in order:
                gates = (jnp.dot(x[:, t, :], w["wihT"], precision=hi)
                         + jnp.dot(h, w["whhT"], precision=hi) + w["b"])
                i = jax.nn.sigmoid(gates[:, 0:H])
                f = jax.nn.sigmoid(gates[:, H:2 * H])
                g = jnp.tanh(gates[:, 2 * H:3 * H])
                o = jax.nn.sigmoid(gates[:, 3 * H:4 * H])
                c = f * c + i * g
                h = o * jnp.tanh(c)
                hs[t] = h
            outs.append(jnp.stack(hs, axis=1))       # (B, T, H)
        x = jnp.concatenate(outs, axis=2)            # (B, T, 2H)
    y = jnp.einsum("btj,j->bt", x, params["fc2_w"][0], precision=hi)
    return y + params["fc2_b"][0, 0]


if __name__ == "__main__":
    # Small shapes consistent with the module's forward.
    B, T = 2, 8
    P, I, H, L = 5, 13, 32, 2   # pre_sample_features_size, input_size, hidden, layers

    key = jax.random.PRNGKey(0)
    k_param, k_pre, k_mf = jax.random.split(key, 3)

    params = init_params(k_param, P, I, H, L)
    pre_sample_features = jax.random.normal(k_pre, (B, P), jnp.float32)
    multi_factors = jax.random.normal(k_mf, (B, T, I), jnp.float32)

    out = jax.jit(bilstm_model)(params, pre_sample_features, multi_factors)
    out = jax.block_until_ready(out)
    assert out.shape == (B, T) and out.dtype == jnp.float32

    ref = jax.jit(bilstm_reference)(params, pre_sample_features, multi_factors)
    ref = jax.block_until_ready(ref)
    # Loose tolerance absorbs TPU matmul-precision differences while still
    # catching weight-packing / direction-routing mistakes.
    assert bool(jnp.max(jnp.abs(out - ref)) < 5e-2)

    print("KERNEL_OK")
</pallas_src>

<mosaic_0001>
module attributes {stable_mosaic.version = 11 : i64} {
  func.func @_fused_bilstm_kernel(%arg0: memref<8x5xf32, #tpu.memory_space<vmem>>, %arg1: memref<64x13xf32, #tpu.memory_space<vmem>>, %arg2: memref<5x32xf32, #tpu.memory_space<vmem>>, %arg3: memref<1x32xf32, #tpu.memory_space<vmem>>, %arg4: memref<32x256xf32, #tpu.memory_space<vmem>>, %arg5: memref<13x256xf32, #tpu.memory_space<vmem>>, %arg6: memref<13x256xf32, #tpu.memory_space<vmem>>, %arg7: memref<1x256xf32, #tpu.memory_space<vmem>>, %arg8: memref<64x256xf32, #tpu.memory_space<vmem>>, %arg9: memref<64x256xf32, #tpu.memory_space<vmem>>, %arg10: memref<64x256xf32, #tpu.memory_space<vmem>>, %arg11: memref<1x256xf32, #tpu.memory_space<vmem>>, %arg12: memref<64x256xf32, #tpu.memory_space<vmem>>, %arg13: memref<1x64xf32, #tpu.memory_space<vmem>>, %arg14: memref<1x64xf32, #tpu.memory_space<vmem>>, %arg15: memref<1x1xf32, #tpu.memory_space<vmem>>, %arg16: memref<64x128xf32, #tpu.memory_space<vmem>>, %arg17: memref<64x256xf32, #tpu.memory_space<vmem>>, %arg18: memref<64x64xf32, #tpu.memory_space<vmem>>, %arg19: memref<64x64xf32, #tpu.memory_space<vmem>>) attributes {dimension_semantics = [], scalar_prefetch = 0 : i64, scratch_operands = 3 : i64, tpu.core_type = #tpu.core_type<tc>} {
    %c0 = arith.constant 0 : index
    %c0_0 = arith.constant 0 : index
    %0 = vector.load %arg0[%c0, %c0_0] : memref<8x5xf32, #tpu.memory_space<vmem>>, vector<8x5xf32>
    %c0_1 = arith.constant 0 : index
    %c0_2 = arith.constant 0 : index
    %1 = vector.load %arg2[%c0_1, %c0_2] : memref<5x32xf32, #tpu.memory_space<vmem>>, vector<5x32xf32>
    %cst = arith.constant dense<0.000000e+00> : vector<8x32xf32>
    %2 = tpu.matmul %0, %1, %cst {dimension_numbers = #tpu.dot_dimension_numbers<[1], [0], [0], [1], [0, 0, 1, 1], [], []>} : vector<8x5xf32>, vector<5x32xf32>, vector<8x32xf32> -> vector<8x32xf32>
    %c0_3 = arith.constant 0 : index
    %c0_4 = arith.constant 0 : index
    %3 = vector.load %arg3[%c0_3, %c0_4] : memref<1x32xf32, #tpu.memory_space<vmem>>, vector<1x32xf32>
    %4 = vector.broadcast %3 : vector<1x32xf32> to vector<8x32xf32>
    %5 = arith.addf %2, %4 : vector<8x32xf32>
    %cst_5 = arith.constant 0.000000e+00 : f32
    %6 = vector.broadcast %cst_5 : f32 to vector<8x32xf32>
    %7 = arith.maximumf %5, %6 : vector<8x32xf32>
    %c0_6 = arith.constant 0 : index
    %c0_7 = arith.constant 0 : index
    %8 = vector.load %arg4[%c0_6, %c0_7] : memref<32x256xf32, #tpu.memory_space<vmem>>, vector<32x256xf32>
    %cst_8 = arith.constant dense<0.000000e+00> : vector<8x256xf32>
    %9 = tpu.matmul %7, %8, %cst_8 {dimension_numbers = #tpu.dot_dimension_numbers<[1], [0], [0], [1], [0, 0, 1, 1], [], []>} : vector<8x32xf32>, vector<32x256xf32>, vector<8x256xf32> -> vector<8x256xf32>
    %c0_9 = arith.constant 0 : index
    %c0_10 = arith.constant 0 : index
    %10 = vector.load %arg7[%c0_9, %c0_10] : memref<1x256xf32, #tpu.memory_space<vmem>>, vector<1x256xf32>
    %11 = vector.broadcast %10 : vector<1x256xf32> to vector<8x256xf32>
    %12 = arith.addf %9, %11 : vector<8x256xf32>
    %c0_11 = arith.constant 0 : index
    %c0_12 = arith.constant 0 : index
    %13 = vector.load %arg5[%c0_11, %c0_12] : memref<13x256xf32, #tpu.memory_space<vmem>>, vector<13x256xf32>
    %c0_13 = arith.constant 0 : index
    %c0_14 = arith.constant 0 : index
    %14 = vector.load %arg6[%c0_13, %c0_14] : memref<13x256xf32, #tpu.memory_space<vmem>>, vector<13x256xf32>
    %c0_15 = arith.constant 0 : index
    %c0_16 = arith.constant 0 : index
    %15 = vector.load %arg1[%c0_15, %c0_16] : memref<64x13xf32, #tpu.memory_space<vmem>>, vector<8x13xf32>
    %cst_17 = arith.constant dense<0.000000e+00> : vector<8x256xf32>
    %16 = tpu.matmul %15, %13, %cst_17 {dimension_numbers = #tpu.dot_dimension_numbers<[1], [0], [0], [1], [0, 0, 1, 1], [], []>} : vector<8x13xf32>, vector<13x256xf32>, vector<8x256xf32> -> vector<8x256xf32>
    %c56 = arith.constant 56 : index
    %c0_18 = arith.constant 0 : index
    %17 = vector.load %arg1[%c56, %c0_18] : memref<64x13xf32, #tpu.memory_space<vmem>>, vector<8x13xf32>
    %cst_19 = arith.constant dense<0.000000e+00> : vector<8x256xf32>
    %18 = tpu.matmul %17, %14, %cst_19 {dimension_numbers = #tpu.dot_dimension_numbers<[1], [0], [0], [1], [0, 0, 1, 1], [], []>} : vector<8x13xf32>, vector<13x256xf32>, vector<8x256xf32> -> vector<8x256xf32>
    %19 = arith.addf %16, %18 : vector<8x256xf32>
    %20 = arith.addf %19, %12 : vector<8x256xf32>
    %c0_20 = arith.constant 0 : index
    %c0_21 = arith.constant 0 : index
    %21 = vector.load %arg17[%c0_20, %c0_21] : memref<64x256xf32, #tpu.memory_space<vmem>>, vector<8x256xf32>
    tpu.vector_store %arg17[%c0_20, %c0_21], %20 {strides = array<i32>} : memref<64x256xf32, #tpu.memory_space<vmem>>, vector<8x256xf32>,
    %c8 = arith.constant 8 : index
    %c0_22 = arith.constant 0 : index
    %22 = vector.load %arg1[%c8, %c0_22] : memref<64x13xf32, #tpu.memory_space<vmem>>, vector<8x13xf32>
    %cst_23 = arith.constant dense<0.000000e+00> : vector<8x256xf32>
    %23 = tpu.matmul %22, %13, %cst_23 {dimension_numbers = #tpu.dot_dimension_numbers<[1], [0], [0], [1], [0, 0, 1, 1], [], []>} : vector<8x13xf32>, vector<13x256xf32>, vector<8x256xf32> -> vector<8x256xf32>
    %c48 = arith.constant 48 : index
    %c0_24 = arith.constant 0 : index
    %24 = vector.load %arg1[%c48, %c0_24] : memref<64x13xf32, #tpu.memory_space<vmem>>, vector<8x13xf32>
    %cst_25 = arith.constant dense<0.000000e+00> : vector<8x256xf32>
    %25 = tpu.matmul %24, %14, %cst_25 {dimension_numbers = #tpu.dot_dimension_numbers<[1], [0], [0], [1], [0, 0, 1, 1], [], []>} : vector<8x13xf32>, vector<13x256xf32>, vector<8x256xf32> -> vector<8x256xf32>
    %26 = arith.addf %23, %25 : vector<8x256xf32>
    %27 = arith.addf %26, %12 : vector<8x256xf32>
    %c8_26 = arith.constant 8 : index
    %c0_27 = arith.constant 0 : index
    %28 = vector.load %arg17[%c8_26, %c0_27] : memref<64x256xf32, #tpu.memory_space<vmem>>, vector<8x256xf32>
    tpu.vector_store %arg17[%c8_26, %c0_27], %27 {strides = array<i32>} : memref<64x256xf32, #tpu.memory_space<vmem>>, vector<8x256xf32>,
    %c16 = arith.constant 16 : index
    %c0_28 = arith.constant 0 : index
    %29 = vector.load %arg1[%c16, %c0_28] : memref<64x13xf32, #tpu.memory_space<vmem>>, vector<8x13xf32>
    %cst_29 = arith.constant dense<0.000000e+00> : vector<8x256xf32>
    %30 = tpu.matmul %29, %13, %cst_29 {dimension_numbers = #tpu.dot_dimension_numbers<[1], [0], [0], [1], [0, 0, 1, 1], [], []>} : vector<8x13xf32>, vector<13x256xf32>, vector<8x256xf32> -> vector<8x256xf32>
    %c40 = arith.constant 40 : index
    %c0_30 = arith.constant 0 : index
    %31 = vector.load %arg1[%c40, %c0_30] : memref<64x13xf32, #tpu.memory_space<vmem>>, vector<8x13xf32>
    %cst_31 = arith.constant dense<0.000000e+00> : vector<8x256xf32>
    %32 = tpu.matmul %31, %14, %cst_31 {dimension_numbers = #tpu.dot_dimension_numbers<[1], [0], [0], [1], [0, 0, 1, 1], [], []>} : vector<8x13xf32>, vector<13x256xf32>, vector<8x256xf32> -> vector<8x256xf32>
    %33 = arith.addf %30, %32 : vector<8x256xf32>
    %34 = arith.addf %33, %12 : vector<8x256xf32>
    %c16_32 = arith.constant 16 : index
    %c0_33 = arith.constant 0 : index
    %35 = vector.load %arg17[%c16_32, %c0_33] : memref<64x256xf32, #tpu.memory_space<vmem>>, vector<8x256xf32>
    tpu.vector_store %arg17[%c16_32, %c0_33], %34 {strides = array<i32>} : memref<64x256xf32, #tpu.memory_space<vmem>>, vector<8x256xf32>,
    %c24 = arith.constant 24 : index
    %c0_34 = arith.constant 0 : index
    %36 = vector.load %arg1[%c24, %c0_34] : memref<64x13xf32, #tpu.memory_space<vmem>>, vector<8x13xf32>
    %cst_35 = arith.constant dense<0.000000e+00> : vector<8x256xf32>
    %37 = tpu.matmul %36, %13, %cst_35 {dimension_numbers = #tpu.dot_dimension_numbers<[1], [0], [0], [1], [0, 0, 1, 1], [], []>} : vector<8x13xf32>, vector<13x256xf32>, vector<8x256xf32> -> vector<8x256xf32>
    %c32 = arith.constant 32 : index
    %c0_36 = arith.constant 0 : index
    %38 = vector.load %arg1[%c32, %c0_36] : memref<64x13xf32, #tpu.memory_space<vmem>>, vector<8x13xf32>
    %cst_37 = arith.constant dense<0.000000e+00> : vector<8x256xf32>
    %39 = tpu.matmul %38, %14, %cst_37 {dimension_numbers = #tpu.dot_dimension_numbers<[1], [0], [0], [1], [0, 0, 1, 1], [], []>} : vector<8x13xf32>, vector<13x256xf32>, vector<8x256xf32> -> vector<8x256xf32>
    %40 = arith.addf %37, %39 : vector<8x256xf32>
    %41 = arith.addf %40, %12 : vector<8x256xf32>
    %c24_38 = arith.constant 24 : index
    %c0_39 = arith.constant 0 : index
    %42 = vector.load %arg17[%c24_38, %c0_39] : memref<64x256xf32, #tpu.memory_space<vmem>>, vector<8x256xf32>
    tpu.vector_store %arg17[%c24_38, %c0_39], %41 {strides = array<i32>} : memref<64x256xf32, #tpu.memory_space<vmem>>, vector<8x256xf32>,
    %c32_40 = arith.constant 32 : index
    %c0_41 = arith.constant 0 : index
    %43 = vector.load %arg1[%c32_40, %c0_41] : memref<64x13xf32, #tpu.memory_space<vmem>>, vector<8x13xf32>
    %cst_42 = arith.constant dense<0.000000e+00> : vector<8x256xf32>
    %44 = tpu.matmul %43, %13, %cst_42 {dimension_numbers = #tpu.dot_dimension_numbers<[1], [0], [0], [1], [0, 0, 1, 1], [], []>} : vector<8x13xf32>, vector<13x256xf32>, vector<8x256xf32> -> vector<8x256xf32>
    %c24_43 = arith.constant 24 : index
    %c0_44 = arith.constant 0 : index
    %45 = vector.load %arg1[%c24_43, %c0_44] : memref<64x13xf32, #tpu.memory_space<vmem>>, vector<8x13xf32>
    %cst_45 = arith.constant dense<0.000000e+00> : vector<8x256xf32>
    %46 = tpu.matmul %45, %14, %cst_45 {dimension_numbers = #tpu.dot_dimension_numbers<[1], [0], [0], [1], [0, 0, 1, 1], [], []>} : vector<8x13xf32>, vector<13x256xf32>, vector<8x256xf32> -> vector<8x256xf32>
    %47 = arith.addf %44, %46 : vector<8x256xf32>
    %48 = arith.addf %47, %12 : vector<8x256xf32>
    %c32_46 = arith.constant 32 : index
    %c0_47 = arith.constant 0 : index
    %49 = vector.load %arg17[%c32_46, %c0_47] : memref<64x256xf32, #tpu.memory_space<vmem>>, vector<8x256xf32>
    tpu.vector_store %arg17[%c32_46, %c0_47], %48 {strides = array<i32>} : memref<64x256xf32, #tpu.memory_space<vmem>>, vector<8x256xf32>,
    %c40_48 = arith.constant 40 : index
    %c0_49 = arith.constant 0 : index
    %50 = vector.load %arg1[%c40_48, %c0_49] : memref<64x13xf32, #tpu.memory_space<vmem>>, vector<8x13xf32>
    %cst_50 = arith.constant dense<0.000000e+00> : vector<8x256xf32>
    %51 = tpu.matmul %50, %13, %cst_50 {dimension_numbers = #tpu.dot_dimension_numbers<[1], [0], [0], [1], [0, 0, 1, 1], [], []>} : vector<8x13xf32>, vector<13x256xf32>, vector<8x256xf32> -> vector<8x256xf32>
    %c16_51 = arith.constant 16 : index
    %c0_52 = arith.constant 0 : index
    %52 = vector.load %arg1[%c16_51, %c0_52] : memref<64x13xf32, #tpu.memory_space<vmem>>, vector<8x13xf32>
    %cst_53 = arith.constant dense<0.000000e+00> : vector<8x256xf32>
    %53 = tpu.matmul %52, %14, %cst_53 {dimension_numbers = #tpu.dot_dimension_numbers<[1], [0], [0], [1], [0, 0, 1, 1], [], []>} : vector<8x13xf32>, vector<13x256xf32>, vector<8x256xf32> -> vector<8x256xf32>
    %54 = arith.addf %51, %53 : vector<8x256xf32>
    %55 = arith.addf %54, %12 : vector<8x256xf32>
    %c40_54 = arith.constant 40 : index
    %c0_55 = arith.constant 0 : index
    %56 = vector.load %arg17[%c40_54, %c0_55] : memref<64x256xf32, #tpu.memory_space<vmem>>, vector<8x256xf32>
    tpu.vector_store %arg17[%c40_54, %c0_55], %55 {strides = array<i32>} : memref<64x256xf32, #tpu.memory_space<vmem>>, vector<8x256xf32>,
    %c48_56 = arith.constant 48 : index
    %c0_57 = arith.constant 0 : index
    %57 = vector.load %arg1[%c48_56, %c0_57] : memref<64x13xf32, #tpu.memory_space<vmem>>, vector<8x13xf32>
    %cst_58 = arith.constant dense<0.000000e+00> : vector<8x256xf32>
    %58 = tpu.matmul %57, %13, %cst_58 {dimension_numbers = #tpu.dot_dimension_numbers<[1], [0], [0], [1], [0, 0, 1, 1], [], []>} : vector<8x13xf32>, vector<13x256xf32>, vector<8x256xf32> -> vector<8x256xf32>
    %c8_59 = arith.constant 8 : index
    %c0_60 = arith.constant 0 : index
    %59 = vector.load %arg1[%c8_59, %c0_60] : memref<64x13xf32, #tpu.memory_space<vmem>>, vector<8x13xf32>
    %cst_61 = arith.constant dense<0.000000e+00> : vector<8x256xf32>
    %60 = tpu.matmul %59, %14, %cst_61 {dimension_numbers = #tpu.dot_dimension_numbers<[1], [0], [0], [1], [0, 0, 1, 1], [], []>} : vector<8x13xf32>, vector<13x256xf32>, vector<8x256xf32> -> vector<8x256xf32>
    %61 = arith.addf %58, %60 : vector<8x256xf32>
    %62 = arith.addf %61, %12 : vector<8x256xf32>
    %c48_62 = arith.constant 48 : index
    %c0_63 = arith.constant 0 : index
    %63 = vector.load %arg17[%c48_62, %c0_63] : memref<64x256xf32, #tpu.memory_space<vmem>>, vector<8x256xf32>
    tpu.vector_store %arg17[%c48_62, %c0_63], %62 {strides = array<i32>} : memref<64x256xf32, #tpu.memory_space<vmem>>, vector<8x256xf32>,
    %c56_64 = arith.constant 56 : index
    %c0_65 = arith.constant 0 : index
    %64 = vector.load %arg1[%c56_64, %c0_65] : memref<64x13xf32, #tpu.memory_space<vmem>>, vector<8x13xf32>
    %cst_66 = arith.constant dense<0.000000e+00> : vector<8x256xf32>
    %65 = tpu.matmul %64, %13, %cst_66 {dimension_numbers = #tpu.dot_dimension_numbers<[1], [0], [0], [1], [0, 0, 1, 1], [], []>} : vector<8x13xf32>, vector<13x256xf32>, vector<8x256xf32> -> vector<8x256xf32>
    %c0_67 = arith.constant 0 : index
    %c0_68 = arith.constant 0 : index
    %66 = vector.load %arg1[%c0_67, %c0_68] : memref<64x13xf32, #tpu.memory_space<vmem>>, vector<8x13xf32>
    %cst_69 = arith.constant dense<0.000000e+00> : vector<8x256xf32>
    %67 = tpu.matmul %66, %14, %cst_69 {dimension_numbers = #tpu.dot_dimension_numbers<[1], [0], [0], [1], [0, 0, 1, 1], [], []>} : vector<8x13xf32>, vector<13x256xf32>, vector<8x256xf32> -> vector<8x256xf32>
    %68 = arith.addf %65, %67 : vector<8x256xf32>
    %69 = arith.addf %68, %12 : vector<8x256xf32>
    %c56_70 = arith.constant 56 : index
    %c0_71 = arith.constant 0 : index
    %70 = vector.load %arg17[%c56_70, %c0_71] : memref<64x256xf32, #tpu.memory_space<vmem>>, vector<8x256xf32>
    tpu.vector_store %arg17[%c56_70, %c0_71], %69 {strides = array<i32>} : memref<64x256xf32, #tpu.memory_space<vmem>>, vector<8x256xf32>,
    %c0_72 = arith.constant 0 : index
    %c0_73 = arith.constant 0 : index
    %71 = vector.load %arg8[%c0_72, %c0_73] : memref<64x256xf32, #tpu.memory_space<vmem>>, vector<64x256xf32>
    %cst_74 = arith.constant 0.000000e+00 : f32
    %72 = vector.broadcast %cst_74 : f32 to vector<8x64xf32>
    %cst_75 = arith.constant 0.000000e+00 : f32
    %73 = vector.broadcast %cst_75 : f32 to vector<8x64xf32>
    %c0_76 = arith.constant 0 : index
    %c0_77 = arith.constant 0 : index
    %74 = vector.load %arg17[%c0_76, %c0_77] : memref<64x256xf32, #tpu.memory_space<vmem>>, vector<8x256xf32>
    %cst_78 = arith.constant dense<0.000000e+00> : vector<8x256xf32>
    %75 = tpu.matmul %72, %71, %cst_78 {dimension_numbers = #tpu.dot_dimension_numbers<[1], [0], [0], [1], [0, 0, 1, 1], [], []>} : vector<8x64xf32>, vector<64x256xf32>, vector<8x256xf32> -> vector<8x256xf32>
    %76 = arith.addf %74, %75 : vector<8x256xf32>
    %77 = vector.extract_strided_slice %76 {offsets = [0, 0], sizes = [8, 64], strides = [1, 1]} : vector<8x256xf32> to vector<8x64xf32>
    %78 = arith.negf %77 : vector<8x64xf32>
    %79 = math.exp %78 : vector<8x64xf32>
    %cst_79 = arith.constant 1.000000e+00 : f32
    %80 = vector.broadcast %cst_79 : f32 to vector<8x64xf32>
    %81 = arith.addf %80, %79 : vector<8x64xf32>
    %82 = arith.divf %80, %81 : vector<8x64xf32>
    %83 = vector.extract_strided_slice %76 {offsets = [0, 64], sizes = [8, 64], strides = [1, 1]} : vector<8x256xf32> to vector<8x64xf32>
    %84 = arith.negf %83 : vector<8x64xf32>
    %85 = math.exp %84 : vector<8x64xf32>
    %cst_80 = arith.constant 1.000000e+00 : f32
    %86 = vector.broadcast %cst_80 : f32 to vector<8x64xf32>
    %87 = arith.addf %86, %85 : vector<8x64xf32>
    %88 = arith.divf %86, %87 : vector<8x64xf32>
    %89 = vector.extract_strided_slice %76 {offsets = [0, 128], sizes = [8, 64], strides = [1, 1]} : vector<8x256xf32> to vector<8x64xf32>
    %90 = math.tanh %89 : vector<8x64xf32>
    %91 = vector.extract_strided_slice %76 {offsets = [0, 192], sizes = [8, 64], strides = [1, 1]} : vector<8x256xf32> to vector<8x64xf32>
    %92 = arith.negf %91 : vector<8x64xf32>
    %93 = math.exp %92 : vector<8x64xf32>
    %cst_81 = arith.constant 1.000000e+00 : f32
    %94 = vector.broadcast %cst_81 : f32 to vector<8x64xf32>
    %95 = arith.addf %94, %93 : vector<8x64xf32>
    %96 = arith.divf %94, %95 : vector<8x64xf32>
    %97 = arith.mulf %88, %73 : vector<8x64xf32>
    %98 = arith.mulf %82, %90 : vector<8x64xf32>
    %99 = arith.addf %97, %98 : vector<8x64xf32>
    %100 = math.tanh %99 : vector<8x64xf32>
    %101 = arith.mulf %96, %100 : vector<8x64xf32>
    %c0_82 = arith.constant 0 : index
    %c0_83 = arith.constant 0 : index
    %102 = vector.load %arg18[%c0_82, %c0_83] : memref<64x64xf32, #tpu.memory_space<vmem>>, vector<8x64xf32>
    tpu.vector_store %arg18[%c0_82, %c0_83], %101 {strides = array<i32>} : memref<64x64xf32, #tpu.memory_space<vmem>>, vector<8x64xf32>,
    %c8_84 = arith.constant 8 : index
    %c0_85 = arith.constant 0 : index
    %103 = vector.load %arg17[%c8_84, %c0_85] : memref<64x256xf32, #tpu.memory_space<vmem>>, vector<8x256xf32>
    %cst_86 = arith.constant dense<0.000000e+00> : vector<8x256xf32>
    %104 = tpu.matmul %101, %71, %cst_86 {dimension_numbers = #tpu.dot_dimension_numbers<[1], [0], [0], [1], [0, 0, 1, 1], [], []>} : vector<8x64xf32>, vector<64x256xf32>, vector<8x256xf32> -> vector<8x256xf32>
    %105 = arith.addf %103, %104 : vector<8x256xf32>
    %106 = vector.extract_strided_slice %105 {offsets = [0, 0], sizes = [8, 64], strides = [1, 1]} : vector<8x256xf32> to vector<8x64xf32>
    %107 = arith.negf %106 : vector<8x64xf32>
    %108 = math.exp %107 : vector<8x64xf32>
    %cst_87 = arith.constant 1.000000e+00 : f32
    %109 = vector.broadcast %cst_87 : f32 to vector<8x64xf32>
    %110 = arith.addf %109, %108 : vector<8x64xf32>
    %111 = arith.divf %109, %110 : vector<8x64xf32>
    %112 = vector.extract_strided_slice %105 {offsets = [0, 64], sizes = [8, 64], strides = [1, 1]} : vector<8x256xf32> to vector<8x64xf32>
    %113 = arith.negf %112 : vector<8x64xf32>
    %114 = math.exp %113 : vector<8x64xf32>
    %cst_88 = arith.constant 1.000000e+00 : f32
    %115 = vector.broadcast %cst_88 : f32 to vector<8x64xf32>
    %116 = arith.addf %115, %114 : vector<8x64xf32>
    %117 = arith.divf %115, %116 : vector<8x64xf32>
    %118 = vector.extract_strided_slice %105 {offsets = [0, 128], sizes = [8, 64], strides = [1, 1]} : vector<8x256xf32> to vector<8x64xf32>
    %119 = math.tanh %118 : vector<8x64xf32>
    %120 = vector.extract_strided_slice %105 {offsets = [0, 192], sizes = [8, 64], strides = [1, 1]} : vector<8x256xf32> to vector<8x64xf32>
    %121 = arith.negf %120 : vector<8x64xf32>
    %122 = math.exp %121 : vector<8x64xf32>
    %cst_89 = arith.constant 1.000000e+00 : f32
    %123 = vector.broadcast %cst_89 : f32 to vector<8x64xf32>
    %124 = arith.addf %123, %122 : vector<8x64xf32>
    %125 = arith.divf %123, %124 : vector<8x64xf32>
    %126 = arith.mulf %117, %99 : vector<8x64xf32>
    %127 = arith.mulf %111, %119 : vector<8x64xf32>
    %128 = arith.addf %126, %127 : vector<8x64xf32>
    %129 = math.tanh %128 : vector<8x64xf32>
    %130 = arith.mulf %125, %129 : vector<8x64xf32>
    %c8_90 = arith.constant 8 : index
    %c0_91 = arith.constant 0 : index
    %131 = vector.load %arg18[%c8_90, %c0_91] : memref<64x64xf32, #tpu.memory_space<vmem>>, vector<8x64xf32>
    tpu.vector_store %arg18[%c8_90, %c0_91], %130 {strides = array<i32>} : memref<64x64xf32, #tpu.memory_space<vmem>>, vector<8x64xf32>,
    %c16_92 = arith.constant 16 : index
    %c0_93 = arith.constant 0 : index
    %132 = vector.load %arg17[%c16_92, %c0_93] : memref<64x256xf32, #tpu.memory_space<vmem>>, vector<8x256xf32>
    %cst_94 = arith.constant dense<0.000000e+00> : vector<8x256xf32>
    %133 = tpu.matmul %130, %71, %cst_94 {dimension_numbers = #tpu.dot_dimension_numbers<[1], [0], [0], [1], [0, 0, 1, 1], [], []>} : vector<8x64xf32>, vector<64x256xf32>, vector<8x256xf32> -> vector<8x256xf32>
    %134 = arith.addf %132, %133 : vector<8x256xf32>
    %135 = vector.extract_strided_slice %134 {offsets = [0, 0], sizes = [8, 64], strides = [1, 1]} : vector<8x256xf32> to vector<8x64xf32>
    %136 = arith.negf %135 : vector<8x64xf32>
    %137 = math.exp %136 : vector<8x64xf32>
    %cst_95 = arith.constant 1.000000e+00 : f32
    %138 = vector.broadcast %cst_95 : f32 to vector<8x64xf32>
    %139 = arith.addf %138, %137 : vector<8x64xf32>
    %140 = arith.divf %138, %139 : vector<8x64xf32>
    %141 = vector.extract_strided_slice %134 {offsets = [0, 64], sizes = [8, 64], strides = [1, 1]} : vector<8x256xf32> to vector<8x64xf32>
    %142 = arith.negf %141 : vector<8x64xf32>
    %143 = math.exp %142 : vector<8x64xf32>
    %cst_96 = arith.constant 1.000000e+00 : f32
    %144 = vector.broadcast %cst_96 : f32 to vector<8x64xf32>
    %145 = arith.addf %144, %143 : vector<8x64xf32>
    %146 = arith.divf %144, %145 : vector<8x64xf32>
    %147 = vector.extract_strided_slice %134 {offsets = [0, 128], sizes = [8, 64], strides = [1, 1]} : vector<8x256xf32> to vector<8x64xf32>
    %148 = math.tanh %147 : vector<8x64xf32>
    %149 = vector.extract_strided_slice %134 {offsets = [0, 192], sizes = [8, 64], strides = [1, 1]} : vector<8x256xf32> to vector<8x64xf32>
    %150 = arith.negf %149 : vector<8x64xf32>
    %151 = math.exp %150 : vector<8x64xf32>
    %cst_97 = arith.constant 1.000000e+00 : f32
    %152 = vector.broadcast %cst_97 : f32 to vector<8x64xf32>
    %153 = arith.addf %152, %151 : vector<8x64xf32>
    %154 = arith.divf %152, %153 : vector<8x64xf32>
    %155 = arith.mulf %146, %128 : vector<8x64xf32>
    %156 = arith.mulf %140, %148 : vector<8x64xf32>
    %157 = arith.addf %155, %156 : vector<8x64xf32>
    %158 = math.tanh %157 : vector<8x64xf32>
    %159 = arith.mulf %154, %158 : vector<8x64xf32>
    %c16_98 = arith.constant 16 : index
    %c0_99 = arith.constant 0 : index
    %160 = vector.load %arg18[%c16_98, %c0_99] : memref<64x64xf32, #tpu.memory_space<vmem>>, vector<8x64xf32>
    tpu.vector_store %arg18[%c16_98, %c0_99], %159 {strides = array<i32>} : memref<64x64xf32, #tpu.memory_space<vmem>>, vector<8x64xf32>,
    %c24_100 = arith.constant 24 : index
    %c0_101 = arith.constant 0 : index
    %161 = vector.load %arg17[%c24_100, %c0_101] : memref<64x256xf32, #tpu.memory_space<vmem>>, vector<8x256xf32>
    %cst_102 = arith.constant dense<0.000000e+00> : vector<8x256xf32>
    %162 = tpu.matmul %159, %71, %cst_102 {dimension_numbers = #tpu.dot_dimension_numbers<[1], [0], [0], [1], [0, 0, 1, 1], [], []>} : vector<8x64xf32>, vector<64x256xf32>, vector<8x256xf32> -> vector<8x256xf32>
    %163 = arith.addf %161, %162 : vector<8x256xf32>
    %164 = vector.extract_strided_slice %163 {offsets = [0, 0], sizes = [8, 64], strides = [1, 1]} : vector<8x256xf32> to vector<8x64xf32>
    %165 = arith.negf %164 : vector<8x64xf32>
    %166 = math.exp %165 : vector<8x64xf32>
    %cst_103 = arith.constant 1.000000e+00 : f32
    %167 = vector.broadcast %cst_103 : f32 to vector<8x64xf32>
    %168 = arith.addf %167, %166 : vector<8x64xf32>
    %169 = arith.divf %167, %168 : vector<8x64xf32>
    %170 = vector.extract_strided_slice %163 {offsets = [0, 64], sizes = [8, 64], strides = [1, 1]} : vector<8x256xf32> to vector<8x64xf32>
    %171 = arith.negf %170 : vector<8x64xf32>
    %172 = math.exp %171 : vector<8x64xf32>
    %cst_104 = arith.constant 1.000000e+00 : f32
    %173 = vector.broadcast %cst_104 : f32 to vector<8x64xf32>
    %174 = arith.addf %173, %172 : vector<8x64xf32>
    %175 = arith.divf %173, %174 : vector<8x64xf32>
    %176 = vector.extract_strided_slice %163 {offsets = [0, 128], sizes = [8, 64], strides = [1, 1]} : vector<8x256xf32> to vector<8x64xf32>
    %177 = math.tanh %176 : vector<8x64xf32>
    %178 = vector.extract_strided_slice %163 {offsets = [0, 192], sizes = [8, 64], strides = [1, 1]} : vector<8x256xf32> to vector<8x64xf32>
    %179 = arith.negf %178 : vector<8x64xf32>
    %180 = math.exp %179 : vector<8x64xf32>
    %cst_105 = arith.constant 1.000000e+00 : f32
    %181 = vector.broadcast %cst_105 : f32 to vector<8x64xf32>
    %182 = arith.addf %181, %180 : vector<8x64xf32>
    %183 = arith.divf %181, %182 : vector<8x64xf32>
    %184 = arith.mulf %175, %157 : vector<8x64xf32>
    %185 = arith.mulf %169, %177 : vector<8x64xf32>
    %186 = arith.addf %184, %185 : vector<8x64xf32>
    %187 = math.tanh %186 : vector<8x64xf32>
    %188 = arith.mulf %183, %187 : vector<8x64xf32>
    %c24_106 = arith.constant 24 : index
    %c0_107 = arith.constant 0 : index
    %189 = vector.load %arg18[%c24_106, %c0_107] : memref<64x64xf32, #tpu.memory_space<vmem>>, vector<8x64xf32>
    tpu.vector_store %arg18[%c24_106, %c0_107], %188 {strides = array<i32>} : memref<64x64xf32, #tpu.memory_space<vmem>>, vector<8x64xf32>,
    %c32_108 = arith.constant 32 : index
    %c0_109 = arith.constant 0 : index
    %190 = vector.load %arg17[%c32_108, %c0_109] : memref<64x256xf32, #tpu.memory_space<vmem>>, vector<8x256xf32>
    %cst_110 = arith.constant dense<0.000000e+00> : vector<8x256xf32>
    %191 = tpu.matmul %188, %71, %cst_110 {dimension_numbers = #tpu.dot_dimension_numbers<[1], [0], [0], [1], [0, 0, 1, 1], [], []>} : vector<8x64xf32>, vector<64x256xf32>, vector<8x256xf32> -> vector<8x256xf32>
    %192 = arith.addf %190, %191 : vector<8x256xf32>
    %193 = vector.extract_strided_slice %192 {offsets = [0, 0], sizes = [8, 64], strides = [1, 1]} : vector<8x256xf32> to vector<8x64xf32>
    %194 = arith.negf %193 : vector<8x64xf32>
    %195 = math.exp %194 : vector<8x64xf32>
    %cst_111 = arith.constant 1.000000e+00 : f32
    %196 = vector.broadcast %cst_111 : f32 to vector<8x64xf32>
    %197 = arith.addf %196, %195 : vector<8x64xf32>
    %198 = arith.divf %196, %197 : vector<8x64xf32>
    %199 = vector.extract_strided_slice %192 {offsets = [0, 64], sizes = [8, 64], strides = [1, 1]} : vector<8x256xf32> to vector<8x64xf32>
    %200 = arith.negf %199 : vector<8x64xf32>
    %201 = math.exp %200 : vector<8x64xf32>
    %cst_112 = arith.constant 1.000000e+00 : f32
    %202 = vector.broadcast %cst_112 : f32 to vector<8x64xf32>
    %203 = arith.addf %202, %201 : vector<8x64xf32>
    %204 = arith.divf %202, %203 : vector<8x64xf32>
    %205 = vector.extract_strided_slice %192 {offsets = [0, 128], sizes = [8, 64], strides = [1, 1]} : vector<8x256xf32> to vector<8x64xf32>
    %206 = math.tanh %205 : vector<8x64xf32>
    %207 = vector.extract_strided_slice %192 {offsets = [0, 192], sizes = [8, 64], strides = [1, 1]} : vector<8x256xf32> to vector<8x64xf32>
    %208 = arith.negf %207 : vector<8x64xf32>
    %209 = math.exp %208 : vector<8x64xf32>
    %cst_113 = arith.constant 1.000000e+00 : f32
    %210 = vector.broadcast %cst_113 : f32 to vector<8x64xf32>
    %211 = arith.addf %210, %209 : vector<8x64xf32>
    %212 = arith.divf %210, %211 : vector<8x64xf32>
    %213 = arith.mulf %204, %186 : vector<8x64xf32>
    %214 = arith.mulf %198, %206 : vector<8x64xf32>
    %215 = arith.addf %213, %214 : vector<8x64xf32>
    %216 = math.tanh %215 : vector<8x64xf32>
    %217 = arith.mulf %212, %216 : vector<8x64xf32>
    %c32_114 = arith.constant 32 : index
    %c0_115 = arith.constant 0 : index
    %218 = vector.load %arg18[%c32_114, %c0_115] : memref<64x64xf32, #tpu.memory_space<vmem>>, vector<8x64xf32>
    tpu.vector_store %arg18[%c32_114, %c0_115], %217 {strides = array<i32>} : memref<64x64xf32, #tpu.memory_space<vmem>>, vector<8x64xf32>,
    %c40_116 = arith.constant 40 : index
    %c0_117 = arith.constant 0 : index
    %219 = vector.load %arg17[%c40_116, %c0_117] : memref<64x256xf32, #tpu.memory_space<vmem>>, vector<8x256xf32>
    %cst_118 = arith.constant dense<0.000000e+00> : vector<8x256xf32>
    %220 = tpu.matmul %217, %71, %cst_118 {dimension_numbers = #tpu.dot_dimension_numbers<[1], [0], [0], [1], [0, 0, 1, 1], [], []>} : vector<8x64xf32>, vector<64x256xf32>, vector<8x256xf32> -> vector<8x256xf32>
    %221 = arith.addf %219, %220 : vector<8x256xf32>
    %222 = vector.extract_strided_slice %221 {offsets = [0, 0], sizes = [8, 64], strides = [1, 1]} : vector<8x256xf32> to vector<8x64xf32>
    %223 = arith.negf %222 : vector<8x64xf32>
    %224 = math.exp %223 : vector<8x64xf32>
    %cst_119 = arith.constant 1.000000e+00 : f32
    %225 = vector.broadcast %cst_119 : f32 to vector<8x64xf32>
    %226 = arith.addf %225, %224 : vector<8x64xf32>
    %227 = arith.divf %225, %226 : vector<8x64xf32>
    %228 = vector.extract_strided_slice %221 {offsets = [0, 64], sizes = [8, 64], strides = [1, 1]} : vector<8x256xf32> to vector<8x64xf32>
    %229 = arith.negf %228 : vector<8x64xf32>
    %230 = math.exp %229 : vector<8x64xf32>
    %cst_120 = arith.constant 1.000000e+00 : f32
    %231 = vector.broadcast %cst_120 : f32 to vector<8x64xf32>
    %232 = arith.addf %231, %230 : vector<8x64xf32>
    %233 = arith.divf %231, %232 : vector<8x64xf32>
    %234 = vector.extract_strided_slice %221 {offsets = [0, 128], sizes = [8, 64], strides = [1, 1]} : vector<8x256xf32> to vector<8x64xf32>
    %235 = math.tanh %234 : vector<8x64xf32>
    %236 = vector.extract_strided_slice %221 {offsets = [0, 192], sizes = [8, 64], strides = [1, 1]} : vector<8x256xf32> to vector<8x64xf32>
    %237 = arith.negf %236 : vector<8x64xf32>
    %238 = math.exp %237 : vector<8x64xf32>
    %cst_121 = arith.constant 1.000000e+00 : f32
    %239 = vector.broadcast %cst_121 : f32 to vector<8x64xf32>
    %240 = arith.addf %239, %238 : vector<8x64xf32>
    %241 = arith.divf %239, %240 : vector<8x64xf32>
    %242 = arith.mulf %233, %215 : vector<8x64xf32>
    %243 = arith.mulf %227, %235 : vector<8x64xf32>
    %244 = arith.addf %242, %243 : vector<8x64xf32>
    %245 = math.tanh %244 : vector<8x64xf32>
    %246 = arith.mulf %241, %245 : vector<8x64xf32>
    %c40_122 = arith.constant 40 : index
    %c0_123 = arith.constant 0 : index
    %247 = vector.load %arg18[%c40_122, %c0_123] : memref<64x64xf32, #tpu.memory_space<vmem>>, vector<8x64xf32>
    tpu.vector_store %arg18[%c40_122, %c0_123], %246 {strides = array<i32>} : memref<64x64xf32, #tpu.memory_space<vmem>>, vector<8x64xf32>,
    %c48_124 = arith.constant 48 : index
    %c0_125 = arith.constant 0 : index
    %248 = vector.load %arg17[%c48_124, %c0_125] : memref<64x256xf32, #tpu.memory_space<vmem>>, vector<8x256xf32>
    %cst_126 = arith.constant dense<0.000000e+00> : vector<8x256xf32>
    %249 = tpu.matmul %246, %71, %cst_126 {dimension_numbers = #tpu.dot_dimension_numbers<[1], [0], [0], [1], [0, 0, 1, 1], [], []>} : vector<8x64xf32>, vector<64x256xf32>, vector<8x256xf32> -> vector<8x256xf32>
    %250 = arith.addf %248, %249 : vector<8x256xf32>
    %251 = vector.extract_strided_slice %250 {offsets = [0, 0], sizes = [8, 64], strides = [1, 1]} : vector<8x256xf32> to vector<8x64xf32>
    %252 = arith.negf %251 : vector<8x64xf32>
    %253 = math.exp %252 : vector<8x64xf32>
    %cst_127 = arith.constant 1.000000e+00 : f32
    %254 = vector.broadcast %cst_127 : f32 to vector<8x64xf32>
    %255 = arith.addf %254, %253 : vector<8x64xf32>
    %256 = arith.divf %254, %255 : vector<8x64xf32>
    %257 = vector.extract_strided_slice %250 {offsets = [0, 64], sizes = [8, 64], strides = [1, 1]} : vector<8x256xf32> to vector<8x64xf32>
    %258 = arith.negf %257 : vector<8x64xf32>
    %259 = math.exp %258 : vector<8x64xf32>
    %cst_128 = arith.constant 1.000000e+00 : f32
    %260 = vector.broadcast %cst_128 : f32 to vector<8x64xf32>
    %261 = arith.addf %260, %259 : vector<8x64xf32>
    %262 = arith.divf %260, %261 : vector<8x64xf32>
    %263 = vector.extract_strided_slice %250 {offsets = [0, 128], sizes = [8, 64], strides = [1, 1]} : vector<8x256xf32> to vector<8x64xf32>
    %264 = math.tanh %263 : vector<8x64xf32>
    %265 = vector.extract_strided_slice %250 {offsets = [0, 192], sizes = [8, 64], strides = [1, 1]} : vector<8x256xf32> to vector<8x64xf32>
    %266 = arith.negf %265 : vector<8x64xf32>
    %267 = math.exp %266 : vector<8x64xf32>
    %cst_129 = arith.constant 1.000000e+00 : f32
    %268 = vector.broadcast %cst_129 : f32 to vector<8x64xf32>
    %269 = arith.addf %268, %267 : vector<8x64xf32>
    %270 = arith.divf %268, %269 : vector<8x64xf32>
    %271 = arith.mulf %262, %244 : vector<8x64xf32>
    %272 = arith.mulf %256, %264 : vector<8x64xf32>
    %273 = arith.addf %271, %272 : vector<8x64xf32>
    %274 = math.tanh %273 : vector<8x64xf32>
    %275 = arith.mulf %270, %274 : vector<8x64xf32>
    %c48_130 = arith.constant 48 : index
    %c0_131 = arith.constant 0 : index
    %276 = vector.load %arg18[%c48_130, %c0_131] : memref<64x64xf32, #tpu.memory_space<vmem>>, vector<8x64xf32>
    tpu.vector_store %arg18[%c48_130, %c0_131], %275 {strides = array<i32>} : memref<64x64xf32, #tpu.memory_space<vmem>>, vector<8x64xf32>,
    %c56_132 = arith.constant 56 : index
    %c0_133 = arith.constant 0 : index
    %277 = vector.load %arg17[%c56_132, %c0_133] : memref<64x256xf32, #tpu.memory_space<vmem>>, vector<8x256xf32>
    %cst_134 = arith.constant dense<0.000000e+00> : vector<8x256xf32>
    %278 = tpu.matmul %275, %71, %cst_134 {dimension_numbers = #tpu.dot_dimension_numbers<[1], [0], [0], [1], [0, 0, 1, 1], [], []>} : vector<8x64xf32>, vector<64x256xf32>, vector<8x256xf32> -> vector<8x256xf32>
    %279 = arith.addf %277, %278 : vector<8x256xf32>
    %280 = vector.extract_strided_slice %279 {offsets = [0, 0], sizes = [8, 64], strides = [1, 1]} : vector<8x256xf32> to vector<8x64xf32>
    %281 = arith.negf %280 : vector<8x64xf32>
    %282 = math.exp %281 : vector<8x64xf32>
    %cst_135 = arith.constant 1.000000e+00 : f32
    %283 = vector.broadcast %cst_135 : f32 to vector<8x64xf32>
    %284 = arith.addf %283, %282 : vector<8x64xf32>
    %285 = arith.divf %283, %284 : vector<8x64xf32>
    %286 = vector.extract_strided_slice %279 {offsets = [0, 64], sizes = [8, 64], strides = [1, 1]} : vector<8x256xf32> to vector<8x64xf32>
    %287 = arith.negf %286 : vector<8x64xf32>
    %288 = math.exp %287 : vector<8x64xf32>
    %cst_136 = arith.constant 1.000000e+00 : f32
    %289 = vector.broadcast %cst_136 : f32 to vector<8x64xf32>
    %290 = arith.addf %289, %288 : vector<8x64xf32>
    %291 = arith.divf %289, %290 : vector<8x64xf32>
    %292 = vector.extract_strided_slice %279 {offsets = [0, 128], sizes = [8, 64], strides = [1, 1]} : vector<8x256xf32> to vector<8x64xf32>
    %293 = math.tanh %292 : vector<8x64xf32>
    %294 = vector.extract_strided_slice %279 {offsets = [0, 192], sizes = [8, 64], strides = [1, 1]} : vector<8x256xf32> to vector<8x64xf32>
    %295 = arith.negf %294 : vector<8x64xf32>
    %296 = math.exp %295 : vector<8x64xf32>
    %cst_137 = arith.constant 1.000000e+00 : f32
    %297 = vector.broadcast %cst_137 : f32 to vector<8x64xf32>
    %298 = arith.addf %297, %296 : vector<8x64xf32>
    %299 = arith.divf %297, %298 : vector<8x64xf32>
    %300 = arith.mulf %291, %273 : vector<8x64xf32>
    %301 = arith.mulf %285, %293 : vector<8x64xf32>
    %302 = arith.addf %300, %301 : vector<8x64xf32>
    %303 = math.tanh %302 : vector<8x64xf32>
    %304 = arith.mulf %299, %303 : vector<8x64xf32>
    %c56_138 = arith.constant 56 : index
    %c0_139 = arith.constant 0 : index
    %305 = vector.load %arg18[%c56_138, %c0_139] : memref<64x64xf32, #tpu.memory_space<vmem>>, vector<8x64xf32>
    tpu.vector_store %arg18[%c56_138, %c0_139], %304 {strides = array<i32>} : memref<64x64xf32, #tpu.memory_space<vmem>>, vector<8x64xf32>,
    %c0_140 = arith.constant 0 : index
    %c0_141 = arith.constant 0 : index
    %306 = vector.load %arg9[%c0_140, %c0_141] : memref<64x256xf32, #tpu.memory_space<vmem>>, vector<64x256xf32>
    %c0_142 = arith.constant 0 : index
    %c0_143 = arith.constant 0 : index
    %307 = vector.load %arg10[%c0_142, %c0_143] : memref<64x256xf32, #tpu.memory_space<vmem>>, vector<64x256xf32>
    %c0_144 = arith.constant 0 : index
    %c0_145 = arith.constant 0 : index
    %308 = vector.load %arg11[%c0_144, %c0_145] : memref<1x256xf32, #tpu.memory_space<vmem>>, vector<1x256xf32>
    %c0_146 = arith.constant 0 : index
    %c0_147 = arith.constant 0 : index
    %309 = vector.load %arg18[%c0_146, %c0_147] : memref<64x64xf32, #tpu.memory_space<vmem>>, vector<8x64xf32>
    %cst_148 = arith.constant dense<0.000000e+00> : vector<8x256xf32>
    %310 = tpu.matmul %309, %306, %cst_148 {dimension_numbers = #tpu.dot_dimension_numbers<[1], [0], [0], [1], [0, 0, 1, 1], [], []>} : vector<8x64xf32>, vector<64x256xf32>, vector<8x256xf32> -> vector<8x256xf32>
    %c56_149 = arith.constant 56 : index
    %c0_150 = arith.constant 0 : index
    %311 = vector.load %arg18[%c56_149, %c0_150] : memref<64x64xf32, #tpu.memory_space<vmem>>, vector<8x64xf32>
    %cst_151 = arith.constant dense<0.000000e+00> : vector<8x256xf32>
    %312 = tpu.matmul %311, %307, %cst_151 {dimension_numbers = #tpu.dot_dimension_numbers<[1], [0], [0], [1], [0, 0, 1, 1], [], []>} : vector<8x64xf32>, vector<64x256xf32>, vector<8x256xf32> -> vector<8x256xf32>
    %313 = arith.addf %310, %312 : vector<8x256xf32>
    %314 = vector.broadcast %308 : vector<1x256xf32> to vector<8x256xf32>
    %315 = arith.addf %313, %314 : vector<8x256xf32>
    %c0_152 = arith.constant 0 : index
    %c0_153 = arith.constant 0 : index
    %316 = vector.load %arg17[%c0_152, %c0_153] : memref<64x256xf32, #tpu.memory_space<vmem>>, vector<8x256xf32>
    tpu.vector_store %arg17[%c0_152, %c0_153], %315 {strides = array<i32>} : memref<64x256xf32, #tpu.memory_space<vmem>>, vector<8x256xf32>,
    %c8_154 = arith.constant 8 : index
    %c0_155 = arith.constant 0 : index
    %317 = vector.load %arg18[%c8_154, %c0_155] : memref<64x64xf32, #tpu.memory_space<vmem>>, vector<8x64xf32>
    %cst_156 = arith.constant dense<0.000000e+00> : vector<8x256xf32>
    %318 = tpu.matmul %317, %306, %cst_156 {dimension_numbers = #tpu.dot_dimension_numbers<[1], [0], [0], [1], [0, 0, 1, 1], [], []>} : vector<8x64xf32>, vector<64x256xf32>, vector<8x256xf32> -> vector<8x256xf32>
    %c48_157 = arith.constant 48 : index
    %c0_158 = arith.constant 0 : index
    %319 = vector.load %arg18[%c48_157, %c0_158] : memref<64x64xf32, #tpu.memory_space<vmem>>, vector<8x64xf32>
    %cst_159 = arith.constant dense<0.000000e+00> : vector<8x256xf32>
    %320 = tpu.matmul %319, %307, %cst_159 {dimension_numbers = #tpu.dot_dimension_numbers<[1], [0], [0], [1], [0, 0, 1, 1], [], []>} : vector<8x64xf32>, vector<64x256xf32>, vector<8x256xf32> -> vector<8x256xf32>
    %321 = arith.addf %318, %320 : vector<8x256xf32>
    %322 = vector.broadcast %308 : vector<1x256xf32> to vector<8x256xf32>
    %323 = arith.addf %321, %322 : vector<8x256xf32>
    %c8_160 = arith.constant 8 : index
    %c0_161 = arith.constant 0 : index
    %324 = vector.load %arg17[%c8_160, %c0_161] : memref<64x256xf32, #tpu.memory_space<vmem>>, vector<8x256xf32>
    tpu.vector_store %arg17[%c8_160, %c0_161], %323 {strides = array<i32>} : memref<64x256xf32, #tpu.memory_space<vmem>>, vector<8x256xf32>,
    %c16_162 = arith.constant 16 : index
    %c0_163 = arith.constant 0 : index
    %325 = vector.load %arg18[%c16_162, %c0_163] : memref<64x64xf32, #tpu.memory_space<vmem>>, vector<8x64xf32>
    %cst_164 = arith.constant dense<0.000000e+00> : vector<8x256xf32>
    %326 = tpu.matmul %325, %306, %cst_164 {dimension_numbers = #tpu.dot_dimension_numbers<[1], [0], [0], [1], [0, 0, 1, 1], [], []>} : vector<8x64xf32>, vector<64x256xf32>, vector<8x256xf32> -> vector<8x256xf32>
    %c40_165 = arith.constant 40 : index
    %c0_166 = arith.constant 0 : index
    %327 = vector.load %arg18[%c40_165, %c0_166] : memref<64x64xf32, #tpu.memory_space<vmem>>, vector<8x64xf32>
    %cst_167 = arith.constant dense<0.000000e+00> : vector<8x256xf32>
    %328 = tpu.matmul %327, %307, %cst_167 {dimension_numbers = #tpu.dot_dimension_numbers<[1], [0], [0], [1], [0, 0, 1, 1], [], []>} : vector<8x64xf32>, vector<64x256xf32>, vector<8x256xf32> -> vector<8x256xf32>
    %329 = arith.addf %326, %328 : vector<8x256xf32>
    %330 = vector.broadcast %308 : vector<1x256xf32> to vector<8x256xf32>
    %331 = arith.addf %329, %330 : vector<8x256xf32>
    %c16_168 = arith.constant 16 : index
    %c0_169 = arith.constant 0 : index
    %332 = vector.load %arg17[%c16_168, %c0_169] : memref<64x256xf32, #tpu.memory_space<vmem>>, vector<8x256xf32>
    tpu.vector_store %arg17[%c16_168, %c0_169], %331 {strides = array<i32>} : memref<64x256xf32, #tpu.memory_space<vmem>>, vector<8x256xf32>,
    %c24_170 = arith.constant 24 : index
    %c0_171 = arith.constant 0 : index
    %333 = vector.load %arg18[%c24_170, %c0_171] : memref<64x64xf32, #tpu.memory_space<vmem>>, vector<8x64xf32>
    %cst_172 = arith.constant dense<0.000000e+00> : vector<8x256xf32>
    %334 = tpu.matmul %333, %306, %cst_172 {dimension_numbers = #tpu.dot_dimension_numbers<[1], [0], [0], [1], [0, 0, 1, 1], [], []>} : vector<8x64xf32>, vector<64x256xf32>, vector<8x256xf32> -> vector<8x256xf32>
    %c32_173 = arith.constant 32 : index
    %c0_174 = arith.constant 0 : index
    %335 = vector.load %arg18[%c32_173, %c0_174] : memref<64x64xf32, #tpu.memory_space<vmem>>, vector<8x64xf32>
    %cst_175 = arith.constant dense<0.000000e+00> : vector<8x256xf32>
    %336 = tpu.matmul %335, %307, %cst_175 {dimension_numbers = #tpu.dot_dimension_numbers<[1], [0], [0], [1], [0, 0, 1, 1], [], []>} : vector<8x64xf32>, vector<64x256xf32>, vector<8x256xf32> -> vector<8x256xf32>
    %337 = arith.addf %334, %336 : vector<8x256xf32>
    %338 = vector.broadcast %308 : vector<1x256xf32> to vector<8x256xf32>
    %339 = arith.addf %337, %338 : vector<8x256xf32>
    %c24_176 = arith.constant 24 : index
    %c0_177 = arith.constant 0 : index
    %340 = vector.load %arg17[%c24_176, %c0_177] : memref<64x256xf32, #tpu.memory_space<vmem>>, vector<8x256xf32>
    tpu.vector_store %arg17[%c24_176, %c0_177], %339 {strides = array<i32>} : memref<64x256xf32, #tpu.memory_space<vmem>>, vector<8x256xf32>,
    %c32_178 = arith.constant 32 : index
    %c0_179 = arith.constant 0 : index
    %341 = vector.load %arg18[%c32_178, %c0_179] : memref<64x64xf32, #tpu.memory_space<vmem>>, vector<8x64xf32>
    %cst_180 = arith.constant dense<0.000000e+00> : vector<8x256xf32>
    %342 = tpu.matmul %341, %306, %cst_180 {dimension_numbers = #tpu.dot_dimension_numbers<[1], [0], [0], [1], [0, 0, 1, 1], [], []>} : vector<8x64xf32>, vector<64x256xf32>, vector<8x256xf32> -> vector<8x256xf32>
    %c24_181 = arith.constant 24 : index
    %c0_182 = arith.constant 0 : index
    %343 = vector.load %arg18[%c24_181, %c0_182] : memref<64x64xf32, #tpu.memory_space<vmem>>, vector<8x64xf32>
    %cst_183 = arith.constant dense<0.000000e+00> : vector<8x256xf32>
    %344 = tpu.matmul %343, %307, %cst_183 {dimension_numbers = #tpu.dot_dimension_numbers<[1], [0], [0], [1], [0, 0, 1, 1], [], []>} : vector<8x64xf32>, vector<64x256xf32>, vector<8x256xf32> -> vector<8x256xf32>
    %345 = arith.addf %342, %344 : vector<8x256xf32>
    %346 = vector.broadcast %308 : vector<1x256xf32> to vector<8x256xf32>
    %347 = arith.addf %345, %346 : vector<8x256xf32>
    %c32_184 = arith.constant 32 : index
    %c0_185 = arith.constant 0 : index
    %348 = vector.load %arg17[%c32_184, %c0_185] : memref<64x256xf32, #tpu.memory_space<vmem>>, vector<8x256xf32>
    tpu.vector_store %arg17[%c32_184, %c0_185], %347 {strides = array<i32>} : memref<64x256xf32, #tpu.memory_space<vmem>>, vector<8x256xf32>,
    %c40_186 = arith.constant 40 : index
    %c0_187 = arith.constant 0 : index
    %349 = vector.load %arg18[%c40_186, %c0_187] : memref<64x64xf32, #tpu.memory_space<vmem>>, vector<8x64xf32>
    %cst_188 = arith.constant dense<0.000000e+00> : vector<8x256xf32>
    %350 = tpu.matmul %349, %306, %cst_188 {dimension_numbers = #tpu.dot_dimension_numbers<[1], [0], [0], [1], [0, 0, 1, 1], [], []>} : vector<8x64xf32>, vector<64x256xf32>, vector<8x256xf32> -> vector<8x256xf32>
    %c16_189 = arith.constant 16 : index
    %c0_190 = arith.constant 0 : index
    %351 = vector.load %arg18[%c16_189, %c0_190] : memref<64x64xf32, #tpu.memory_space<vmem>>, vector<8x64xf32>
    %cst_191 = arith.constant dense<0.000000e+00> : vector<8x256xf32>
    %352 = tpu.matmul %351, %307, %cst_191 {dimension_numbers = #tpu.dot_dimension_numbers<[1], [0], [0], [1], [0, 0, 1, 1], [], []>} : vector<8x64xf32>, vector<64x256xf32>, vector<8x256xf32> -> vector<8x256xf32>
    %353 = arith.addf %350, %352 : vector<8x256xf32>
    %354 = vector.broadcast %308 : vector<1x256xf32> to vector<8x256xf32>
    %355 = arith.addf %353, %354 : vector<8x256xf32>
    %c40_192 = arith.constant 40 : index
    %c0_193 = arith.constant 0 : index
    %356 = vector.load %arg17[%c40_192, %c0_193] : memref<64x256xf32, #tpu.memory_space<vmem>>, vector<8x256xf32>
    tpu.vector_store %arg17[%c40_192, %c0_193], %355 {strides = array<i32>} : memref<64x256xf32, #tpu.memory_space<vmem>>, vector<8x256xf32>,
    %c48_194 = arith.constant 48 : index
    %c0_195 = arith.constant 0 : index
    %357 = vector.load %arg18[%c48_194, %c0_195] : memref<64x64xf32, #tpu.memory_space<vmem>>, vector<8x64xf32>
    %cst_196 = arith.constant dense<0.000000e+00> : vector<8x256xf32>
    %358 = tpu.matmul %357, %306, %cst_196 {dimension_numbers = #tpu.dot_dimension_numbers<[1], [0], [0], [1], [0, 0, 1, 1], [], []>} : vector<8x64xf32>, vector<64x256xf32>, vector<8x256xf32> -> vector<8x256xf32>
    %c8_197 = arith.constant 8 : index
    %c0_198 = arith.constant 0 : index
    %359 = vector.load %arg18[%c8_197, %c0_198] : memref<64x64xf32, #tpu.memory_space<vmem>>, vector<8x64xf32>
    %cst_199 = arith.constant dense<0.000000e+00> : vector<8x256xf32>
    %360 = tpu.matmul %359, %307, %cst_199 {dimension_numbers = #tpu.dot_dimension_numbers<[1], [0], [0], [1], [0, 0, 1, 1], [], []>} : vector<8x64xf32>, vector<64x256xf32>, vector<8x256xf32> -> vector<8x256xf32>
    %361 = arith.addf %358, %360 : vector<8x256xf32>
    %362 = vector.broadcast %308 : vector<1x256xf32> to vector<8x256xf32>
    %363 = arith.addf %361, %362 : vector<8x256xf32>
    %c48_200 = arith.constant 48 : index
    %c0_201 = arith.constant 0 : index
    %364 = vector.load %arg17[%c48_200, %c0_201] : memref<64x256xf32, #tpu.memory_space<vmem>>, vector<8x256xf32>
    tpu.vector_store %arg17[%c48_200, %c0_201], %363 {strides = array<i32>} : memref<64x256xf32, #tpu.memory_space<vmem>>, vector<8x256xf32>,
    %c56_202 = arith.constant 56 : index
    %c0_203 = arith.constant 0 : index
    %365 = vector.load %arg18[%c56_202, %c0_203] : memref<64x64xf32, #tpu.memory_space<vmem>>, vector<8x64xf32>
    %cst_204 = arith.constant dense<0.000000e+00> : vector<8x256xf32>
    %366 = tpu.matmul %365, %306, %cst_204 {dimension_numbers = #tpu.dot_dimension_numbers<[1], [0], [0], [1], [0, 0, 1, 1], [], []>} : vector<8x64xf32>, vector<64x256xf32>, vector<8x256xf32> -> vector<8x256xf32>
    %c0_205 = arith.constant 0 : index
    %c0_206 = arith.constant 0 : index
    %367 = vector.load %arg18[%c0_205, %c0_206] : memref<64x64xf32, #tpu.memory_space<vmem>>, vector<8x64xf32>
    %cst_207 = arith.constant dense<0.000000e+00> : vector<8x256xf32>
    %368 = tpu.matmul %367, %307, %cst_207 {dimension_numbers = #tpu.dot_dimension_numbers<[1], [0], [0], [1], [0, 0, 1, 1], [], []>} : vector<8x64xf32>, vector<64x256xf32>, vector<8x256xf32> -> vector<8x256xf32>
    %369 = arith.addf %366, %368 : vector<8x256xf32>
    %370 = vector.broadcast %308 : vector<1x256xf32> to vector<8x256xf32>
    %371 = arith.addf %369, %370 : vector<8x256xf32>
    %c56_208 = arith.constant 56 : index
    %c0_209 = arith.constant 0 : index
    %372 = vector.load %arg17[%c56_208, %c0_209] : memref<64x256xf32, #tpu.memory_space<vmem>>, vector<8x256xf32>
    tpu.vector_store %arg17[%c56_208, %c0_209], %371 {strides = array<i32>} : memref<64x256xf32, #tpu.memory_space<vmem>>, vector<8x256xf32>,
    %c0_210 = arith.constant 0 : index
    %c0_211 = arith.constant 0 : index
    %373 = vector.load %arg12[%c0_210, %c0_211] : memref<64x256xf32, #tpu.memory_space<vmem>>, vector<64x256xf32>
    %cst_212 = arith.constant 0.000000e+00 : f32
    %374 = vector.broadcast %cst_212 : f32 to vector<8x64xf32>
    %cst_213 = arith.constant 0.000000e+00 : f32
    %375 = vector.broadcast %cst_213 : f32 to vector<8x64xf32>
    %c0_214 = arith.constant 0 : index
    %c0_215 = arith.constant 0 : index
    %376 = vector.load %arg17[%c0_214, %c0_215] : memref<64x256xf32, #tpu.memory_space<vmem>>, vector<8x256xf32>
    %cst_216 = arith.constant dense<0.000000e+00> : vector<8x256xf32>
    %377 = tpu.matmul %374, %373, %cst_216 {dimension_numbers = #tpu.dot_dimension_numbers<[1], [0], [0], [1], [0, 0, 1, 1], [], []>} : vector<8x64xf32>, vector<64x256xf32>, vector<8x256xf32> -> vector<8x256xf32>
    %378 = arith.addf %376, %377 : vector<8x256xf32>
    %379 = vector.extract_strided_slice %378 {offsets = [0, 0], sizes = [8, 64], strides = [1, 1]} : vector<8x256xf32> to vector<8x64xf32>
    %380 = arith.negf %379 : vector<8x64xf32>
    %381 = math.exp %380 : vector<8x64xf32>
    %cst_217 = arith.constant 1.000000e+00 : f32
    %382 = vector.broadcast %cst_217 : f32 to vector<8x64xf32>
    %383 = arith.addf %382, %381 : vector<8x64xf32>
    %384 = arith.divf %382, %383 : vector<8x64xf32>
    %385 = vector.extract_strided_slice %378 {offsets = [0, 64], sizes = [8, 64], strides = [1, 1]} : vector<8x256xf32> to vector<8x64xf32>
    %386 = arith.negf %385 : vector<8x64xf32>
    %387 = math.exp %386 : vector<8x64xf32>
    %cst_218 = arith.constant 1.000000e+00 : f32
    %388 = vector.broadcast %cst_218 : f32 to vector<8x64xf32>
    %389 = arith.addf %388, %387 : vector<8x64xf32>
    %390 = arith.divf %388, %389 : vector<8x64xf32>
    %391 = vector.extract_strided_slice %378 {offsets = [0, 128], sizes = [8, 64], strides = [1, 1]} : vector<8x256xf32> to vector<8x64xf32>
    %392 = math.tanh %391 : vector<8x64xf32>
    %393 = vector.extract_strided_slice %378 {offsets = [0, 192], sizes = [8, 64], strides = [1, 1]} : vector<8x256xf32> to vector<8x64xf32>
    %394 = arith.negf %393 : vector<8x64xf32>
    %395 = math.exp %394 : vector<8x64xf32>
    %cst_219 = arith.constant 1.000000e+00 : f32
    %396 = vector.broadcast %cst_219 : f32 to vector<8x64xf32>
    %397 = arith.addf %396, %395 : vector<8x64xf32>
    %398 = arith.divf %396, %397 : vector<8x64xf32>
    %399 = arith.mulf %390, %375 : vector<8x64xf32>
    %400 = arith.mulf %384, %392 : vector<8x64xf32>
    %401 = arith.addf %399, %400 : vector<8x64xf32>
    %402 = math.tanh %401 : vector<8x64xf32>
    %403 = arith.mulf %398, %402 : vector<8x64xf32>
    %c0_220 = arith.constant 0 : index
    %c0_221 = arith.constant 0 : index
    %404 = vector.load %arg19[%c0_220, %c0_221] : memref<64x64xf32, #tpu.memory_space<vmem>>, vector<8x64xf32>
    tpu.vector_store %arg19[%c0_220, %c0_221], %403 {strides = array<i32>} : memref<64x64xf32, #tpu.memory_space<vmem>>, vector<8x64xf32>,
    %c8_222 = arith.constant 8 : index
    %c0_223 = arith.constant 0 : index
    %405 = vector.load %arg17[%c8_222, %c0_223] : memref<64x256xf32, #tpu.memory_space<vmem>>, vector<8x256xf32>
    %cst_224 = arith.constant dense<0.000000e+00> : vector<8x256xf32>
    %406 = tpu.matmul %403, %373, %cst_224 {dimension_numbers = #tpu.dot_dimension_numbers<[1], [0], [0], [1], [0, 0, 1, 1], [], []>} : vector<8x64xf32>, vector<64x256xf32>, vector<8x256xf32> -> vector<8x256xf32>
    %407 = arith.addf %405, %406 : vector<8x256xf32>
    %408 = vector.extract_strided_slice %407 {offsets = [0, 0], sizes = [8, 64], strides = [1, 1]} : vector<8x256xf32> to vector<8x64xf32>
    %409 = arith.negf %408 : vector<8x64xf32>
    %410 = math.exp %409 : vector<8x64xf32>
    %cst_225 = arith.constant 1.000000e+00 : f32
    %411 = vector.broadcast %cst_225 : f32 to vector<8x64xf32>
    %412 = arith.addf %411, %410 : vector<8x64xf32>
    %413 = arith.divf %411, %412 : vector<8x64xf32>
    %414 = vector.extract_strided_slice %407 {offsets = [0, 64], sizes = [8, 64], strides = [1, 1]} : vector<8x256xf32> to vector<8x64xf32>
    %415 = arith.negf %414 : vector<8x64xf32>
    %416 = math.exp %415 : vector<8x64xf32>
    %cst_226 = arith.constant 1.000000e+00 : f32
    %417 = vector.broadcast %cst_226 : f32 to vector<8x64xf32>
    %418 = arith.addf %417, %416 : vector<8x64xf32>
    %419 = arith.divf %417, %418 : vector<8x64xf32>
    %420 = vector.extract_strided_slice %407 {offsets = [0, 128], sizes = [8, 64], strides = [1, 1]} : vector<8x256xf32> to vector<8x64xf32>
    %421 = math.tanh %420 : vector<8x64xf32>
    %422 = vector.extract_strided_slice %407 {offsets = [0, 192], sizes = [8, 64], strides = [1, 1]} : vector<8x256xf32> to vector<8x64xf32>
    %423 = arith.negf %422 : vector<8x64xf32>
    %424 = math.exp %423 : vector<8x64xf32>
    %cst_227 = arith.constant 1.000000e+00 : f32
    %425 = vector.broadcast %cst_227 : f32 to vector<8x64xf32>
    %426 = arith.addf %425, %424 : vector<8x64xf32>
    %427 = arith.divf %425, %426 : vector<8x64xf32>
    %428 = arith.mulf %419, %401 : vector<8x64xf32>
    %429 = arith.mulf %413, %421 : vector<8x64xf32>
    %430 = arith.addf %428, %429 : vector<8x64xf32>
    %431 = math.tanh %430 : vector<8x64xf32>
    %432 = arith.mulf %427, %431 : vector<8x64xf32>
    %c8_228 = arith.constant 8 : index
    %c0_229 = arith.constant 0 : index
    %433 = vector.load %arg19[%c8_228, %c0_229] : memref<64x64xf32, #tpu.memory_space<vmem>>, vector<8x64xf32>
    tpu.vector_store %arg19[%c8_228, %c0_229], %432 {strides = array<i32>} : memref<64x64xf32, #tpu.memory_space<vmem>>, vector<8x64xf32>,
    %c16_230 = arith.constant 16 : index
    %c0_231 = arith.constant 0 : index
    %434 = vector.load %arg17[%c16_230, %c0_231] : memref<64x256xf32, #tpu.memory_space<vmem>>, vector<8x256xf32>
    %cst_232 = arith.constant dense<0.000000e+00> : vector<8x256xf32>
    %435 = tpu.matmul %432, %373, %cst_232 {dimension_numbers = #tpu.dot_dimension_numbers<[1], [0], [0], [1], [0, 0, 1, 1], [], []>} : vector<8x64xf32>, vector<64x256xf32>, vector<8x256xf32> -> vector<8x256xf32>
    %436 = arith.addf %434, %435 : vector<8x256xf32>
    %437 = vector.extract_strided_slice %436 {offsets = [0, 0], sizes = [8, 64], strides = [1, 1]} : vector<8x256xf32> to vector<8x64xf32>
    %438 = arith.negf %437 : vector<8x64xf32>
    %439 = math.exp %438 : vector<8x64xf32>
    %cst_233 = arith.constant 1.000000e+00 : f32
    %440 = vector.broadcast %cst_233 : f32 to vector<8x64xf32>
    %441 = arith.addf %440, %439 : vector<8x64xf32>
    %442 = arith.divf %440, %441 : vector<8x64xf32>
    %443 = vector.extract_strided_slice %436 {offsets = [0, 64], sizes = [8, 64], strides = [1, 1]} : vector<8x256xf32> to vector<8x64xf32>
    %444 = arith.negf %443 : vector<8x64xf32>
    %445 = math.exp %444 : vector<8x64xf32>
    %cst_234 = arith.constant 1.000000e+00 : f32
    %446 = vector.broadcast %cst_234 : f32 to vector<8x64xf32>
    %447 = arith.addf %446, %445 : vector<8x64xf32>
    %448 = arith.divf %446, %447 : vector<8x64xf32>
    %449 = vector.extract_strided_slice %436 {offsets = [0, 128], sizes = [8, 64], strides = [1, 1]} : vector<8x256xf32> to vector<8x64xf32>
    %450 = math.tanh %449 : vector<8x64xf32>
    %451 = vector.extract_strided_slice %436 {offsets = [0, 192], sizes = [8, 64], strides = [1, 1]} : vector<8x256xf32> to vector<8x64xf32>
    %452 = arith.negf %451 : vector<8x64xf32>
    %453 = math.exp %452 : vector<8x64xf32>
    %cst_235 = arith.constant 1.000000e+00 : f32
    %454 = vector.broadcast %cst_235 : f32 to vector<8x64xf32>
    %455 = arith.addf %454, %453 : vector<8x64xf32>
    %456 = arith.divf %454, %455 : vector<8x64xf32>
    %457 = arith.mulf %448, %430 : vector<8x64xf32>
    %458 = arith.mulf %442, %450 : vector<8x64xf32>
    %459 = arith.addf %457, %458 : vector<8x64xf32>
    %460 = math.tanh %459 : vector<8x64xf32>
    %461 = arith.mulf %456, %460 : vector<8x64xf32>
    %c16_236 = arith.constant 16 : index
    %c0_237 = arith.constant 0 : index
    %462 = vector.load %arg19[%c16_236, %c0_237] : memref<64x64xf32, #tpu.memory_space<vmem>>, vector<8x64xf32>
    tpu.vector_store %arg19[%c16_236, %c0_237], %461 {strides = array<i32>} : memref<64x64xf32, #tpu.memory_space<vmem>>, vector<8x64xf32>,
    %c24_238 = arith.constant 24 : index
    %c0_239 = arith.constant 0 : index
    %463 = vector.load %arg17[%c24_238, %c0_239] : memref<64x256xf32, #tpu.memory_space<vmem>>, vector<8x256xf32>
    %cst_240 = arith.constant dense<0.000000e+00> : vector<8x256xf32>
    %464 = tpu.matmul %461, %373, %cst_240 {dimension_numbers = #tpu.dot_dimension_numbers<[1], [0], [0], [1], [0, 0, 1, 1], [], []>} : vector<8x64xf32>, vector<64x256xf32>, vector<8x256xf32> -> vector<8x256xf32>
    %465 = arith.addf %463, %464 : vector<8x256xf32>
    %466 = vector.extract_strided_slice %465 {offsets = [0, 0], sizes = [8, 64], strides = [1, 1]} : vector<8x256xf32> to vector<8x64xf32>
    %467 = arith.negf %466 : vector<8x64xf32>
    %468 = math.exp %467 : vector<8x64xf32>
    %cst_241 = arith.constant 1.000000e+00 : f32
    %469 = vector.broadcast %cst_241 : f32 to vector<8x64xf32>
    %470 = arith.addf %469, %468 : vector<8x64xf32>
    %471 = arith.divf %469, %470 : vector<8x64xf32>
    %472 = vector.extract_strided_slice %465 {offsets = [0, 64], sizes = [8, 64], strides = [1, 1]} : vector<8x256xf32> to vector<8x64xf32>
    %473 = arith.negf %472 : vector<8x64xf32>
    %474 = math.exp %473 : vector<8x64xf32>
    %cst_242 = arith.constant 1.000000e+00 : f32
    %475 = vector.broadcast %cst_242 : f32 to vector<8x64xf32>
    %476 = arith.addf %475, %474 : vector<8x64xf32>
    %477 = arith.divf %475, %476 : vector<8x64xf32>
    %478 = vector.extract_strided_slice %465 {offsets = [0, 128], sizes = [8, 64], strides = [1, 1]} : vector<8x256xf32> to vector<8x64xf32>
    %479 = math.tanh %478 : vector<8x64xf32>
    %480 = vector.extract_strided_slice %465 {offsets = [0, 192], sizes = [8, 64], strides = [1, 1]} : vector<8x256xf32> to vector<8x64xf32>
    %481 = arith.negf %480 : vector<8x64xf32>
    %482 = math.exp %481 : vector<8x64xf32>
    %cst_243 = arith.constant 1.000000e+00 : f32
    %483 = vector.broadcast %cst_243 : f32 to vector<8x64xf32>
    %484 = arith.addf %483, %482 : vector<8x64xf32>
    %485 = arith.divf %483, %484 : vector<8x64xf32>
    %486 = arith.mulf %477, %459 : vector<8x64xf32>
    %487 = arith.mulf %471, %479 : vector<8x64xf32>
    %488 = arith.addf %486, %487 : vector<8x64xf32>
    %489 = math.tanh %488 : vector<8x64xf32>
    %490 = arith.mulf %485, %489 : vector<8x64xf32>
    %c24_244 = arith.constant 24 : index
    %c0_245 = arith.constant 0 : index
    %491 = vector.load %arg19[%c24_244, %c0_245] : memref<64x64xf32, #tpu.memory_space<vmem>>, vector<8x64xf32>
    tpu.vector_store %arg19[%c24_244, %c0_245], %490 {strides = array<i32>} : memref<64x64xf32, #tpu.memory_space<vmem>>, vector<8x64xf32>,
    %c32_246 = arith.constant 32 : index
    %c0_247 = arith.constant 0 : index
    %492 = vector.load %arg17[%c32_246, %c0_247] : memref<64x256xf32, #tpu.memory_space<vmem>>, vector<8x256xf32>
    %cst_248 = arith.constant dense<0.000000e+00> : vector<8x256xf32>
    %493 = tpu.matmul %490, %373, %cst_248 {dimension_numbers = #tpu.dot_dimension_numbers<[1], [0], [0], [1], [0, 0, 1, 1], [], []>} : vector<8x64xf32>, vector<64x256xf32>, vector<8x256xf32> -> vector<8x256xf32>
    %494 = arith.addf %492, %493 : vector<8x256xf32>
    %495 = vector.extract_strided_slice %494 {offsets = [0, 0], sizes = [8, 64], strides = [1, 1]} : vector<8x256xf32> to vector<8x64xf32>
    %496 = arith.negf %495 : vector<8x64xf32>
    %497 = math.exp %496 : vector<8x64xf32>
    %cst_249 = arith.constant 1.000000e+00 : f32
    %498 = vector.broadcast %cst_249 : f32 to vector<8x64xf32>
    %499 = arith.addf %498, %497 : vector<8x64xf32>
    %500 = arith.divf %498, %499 : vector<8x64xf32>
    %501 = vector.extract_strided_slice %494 {offsets = [0, 64], sizes = [8, 64], strides = [1, 1]} : vector<8x256xf32> to vector<8x64xf32>
    %502 = arith.negf %501 : vector<8x64xf32>
    %503 = math.exp %502 : vector<8x64xf32>
    %cst_250 = arith.constant 1.000000e+00 : f32
    %504 = vector.broadcast %cst_250 : f32 to vector<8x64xf32>
    %505 = arith.addf %504, %503 : vector<8x64xf32>
    %506 = arith.divf %504, %505 : vector<8x64xf32>
    %507 = vector.extract_strided_slice %494 {offsets = [0, 128], sizes = [8, 64], strides = [1, 1]} : vector<8x256xf32> to vector<8x64xf32>
    %508 = math.tanh %507 : vector<8x64xf32>
    %509 = vector.extract_strided_slice %494 {offsets = [0, 192], sizes = [8, 64], strides = [1, 1]} : vector<8x256xf32> to vector<8x64xf32>
    %510 = arith.negf %509 : vector<8x64xf32>
    %511 = math.exp %510 : vector<8x64xf32>
    %cst_251 = arith.constant 1.000000e+00 : f32
    %512 = vector.broadcast %cst_251 : f32 to vector<8x64xf32>
    %513 = arith.addf %512, %511 : vector<8x64xf32>
    %514 = arith.divf %512, %513 : vector<8x64xf32>
    %515 = arith.mulf %506, %488 : vector<8x64xf32>
    %516 = arith.mulf %500, %508 : vector<8x64xf32>
    %517 = arith.addf %515, %516 : vector<8x64xf32>
    %518 = math.tanh %517 : vector<8x64xf32>
    %519 = arith.mulf %514, %518 : vector<8x64xf32>
    %c32_252 = arith.constant 32 : index
    %c0_253 = arith.constant 0 : index
    %520 = vector.load %arg19[%c32_252, %c0_253] : memref<64x64xf32, #tpu.memory_space<vmem>>, vector<8x64xf32>
    tpu.vector_store %arg19[%c32_252, %c0_253], %519 {strides = array<i32>} : memref<64x64xf32, #tpu.memory_space<vmem>>, vector<8x64xf32>,
    %c40_254 = arith.constant 40 : index
    %c0_255 = arith.constant 0 : index
    %521 = vector.load %arg17[%c40_254, %c0_255] : memref<64x256xf32, #tpu.memory_space<vmem>>, vector<8x256xf32>
    %cst_256 = arith.constant dense<0.000000e+00> : vector<8x256xf32>
    %522 = tpu.matmul %519, %373, %cst_256 {dimension_numbers = #tpu.dot_dimension_numbers<[1], [0], [0], [1], [0, 0, 1, 1], [], []>} : vector<8x64xf32>, vector<64x256xf32>, vector<8x256xf32> -> vector<8x256xf32>
    %523 = arith.addf %521, %522 : vector<8x256xf32>
    %524 = vector.extract_strided_slice %523 {offsets = [0, 0], sizes = [8, 64], strides = [1, 1]} : vector<8x256xf32> to vector<8x64xf32>
    %525 = arith.negf %524 : vector<8x64xf32>
    %526 = math.exp %525 : vector<8x64xf32>
    %cst_257 = arith.constant 1.000000e+00 : f32
    %527 = vector.broadcast %cst_257 : f32 to vector<8x64xf32>
    %528 = arith.addf %527, %526 : vector<8x64xf32>
    %529 = arith.divf %527, %528 : vector<8x64xf32>
    %530 = vector.extract_strided_slice %523 {offsets = [0, 64], sizes = [8, 64], strides = [1, 1]} : vector<8x256xf32> to vector<8x64xf32>
    %531 = arith.negf %530 : vector<8x64xf32>
    %532 = math.exp %531 : vector<8x64xf32>
    %cst_258 = arith.constant 1.000000e+00 : f32
    %533 = vector.broadcast %cst_258 : f32 to vector<8x64xf32>
    %534 = arith.addf %533, %532 : vector<8x64xf32>
    %535 = arith.divf %533, %534 : vector<8x64xf32>
    %536 = vector.extract_strided_slice %523 {offsets = [0, 128], sizes = [8, 64], strides = [1, 1]} : vector<8x256xf32> to vector<8x64xf32>
    %537 = math.tanh %536 : vector<8x64xf32>
    %538 = vector.extract_strided_slice %523 {offsets = [0, 192], sizes = [8, 64], strides = [1, 1]} : vector<8x256xf32> to vector<8x64xf32>
    %539 = arith.negf %538 : vector<8x64xf32>
    %540 = math.exp %539 : vector<8x64xf32>
    %cst_259 = arith.constant 1.000000e+00 : f32
    %541 = vector.broadcast %cst_259 : f32 to vector<8x64xf32>
    %542 = arith.addf %541, %540 : vector<8x64xf32>
    %543 = arith.divf %541, %542 : vector<8x64xf32>
    %544 = arith.mulf %535, %517 : vector<8x64xf32>
    %545 = arith.mulf %529, %537 : vector<8x64xf32>
    %546 = arith.addf %544, %545 : vector<8x64xf32>
    %547 = math.tanh %546 : vector<8x64xf32>
    %548 = arith.mulf %543, %547 : vector<8x64xf32>
    %c40_260 = arith.constant 40 : index
    %c0_261 = arith.constant 0 : index
    %549 = vector.load %arg19[%c40_260, %c0_261] : memref<64x64xf32, #tpu.memory_space<vmem>>, vector<8x64xf32>
    tpu.vector_store %arg19[%c40_260, %c0_261], %548 {strides = array<i32>} : memref<64x64xf32, #tpu.memory_space<vmem>>, vector<8x64xf32>,
    %c48_262 = arith.constant 48 : index
    %c0_263 = arith.constant 0 : index
    %550 = vector.load %arg17[%c48_262, %c0_263] : memref<64x256xf32, #tpu.memory_space<vmem>>, vector<8x256xf32>
    %cst_264 = arith.constant dense<0.000000e+00> : vector<8x256xf32>
    %551 = tpu.matmul %548, %373, %cst_264 {dimension_numbers = #tpu.dot_dimension_numbers<[1], [0], [0], [1], [0, 0, 1, 1], [], []>} : vector<8x64xf32>, vector<64x256xf32>, vector<8x256xf32> -> vector<8x256xf32>
    %552 = arith.addf %550, %551 : vector<8x256xf32>
    %553 = vector.extract_strided_slice %552 {offsets = [0, 0], sizes = [8, 64], strides = [1, 1]} : vector<8x256xf32> to vector<8x64xf32>
    %554 = arith.negf %553 : vector<8x64xf32>
    %555 = math.exp %554 : vector<8x64xf32>
    %cst_265 = arith.constant 1.000000e+00 : f32
    %556 = vector.broadcast %cst_265 : f32 to vector<8x64xf32>
    %557 = arith.addf %556, %555 : vector<8x64xf32>
    %558 = arith.divf %556, %557 : vector<8x64xf32>
    %559 = vector.extract_strided_slice %552 {offsets = [0, 64], sizes = [8, 64], strides = [1, 1]} : vector<8x256xf32> to vector<8x64xf32>
    %560 = arith.negf %559 : vector<8x64xf32>
    %561 = math.exp %560 : vector<8x64xf32>
    %cst_266 = arith.constant 1.000000e+00 : f32
    %562 = vector.broadcast %cst_266 : f32 to vector<8x64xf32>
    %563 = arith.addf %562, %561 : vector<8x64xf32>
    %564 = arith.divf %562, %563 : vector<8x64xf32>
    %565 = vector.extract_strided_slice %552 {offsets = [0, 128], sizes = [8, 64], strides = [1, 1]} : vector<8x256xf32> to vector<8x64xf32>
    %566 = math.tanh %565 : vector<8x64xf32>
    %567 = vector.extract_strided_slice %552 {offsets = [0, 192], sizes = [8, 64], strides = [1, 1]} : vector<8x256xf32> to vector<8x64xf32>
    %568 = arith.negf %567 : vector<8x64xf32>
    %569 = math.exp %568 : vector<8x64xf32>
    %cst_267 = arith.constant 1.000000e+00 : f32
    %570 = vector.broadcast %cst_267 : f32 to vector<8x64xf32>
    %571 = arith.addf %570, %569 : vector<8x64xf32>
    %572 = arith.divf %570, %571 : vector<8x64xf32>
    %573 = arith.mulf %564, %546 : vector<8x64xf32>
    %574 = arith.mulf %558, %566 : vector<8x64xf32>
    %575 = arith.addf %573, %574 : vector<8x64xf32>
    %576 = math.tanh %575 : vector<8x64xf32>
    %577 = arith.mulf %572, %576 : vector<8x64xf32>
    %c48_268 = arith.constant 48 : index
    %c0_269 = arith.constant 0 : index
    %578 = vector.load %arg19[%c48_268, %c0_269] : memref<64x64xf32, #tpu.memory_space<vmem>>, vector<8x64xf32>
    tpu.vector_store %arg19[%c48_268, %c0_269], %577 {strides = array<i32>} : memref<64x64xf32, #tpu.memory_space<vmem>>, vector<8x64xf32>,
    %c56_270 = arith.constant 56 : index
    %c0_271 = arith.constant 0 : index
    %579 = vector.load %arg17[%c56_270, %c0_271] : memref<64x256xf32, #tpu.memory_space<vmem>>, vector<8x256xf32>
    %cst_272 = arith.constant dense<0.000000e+00> : vector<8x256xf32>
    %580 = tpu.matmul %577, %373, %cst_272 {dimension_numbers = #tpu.dot_dimension_numbers<[1], [0], [0], [1], [0, 0, 1, 1], [], []>} : vector<8x64xf32>, vector<64x256xf32>, vector<8x256xf32> -> vector<8x256xf32>
    %581 = arith.addf %579, %580 : vector<8x256xf32>
    %582 = vector.extract_strided_slice %581 {offsets = [0, 0], sizes = [8, 64], strides = [1, 1]} : vector<8x256xf32> to vector<8x64xf32>
    %583 = arith.negf %582 : vector<8x64xf32>
    %584 = math.exp %583 : vector<8x64xf32>
    %cst_273 = arith.constant 1.000000e+00 : f32
    %585 = vector.broadcast %cst_273 : f32 to vector<8x64xf32>
    %586 = arith.addf %585, %584 : vector<8x64xf32>
    %587 = arith.divf %585, %586 : vector<8x64xf32>
    %588 = vector.extract_strided_slice %581 {offsets = [0, 64], sizes = [8, 64], strides = [1, 1]} : vector<8x256xf32> to vector<8x64xf32>
    %589 = arith.negf %588 : vector<8x64xf32>
    %590 = math.exp %589 : vector<8x64xf32>
    %cst_274 = arith.constant 1.000000e+00 : f32
    %591 = vector.broadcast %cst_274 : f32 to vector<8x64xf32>
    %592 = arith.addf %591, %590 : vector<8x64xf32>
    %593 = arith.divf %591, %592 : vector<8x64xf32>
    %594 = vector.extract_strided_slice %581 {offsets = [0, 128], sizes = [8, 64], strides = [1, 1]} : vector<8x256xf32> to vector<8x64xf32>
    %595 = math.tanh %594 : vector<8x64xf32>
    %596 = vector.extract_strided_slice %581 {offsets = [0, 192], sizes = [8, 64], strides = [1, 1]} : vector<8x256xf32> to vector<8x64xf32>
    %597 = arith.negf %596 : vector<8x64xf32>
    %598 = math.exp %597 : vector<8x64xf32>
    %cst_275 = arith.constant 1.000000e+00 : f32
    %599 = vector.broadcast %cst_275 : f32 to vector<8x64xf32>
    %600 = arith.addf %599, %598 : vector<8x64xf32>
    %601 = arith.divf %599, %600 : vector<8x64xf32>
    %602 = arith.mulf %593, %575 : vector<8x64xf32>
    %603 = arith.mulf %587, %595 : vector<8x64xf32>
    %604 = arith.addf %602, %603 : vector<8x64xf32>
    %605 = math.tanh %604 : vector<8x64xf32>
    %606 = arith.mulf %601, %605 : vector<8x64xf32>
    %c56_276 = arith.constant 56 : index
    %c0_277 = arith.constant 0 : index
    %607 = vector.load %arg19[%c56_276, %c0_277] : memref<64x64xf32, #tpu.memory_space<vmem>>, vector<8x64xf32>
    tpu.vector_store %arg19[%c56_276, %c0_277], %606 {strides = array<i32>} : memref<64x64xf32, #tpu.memory_space<vmem>>, vector<8x64xf32>,
    %c0_278 = arith.constant 0 : index
    %c0_279 = arith.constant 0 : index
    %608 = vector.load %arg13[%c0_278, %c0_279] : memref<1x64xf32, #tpu.memory_space<vmem>>, vector<1x64xf32>
    %c0_280 = arith.constant 0 : index
    %c0_281 = arith.constant 0 : index
    %609 = vector.load %arg14[%c0_280, %c0_281] : memref<1x64xf32, #tpu.memory_space<vmem>>, vector<1x64xf32>
    %c0_282 = arith.constant 0 : index
    %c0_283 = arith.constant 0 : index
    %610 = vector.load %arg15[%c0_282, %c0_283] : memref<1x1xf32, #tpu.memory_space<vmem>>, vector<1x1xf32>
    %c0_284 = arith.constant 0 : index
    %c0_285 = arith.constant 0 : index
    %611 = vector.load %arg19[%c0_284, %c0_285] : memref<64x64xf32, #tpu.memory_space<vmem>>, vector<8x64xf32>
    %612 = vector.broadcast %608 : vector<1x64xf32> to vector<8x64xf32>
    %613 = arith.mulf %611, %612 : vector<8x64xf32>
    %cst_286 = arith.constant dense<0.000000e+00> : vector<8xf32>
    %614 = vector.multi_reduction <add>, %613, %cst_286 [1] : vector<8x64xf32> to vector<8xf32>
    %615 = vector.shape_cast %614 : vector<8xf32> to vector<8x1xf32>
    %c56_287 = arith.constant 56 : index
    %c0_288 = arith.constant 0 : index
    %616 = vector.load %arg19[%c56_287, %c0_288] : memref<64x64xf32, #tpu.memory_space<vmem>>, vector<8x64xf32>
    %617 = vector.broadcast %609 : vector<1x64xf32> to vector<8x64xf32>
    %618 = arith.mulf %616, %617 : vector<8x64xf32>
    %cst_289 = arith.constant dense<0.000000e+00> : vector<8xf32>
    %619 = vector.multi_reduction <add>, %618, %cst_289 [1] : vector<8x64xf32> to vector<8xf32>
    %620 = vector.shape_cast %619 : vector<8xf32> to vector<8x1xf32>
    %621 = arith.addf %615, %620 : vector<8x1xf32>
    %622 = vector.broadcast %610 : vector<1x1xf32> to vector<8x1xf32>
    %623 = arith.addf %621, %622 : vector<8x1xf32>
    %624 = vector.shape_cast %623 : vector<8x1xf32> to vector<8x1xf32>
    %625 = vector.broadcast %624 : vector<8x1xf32> to vector<8x128xf32>
    %c0_290 = arith.constant 0 : index
    %c0_291 = arith.constant 0 : index
    %626 = vector.load %arg16[%c0_290, %c0_291] : memref<64x128xf32, #tpu.memory_space<vmem>>, vector<8x128xf32>
    tpu.vector_store %arg16[%c0_290, %c0_291], %625 {strides = array<i32>} : memref<64x128xf32, #tpu.memory_space<vmem>>, vector<8x128xf32>,
    %c8_292 = arith.constant 8 : index
    %c0_293 = arith.constant 0 : index
    %627 = vector.load %arg19[%c8_292, %c0_293] : memref<64x64xf32, #tpu.memory_space<vmem>>, vector<8x64xf32>
    %628 = vector.broadcast %608 : vector<1x64xf32> to vector<8x64xf32>
    %629 = arith.mulf %627, %628 : vector<8x64xf32>
    %cst_294 = arith.constant dense<0.000000e+00> : vector<8xf32>
    %630 = vector.multi_reduction <add>, %629, %cst_294 [1] : vector<8x64xf32> to vector<8xf32>
    %631 = vector.shape_cast %630 : vector<8xf32> to vector<8x1xf32>
    %c48_295 = arith.constant 48 : index
    %c0_296 = arith.constant 0 : index
    %632 = vector.load %arg19[%c48_295, %c0_296] : memref<64x64xf32, #tpu.memory_space<vmem>>, vector<8x64xf32>
    %633 = vector.broadcast %609 : vector<1x64xf32> to vector<8x64xf32>
    %634 = arith.mulf %632, %633 : vector<8x64xf32>
    %cst_297 = arith.constant dense<0.000000e+00> : vector<8xf32>
    %635 = vector.multi_reduction <add>, %634, %cst_297 [1] : vector<8x64xf32> to vector<8xf32>
    %636 = vector.shape_cast %635 : vector<8xf32> to vector<8x1xf32>
    %637 = arith.addf %631, %636 : vector<8x1xf32>
    %638 = vector.broadcast %610 : vector<1x1xf32> to vector<8x1xf32>
    %639 = arith.addf %637, %638 : vector<8x1xf32>
    %640 = vector.shape_cast %639 : vector<8x1xf32> to vector<8x1xf32>
    %641 = vector.broadcast %640 : vector<8x1xf32> to vector<8x128xf32>
    %c8_298 = arith.constant 8 : index
    %c0_299 = arith.constant 0 : index
    %642 = vector.load %arg16[%c8_298, %c0_299] : memref<64x128xf32, #tpu.memory_space<vmem>>, vector<8x128xf32>
    tpu.vector_store %arg16[%c8_298, %c0_299], %641 {strides = array<i32>} : memref<64x128xf32, #tpu.memory_space<vmem>>, vector<8x128xf32>,
    %c16_300 = arith.constant 16 : index
    %c0_301 = arith.constant 0 : index
    %643 = vector.load %arg19[%c16_300, %c0_301] : memref<64x64xf32, #tpu.memory_space<vmem>>, vector<8x64xf32>
    %644 = vector.broadcast %608 : vector<1x64xf32> to vector<8x64xf32>
    %645 = arith.mulf %643, %644 : vector<8x64xf32>
    %cst_302 = arith.constant dense<0.000000e+00> : vector<8xf32>
    %646 = vector.multi_reduction <add>, %645, %cst_302 [1] : vector<8x64xf32> to vector<8xf32>
    %647 = vector.shape_cast %646 : vector<8xf32> to vector<8x1xf32>
    %c40_303 = arith.constant 40 : index
    %c0_304 = arith.constant 0 : index
    %648 = vector.load %arg19[%c40_303, %c0_304] : memref<64x64xf32, #tpu.memory_space<vmem>>, vector<8x64xf32>
    %649 = vector.broadcast %609 : vector<1x64xf32> to vector<8x64xf32>
    %650 = arith.mulf %648, %649 : vector<8x64xf32>
    %cst_305 = arith.constant dense<0.000000e+00> : vector<8xf32>
    %651 = vector.multi_reduction <add>, %650, %cst_305 [1] : vector<8x64xf32> to vector<8xf32>
    %652 = vector.shape_cast %651 : vector<8xf32> to vector<8x1xf32>
    %653 = arith.addf %647, %652 : vector<8x1xf32>
    %654 = vector.broadcast %610 : vector<1x1xf32> to vector<8x1xf32>
    %655 = arith.addf %653, %654 : vector<8x1xf32>
    %656 = vector.shape_cast %655 : vector<8x1xf32> to vector<8x1xf32>
    %657 = vector.broadcast %656 : vector<8x1xf32> to vector<8x128xf32>
    %c16_306 = arith.constant 16 : index
    %c0_307 = arith.constant 0 : index
    %658 = vector.load %arg16[%c16_306, %c0_307] : memref<64x128xf32, #tpu.memory_space<vmem>>, vector<8x128xf32>
    tpu.vector_store %arg16[%c16_306, %c0_307], %657 {strides = array<i32>} : memref<64x128xf32, #tpu.memory_space<vmem>>, vector<8x128xf32>,
    %c24_308 = arith.constant 24 : index
    %c0_309 = arith.constant 0 : index
    %659 = vector.load %arg19[%c24_308, %c0_309] : memref<64x64xf32, #tpu.memory_space<vmem>>, vector<8x64xf32>
    %660 = vector.broadcast %608 : vector<1x64xf32> to vector<8x64xf32>
    %661 = arith.mulf %659, %660 : vector<8x64xf32>
    %cst_310 = arith.constant dense<0.000000e+00> : vector<8xf32>
    %662 = vector.multi_reduction <add>, %661, %cst_310 [1] : vector<8x64xf32> to vector<8xf32>
    %663 = vector.shape_cast %662 : vector<8xf32> to vector<8x1xf32>
    %c32_311 = arith.constant 32 : index
    %c0_312 = arith.constant 0 : index
    %664 = vector.load %arg19[%c32_311, %c0_312] : memref<64x64xf32, #tpu.memory_space<vmem>>, vector<8x64xf32>
    %665 = vector.broadcast %609 : vector<1x64xf32> to vector<8x64xf32>
    %666 = arith.mulf %664, %665 : vector<8x64xf32>
    %cst_313 = arith.constant dense<0.000000e+00> : vector<8xf32>
    %667 = vector.multi_reduction <add>, %666, %cst_313 [1] : vector<8x64xf32> to vector<8xf32>
    %668 = vector.shape_cast %667 : vector<8xf32> to vector<8x1xf32>
    %669 = arith.addf %663, %668 : vector<8x1xf32>
    %670 = vector.broadcast %610 : vector<1x1xf32> to vector<8x1xf32>
    %671 = arith.addf %669, %670 : vector<8x1xf32>
    %672 = vector.shape_cast %671 : vector<8x1xf32> to vector<8x1xf32>
    %673 = vector.broadcast %672 : vector<8x1xf32> to vector<8x128xf32>
    %c24_314 = arith.constant 24 : index
    %c0_315 = arith.constant 0 : index
    %674 = vector.load %arg16[%c24_314, %c0_315] : memref<64x128xf32, #tpu.memory_space<vmem>>, vector<8x128xf32>
    tpu.vector_store %arg16[%c24_314, %c0_315], %673 {strides = array<i32>} : memref<64x128xf32, #tpu.memory_space<vmem>>, vector<8x128xf32>,
    %c32_316 = arith.constant 32 : index
    %c0_317 = arith.constant 0 : index
    %675 = vector.load %arg19[%c32_316, %c0_317] : memref<64x64xf32, #tpu.memory_space<vmem>>, vector<8x64xf32>
    %676 = vector.broadcast %608 : vector<1x64xf32> to vector<8x64xf32>
    %677 = arith.mulf %675, %676 : vector<8x64xf32>
    %cst_318 = arith.constant dense<0.000000e+00> : vector<8xf32>
    %678 = vector.multi_reduction <add>, %677, %cst_318 [1] : vector<8x64xf32> to vector<8xf32>
    %679 = vector.shape_cast %678 : vector<8xf32> to vector<8x1xf32>
    %c24_319 = arith.constant 24 : index
    %c0_320 = arith.constant 0 : index
    %680 = vector.load %arg19[%c24_319, %c0_320] : memref<64x64xf32, #tpu.memory_space<vmem>>, vector<8x64xf32>
    %681 = vector.broadcast %609 : vector<1x64xf32> to vector<8x64xf32>
    %682 = arith.mulf %680, %681 : vector<8x64xf32>
    %cst_321 = arith.constant dense<0.000000e+00> : vector<8xf32>
    %683 = vector.multi_reduction <add>, %682, %cst_321 [1] : vector<8x64xf32> to vector<8xf32>
    %684 = vector.shape_cast %683 : vector<8xf32> to vector<8x1xf32>
    %685 = arith.addf %679, %684 : vector<8x1xf32>
    %686 = vector.broadcast %610 : vector<1x1xf32> to vector<8x1xf32>
    %687 = arith.addf %685, %686 : vector<8x1xf32>
    %688 = vector.shape_cast %687 : vector<8x1xf32> to vector<8x1xf32>
    %689 = vector.broadcast %688 : vector<8x1xf32> to vector<8x128xf32>
    %c32_322 = arith.constant 32 : index
    %c0_323 = arith.constant 0 : index
    %690 = vector.load %arg16[%c32_322, %c0_323] : memref<64x128xf32, #tpu.memory_space<vmem>>, vector<8x128xf32>
    tpu.vector_store %arg16[%c32_322, %c0_323], %689 {strides = array<i32>} : memref<64x128xf32, #tpu.memory_space<vmem>>, vector<8x128xf32>,
    %c40_324 = arith.constant 40 : index
    %c0_325 = arith.constant 0 : index
    %691 = vector.load %arg19[%c40_324, %c0_325] : memref<64x64xf32, #tpu.memory_space<vmem>>, vector<8x64xf32>
    %692 = vector.broadcast %608 : vector<1x64xf32> to vector<8x64xf32>
    %693 = arith.mulf %691, %692 : vector<8x64xf32>
    %cst_326 = arith.constant dense<0.000000e+00> : vector<8xf32>
    %694 = vector.multi_reduction <add>, %693, %cst_326 [1] : vector<8x64xf32> to vector<8xf32>
    %695 = vector.shape_cast %694 : vector<8xf32> to vector<8x1xf32>
    %c16_327 = arith.constant 16 : index
    %c0_328 = arith.constant 0 : index
    %696 = vector.load %arg19[%c16_327, %c0_328] : memref<64x64xf32, #tpu.memory_space<vmem>>, vector<8x64xf32>
    %697 = vector.broadcast %609 : vector<1x64xf32> to vector<8x64xf32>
    %698 = arith.mulf %696, %697 : vector<8x64xf32>
    %cst_329 = arith.constant dense<0.000000e+00> : vector<8xf32>
    %699 = vector.multi_reduction <add>, %698, %cst_329 [1] : vector<8x64xf32> to vector<8xf32>
    %700 = vector.shape_cast %699 : vector<8xf32> to vector<8x1xf32>
    %701 = arith.addf %695, %700 : vector<8x1xf32>
    %702 = vector.broadcast %610 : vector<1x1xf32> to vector<8x1xf32>
    %703 = arith.addf %701, %702 : vector<8x1xf32>
    %704 = vector.shape_cast %703 : vector<8x1xf32> to vector<8x1xf32>
    %705 = vector.broadcast %704 : vector<8x1xf32> to vector<8x128xf32>
    %c40_330 = arith.constant 40 : index
    %c0_331 = arith.constant 0 : index
    %706 = vector.load %arg16[%c40_330, %c0_331] : memref<64x128xf32, #tpu.memory_space<vmem>>, vector<8x128xf32>
    tpu.vector_store %arg16[%c40_330, %c0_331], %705 {strides = array<i32>} : memref<64x128xf32, #tpu.memory_space<vmem>>, vector<8x128xf32>,
    %c48_332 = arith.constant 48 : index
    %c0_333 = arith.constant 0 : index
    %707 = vector.load %arg19[%c48_332, %c0_333] : memref<64x64xf32, #tpu.memory_space<vmem>>, vector<8x64xf32>
    %708 = vector.broadcast %608 : vector<1x64xf32> to vector<8x64xf32>
    %709 = arith.mulf %707, %708 : vector<8x64xf32>
    %cst_334 = arith.constant dense<0.000000e+00> : vector<8xf32>
    %710 = vector.multi_reduction <add>, %709, %cst_334 [1] : vector<8x64xf32> to vector<8xf32>
    %711 = vector.shape_cast %710 : vector<8xf32> to vector<8x1xf32>
    %c8_335 = arith.constant 8 : index
    %c0_336 = arith.constant 0 : index
    %712 = vector.load %arg19[%c8_335, %c0_336] : memref<64x64xf32, #tpu.memory_space<vmem>>, vector<8x64xf32>
    %713 = vector.broadcast %609 : vector<1x64xf32> to vector<8x64xf32>
    %714 = arith.mulf %712, %713 : vector<8x64xf32>
    %cst_337 = arith.constant dense<0.000000e+00> : vector<8xf32>
    %715 = vector.multi_reduction <add>, %714, %cst_337 [1] : vector<8x64xf32> to vector<8xf32>
    %716 = vector.shape_cast %715 : vector<8xf32> to vector<8x1xf32>
    %717 = arith.addf %711, %716 : vector<8x1xf32>
    %718 = vector.broadcast %610 : vector<1x1xf32> to vector<8x1xf32>
    %719 = arith.addf %717, %718 : vector<8x1xf32>
    %720 = vector.shape_cast %719 : vector<8x1xf32> to vector<8x1xf32>
    %721 = vector.broadcast %720 : vector<8x1xf32> to vector<8x128xf32>
    %c48_338 = arith.constant 48 : index
    %c0_339 = arith.constant 0 : index
    %722 = vector.load %arg16[%c48_338, %c0_339] : memref<64x128xf32, #tpu.memory_space<vmem>>, vector<8x128xf32>
    tpu.vector_store %arg16[%c48_338, %c0_339], %721 {strides = array<i32>} : memref<64x128xf32, #tpu.memory_space<vmem>>, vector<8x128xf32>,
    %c56_340 = arith.constant 56 : index
    %c0_341 = arith.constant 0 : index
    %723 = vector.load %arg19[%c56_340, %c0_341] : memref<64x64xf32, #tpu.memory_space<vmem>>, vector<8x64xf32>
    %724 = vector.broadcast %608 : vector<1x64xf32> to vector<8x64xf32>
    %725 = arith.mulf %723, %724 : vector<8x64xf32>
    %cst_342 = arith.constant dense<0.000000e+00> : vector<8xf32>
    %726 = vector.multi_reduction <add>, %725, %cst_342 [1] : vector<8x64xf32> to vector<8xf32>
    %727 = vector.shape_cast %726 : vector<8xf32> to vector<8x1xf32>
    %c0_343 = arith.constant 0 : index
    %c0_344 = arith.constant 0 : index
    %728 = vector.load %arg19[%c0_343, %c0_344] : memref<64x64xf32, #tpu.memory_space<vmem>>, vector<8x64xf32>
    %729 = vector.broadcast %609 : vector<1x64xf32> to vector<8x64xf32>
    %730 = arith.mulf %728, %729 : vector<8x64xf32>
    %cst_345 = arith.constant dense<0.000000e+00> : vector<8xf32>
    %731 = vector.multi_reduction <add>, %730, %cst_345 [1] : vector<8x64xf32> to vector<8xf32>
    %732 = vector.shape_cast %731 : vector<8xf32> to vector<8x1xf32>
    %733 = arith.addf %727, %732 : vector<8x1xf32>
    %734 = vector.broadcast %610 : vector<1x1xf32> to vector<8x1xf32>
    %735 = arith.addf %733, %734 : vector<8x1xf32>
    %736 = vector.shape_cast %735 : vector<8x1xf32> to vector<8x1xf32>
    %737 = vector.broadcast %736 : vector<8x1xf32> to vector<8x128xf32>
    %c56_346 = arith.constant 56 : index
    %c0_347 = arith.constant 0 : index
    %738 = vector.load %arg16[%c56_346, %c0_347] : memref<64x128xf32, #tpu.memory_space<vmem>>, vector<8x128xf32>
    tpu.vector_store %arg16[%c56_346, %c0_347], %737 {strides = array<i32>} : memref<64x128xf32, #tpu.memory_space<vmem>>, vector<8x128xf32>,
    return
  }
}

</mosaic_0001>

<bundles_post_ra>
// kernel: squeeze.1
= control target key start
LH: loop header
LB: loop body
LE: loop exit
PB: predicated region body
PF: predicated region fallthrough
CT: control target
= control target key end

     0   :  { %s66_s8 = smov 104   ;;  %vm7_vm0 = vcmask 64512   ;;  %s67_s11 = smov 112   ;;  %s117_s0 = inlined_call_operand.vmem [shape: f32[64], index: 0, kind: input, shape index: {}]   ;;  %s118_s1 = inlined_call_operand.vmem [shape: f32[8,8], index: 1, kind: output, shape index: {}]  }
   0x1   :  { %v4_v0 = vld [vmem:[%s117_s0] sm:$0x1]  ;;  %s65_s0 = smov 120   ;;  %s68_s12 = smov 96  }
   0x2   :  { %5 = vst [vmem:[#allocation0] sm:$0x1] %v4_v0  ;;  %s69_s13 = smov 88   ;;  %s70_s14 = smov 80  }
   0x3   :  { %s71_s15 = smov 72  }
   0x9   :  { %v9_v1 = vld [vmem:[#allocation0] sm:$0x1]  }
   0xa   :  { %v21_v2 = vld [vmem:[#allocation0] sm:$0x1]   ;;  %10 = vrot.lane.b32.xlu0 %v9_v1, %s65_s0 }
   0xb   :  { %22 = vrot.lane.b32.xlu1 %v21_v2, %s66_s8  ;;  %v15_v3 = vld [vmem:[#allocation0] sm:$0x1]  }
   0xc   :  { %v27_v4 = vld [vmem:[#allocation0] sm:$0x1]  }
   0xd   :  { %v6_v5 = vld [vmem:[#allocation0] sm:$0x1]  }
   0xe   :  { %8 = vst.msk [vmem:[%s118_s1] sm:$0x1] %vm7_vm0, %v6_v5   ;;  %16 = vrot.lane.b32.xlu0 %v15_v3, %s67_s11  ;;  %v33_v6 = vld [vmem:[#allocation0] sm:$0x1]  }
   0xf   :  { %28 = vrot.lane.b32.xlu1 %v27_v4, %s68_s12  ;;  %v39_v7 = vld [vmem:[#allocation0] sm:$0x1]  }
  0x10   :  { %v45_v8 = vld [vmem:[#allocation0] sm:$0x1]  }
  0x12   :  { %34 = vrot.lane.b32.xlu0 %v33_v6, %s69_s13 }
  0x13   :  { %40 = vrot.lane.b32.xlu1 %v39_v7, %s70_s14 }
  0x16   :  { %46 = vrot.lane.b32.xlu0 %v45_v8, %s71_s15 }
  0x7c   :  { %v11_v9 = vpop.permute.xlu0 %10  }
  0x7d   :  { %v23_v10 = vpop.permute.xlu1 %22   ;;  %51 = vst.msk [vmem:[%s118_s1 + $0x1] sm:$0x1] %vm7_vm0, %v11_v9  }
  0x7e   :  { %53 = vst.msk [vmem:[%s118_s1 + $0x3] sm:$0x1] %vm7_vm0, %v23_v10  }
  0x80   :  { %v17_v11 = vpop.permute.xlu0 %16  }
  0x81   :  { %v29_v12 = vpop.permute.xlu1 %28   ;;  %52 = vst.msk [vmem:[%s118_s1 + $0x2] sm:$0x1] %vm7_vm0, %v17_v11  }
  0x82   :  { %54 = vst.msk [vmem:[%s118_s1 + $0x4] sm:$0x1] %vm7_vm0, %v29_v12  }
  0x84   :  { %v35_v13 = vpop.permute.xlu0 %34  }
  0x85   :  { %v41_v14 = vpop.permute.xlu1 %40   ;;  %55 = vst.msk [vmem:[%s118_s1 + $0x5] sm:$0x1] %vm7_vm0, %v35_v13  }
  0x86   :  { %56 = vst.msk [vmem:[%s118_s1 + $0x6] sm:$0x1] %vm7_vm0, %v41_v14  }
  0x88   :  { %v47_v15 = vpop.permute.xlu0 %46  }
  0x89   :  { %57 = vst.msk [vmem:[%s118_s1 + $0x7] sm:$0x1] %vm7_vm0, %v47_v15  }

// kernel: bilstm_model.1
= control target key start
LH: loop header
LB: loop body
LE: loop exit
PB: predicated region body
PF: predicated region fallthrough
CT: control target
= control target key end

     0   :  { %vm68_vm0 = vcmask 1044480   ;;  %v5667_v0 = vmov 0.0   ;;  %vm5668_vm1 = vmmov 1   ;;  %vm5669_vm3 = vmmov 0   ;;  %s6806_s2 = inlined_call_operand.vmem [shape: f32[5,32], index: 2, kind: input, shape index: {}]   ;;  %s6807_s0 = inlined_call_operand.vmem [shape: f32[8,5], index: 0, kind: input, shape index: {}]   ;;  %s6808_s6 = inlined_call_operand.vmem [shape: f32[13,256], index: 6, kind: input, shape index: {}]   ;;  %s6809_s5 = inlined_call_operand.vmem [shape: f32[13,256], index: 5, kind: input, shape index: {}]   ;;  %s6810_s1 = inlined_call_operand.vmem [shape: f32[64,13], index: 1, kind: input, shape index: {}]   ;;  %s6811_s4 = inlined_call_operand.vmem [shape: f32[32,256], index: 4, kind: input, shape index: {}]   ;;  %s6812_s8 = inlined_call_operand.vmem [shape: f32[64,256], index: 8, kind: input, shape index: {}]   ;;  %s6813_s3 = inlined_call_operand.vmem [shape: f32[1,32], index: 3, kind: input, shape index: {}]   ;;  %s6814_s7 = inlined_call_operand.vmem [shape: f32[1,256], index: 7, kind: input, shape index: {}]   ;;  %s6815_s10 = inlined_call_operand.vmem [shape: f32[64,256], index: 10, kind: input, shape index: {}]   ;;  %s6816_s9 = inlined_call_operand.vmem [shape: f32[64,256], index: 9, kind: input, shape index: {}]   ;;  %s6817_s12 = inlined_call_operand.vmem [shape: f32[64,256], index: 12, kind: input, shape index: {}]   ;;  %s6818_s11 = inlined_call_operand.vmem [shape: f32[1,256], index: 11, kind: input, shape index: {}]   ;;  %s6819_s13 = inlined_call_operand.vmem [shape: f32[1,64], index: 13, kind: input, shape index: {}]   ;;  %s6820_s14 = inlined_call_operand.vmem [shape: f32[1,64], index: 14, kind: input, shape index: {}]   ;;  %s6821_s15 = inlined_call_operand.<no memory space> [shape: f32[1,1], index: 15, kind: input, shape index: {}]   ;;  %s6822_s16 = inlined_call_operand.vmem [shape: f32[64,128], index: 16, kind: output, shape index: {}]  }
   0x1   :  { %6823 = sst [smem:[#allocation6_spill]] %s6806_s2  ;;  %4751 = vmatprep.subr.mxu0 %v5667_v0  ;;  %vm5761_vm2 = vmpackc.low %vm68_vm0, %vm5668_vm1  ;;  %4753 = vmatprep.mubr.msk.f32.mxu0 %vm5669_vm3, %v5667_v0  ;;  %v55_v3 = vld [vmem:[%s6807_s0] sm:$0xff]  ;;  %vm64_vm4 = vcmask 39936   ;;  %v243_v4 = vld [vmem:[%s6808_s6 + $0x8] sm:$0xff]  ;;  %vm248_vm5 = vcmask 105472   ;;  %vm163_vm6 = vcmask 261120  }
   0x2   :  { %s6824_s23 = sld [smem:[#allocation6_spill]]  ;;  %v245_v5 = vld [vmem:[%s6808_s6 + $0x18] sm:$0x1f]  ;;  %v242_v6 = vld [vmem:[%s6808_s6] sm:$0xff]  ;;  %231 = vmatprep.mubr.f32.mxu1 %v5667_v0  ;;  %v244_v8 = vld [vmem:[%s6808_s6 + $0x10] sm:$0x1f] }
   0x3   :  { %v5779_v7 = vpack.c.bf16 %v245_v5, %v243_v4  ;;  %v239_v9 = vld [vmem:[%s6809_s5 + $0x8] sm:$0xff]  ;;  %v5787_v10 = vpack.c.bf16 %v244_v8, %v242_v6  ;;  %v241_v11 = vld [vmem:[%s6809_s5 + $0x18] sm:$0x1f]  ;;  %v238_v12 = vld [vmem:[%s6809_s5] sm:$0xff]  ;;  %v153_v6 = vlaneseq  ;;  %vm1509_vm7 = vcmask 523264  }
   0x4   :  { %v240_v13 = vld [vmem:[%s6809_s5 + $0x10] sm:$0x1f]  ;;  %v5802_v14 = vpack.c.bf16 %v241_v11, %v239_v9  ;;  %v5810_v15 = vld [vmem:[%s6810_s1 + $0x38] sm:$0xff]  ;;  %v144_v17 = vld [vmem:[%s6811_s4 + $0x8] sm:$0xff] }
   0x5   :  { %v5812_v16 = vpack.c.bf16 %v240_v13, %v238_v12  ;;  %v146_v18 = vld [vmem:[%s6811_s4 + $0x18] sm:$0xff]  ;;  %v143_v19 = vld [vmem:[%s6811_s4] sm:$0xff]  ;;  %v145_v20 = vld [vmem:[%s6811_s4 + $0x10] sm:$0xff] }
   0x6   :  { %v5841_v21 = vld [vmem:[%s6810_s1] sm:$0xff]  ;;  %v4756_v22 = vpack.c.bf16 %v146_v18, %v144_v17  ;;  %v4758_v23 = vpack.c.bf16 %v145_v20, %v143_v19  ;;  %v414_v24 = vld [vmem:[%s6810_s1 + $0x30] sm:$0xff]  ;;  %v5863_v25 = vld [vmem:[%s6810_s1 + $0x28] sm:$0xff] }
   0x7   :  { %v5880_v26 = vld [vmem:[%s6810_s1 + $0x10] sm:$0xff]  ;;  %v5891_v27 = vld [vmem:[%s6810_s1 + $0x18] sm:$0xff]  ;;  %v5908_v28 = vld [vmem:[%s6810_s1 + $0x20] sm:$0xff] }
   0x8   :  { %v56_v1 = vld [vmem:[%s6824_s23] sm:$0x1f]  ;;  %4757 = vmatprep.subr.bf16.mxu1 %v4756_v22  ;;  %v1492_v29 = vld [vmem:[%s6812_s8 + $0x8] sm:$0xff]  ;;  %v1494_v30 = vld [vmem:[%s6812_s8 + $0x18] sm:$0xff] }
   0x9   :  { %4752 = vmatpush3.msk.msra.mxu0 %vm68_vm0, %v56_v1  ;;  %4759 = vmatpush1.bf16.msra.mxu1 %v4758_v23  ;;  %v5925_v31 = vld [vmem:[%s6810_s1 + $0x8] sm:$0xff]  ;;  %v5930_v32 = vpack.c.bf16 %v1494_v30, %v1492_v29  ;;  %v1491_v33 = vld [vmem:[%s6812_s8] sm:$0xff]  ;;  %v1493_v34 = vld [vmem:[%s6812_s8 + $0x10] sm:$0xff] }
   0xa   :  { %4754 = vmatmul.mubr.msk.f32.vlgmr.msra.gmra.mrb[0].mxu0 %vm64_vm4, %v55_v3  ;;  %4766 = vmatprep.subr.msk.bf16.mxu0 %vm5761_vm2, %v5779_v7  ;;  %v1496_v35 = vld [vmem:[%s6812_s8 + $0x28] sm:$0xff]  ;;  %v1498_v36 = vld [vmem:[%s6812_s8 + $0x38] sm:$0xff]  ;;  %v5951_v37 = vpack.c.bf16 %v1493_v34, %v1491_v33  ;;  %v1495_v39 = vld [vmem:[%s6812_s8 + $0x20] sm:$0xff] }
   0xb   :  { %322 = vmatprep.mubr.f32.mxu0 %v5667_v0  ;;  %4769 = vmatpush1.bf16.msk.msra.mxu0 %vm5761_vm2, %v5787_v10  ;;  %v5953_v38 = vpack.c.bf16 %v1498_v36, %v1496_v35  ;;  %v1497_v40 = vld [vmem:[%s6812_s8 + $0x30] sm:$0xff]  ;;  %v1500_v41 = vld [vmem:[%s6812_s8 + $0x48] sm:$0xff]  ;;  %v1502_v42 = vld [vmem:[%s6812_s8 + $0x58] sm:$0xff] }
   0xc   :  { %4772 = vmatprep.subr.msk.bf16.mxu0 %vm5761_vm2, %v5802_v14  ;;  %v5969_v43 = vpack.c.bf16 %v1497_v40, %v1495_v39  ;;  %v5973_v44 = vpack.c.bf16 %v1502_v42, %v1500_v41  ;;  %v1499_v45 = vld [vmem:[%s6812_s8 + $0x40] sm:$0xff]  ;;  %v1501_v46 = vld [vmem:[%s6812_s8 + $0x50] sm:$0xff]  ;;  %v1504_v47 = vld [vmem:[%s6812_s8 + $0x68] sm:$0xff] }
   0xd   :  { %v1506_v48 = vld [vmem:[%s6812_s8 + $0x78] sm:$0xff]  ;;  %v5988_v49 = vpack.c.bf16 %v1501_v46, %v1499_v45  ;;  %v1503_v51 = vld [vmem:[%s6812_s8 + $0x60] sm:$0xff]  ;;  %v1505_v52 = vld [vmem:[%s6812_s8 + $0x70] sm:$0xff] }
   0xe   :  { %4638 = vmatmul.mubr.msk.f32.vlgmr.msra.gmra.mrb[2].mxu0 %vm248_vm5, %v5810_v15  ;;  %v5991_v50 = vpack.c.bf16 %v1506_v48, %v1504_v47  ;;  %v6000_v53 = vpack.c.bf16 %v1505_v52, %v1503_v51  ;;  %v148_v54 = vld [vmem:[%s6811_s4 + $0x28] sm:$0xff]  ;;  %v150_v55 = vld [vmem:[%s6811_s4 + $0x38] sm:$0xff]  ;;  %v147_v57 = vld [vmem:[%s6811_s4 + $0x20] sm:$0xff] }
   0xf   :  { %4775 = vmatpush1.bf16.msk.msra.mxu0 %vm5761_vm2, %v5812_v16  ;;  %402 = vmatprep.mubr.f32.mxu0 %v5667_v0  ;;  %v4760_v56 = vpack.c.bf16 %v150_v55, %v148_v54  ;;  %v149_v58 = vld [vmem:[%s6811_s4 + $0x30] sm:$0xff]  ;;  %v4632_v60 = vld [vmem:[%s6813_s3] ss:$0 sm:$0xff] }
  0x10   :  { %4778 = vmatprep.subr.msk.bf16.mxu0 %vm5761_vm2, %v5779_v7  ;;  %v4762_v59 = vpack.c.bf16 %v149_v58, %v147_v57  ;;  %v151_v9 = vld [vmem:[%s6814_s7] sm:$0x3]  ;;  %s5670_s7 = smov 64  }
  0x11   :  { %4761 = vmatprep.subr.bf16.mxu1 %v4760_v56 }
  0x12   :  { %4763 = vmatpush1.bf16.msra.mxu1 %v4762_v59 }
  0x13   :  { %4784 = vmatprep.subr.msk.bf16.mxu1 %vm5761_vm2, %v5802_v14 }
  0x16   :  { %4641 = vmatmul.mubr.msk.f32.vlgmr.msra.gmra.mrb[2].mxu0 %vm248_vm5, %v5841_v21 }
  0x17   :  { %4781 = vmatpush1.bf16.msk.msra.mxu0 %vm5761_vm2, %v5787_v10  ;;  %482 = vmatprep.mubr.f32.mxu0 %v5667_v0 }
  0x18   :  { %4790 = vmatprep.subr.msk.bf16.mxu0 %vm5761_vm2, %v5779_v7 }
  0x1a   :  { %4644 = vmatmul.mubr.msk.f32.vlgmr.msra.gmra.mrb[4].mxu0 %vm248_vm5, %v414_v24 }
  0x1b   :  { %4793 = vmatpush1.bf16.msk.msra.mxu0 %vm5761_vm2, %v5787_v10  ;;  %636 = vmatprep.mubr.f32.mxu0 %v5667_v0 }
  0x1c   :  { %4796 = vmatprep.subr.msk.bf16.mxu0 %vm5761_vm2, %v5802_v14 }
  0x1e   :  { %4650 = vmatmul.mubr.msk.f32.vlgmr.msra.gmra.mrb[6].mxu0 %vm248_vm5, %v5863_v25 }
  0x1f   :  { %4799 = vmatpush1.bf16.msk.msra.mxu0 %vm5761_vm2, %v5812_v16  ;;  %710 = vmatprep.mubr.f32.mxu0 %v5667_v0 }
  0x20   :  { %4814 = vmatprep.subr.msk.bf16.mxu0 %vm5761_vm2, %v5779_v7 }
  0x26   :  { %4653 = vmatmul.mubr.msk.f32.vlgmr.msra.gmra.mrb[6].mxu0 %vm248_vm5, %v5880_v26 }
  0x27   :  { %4817 = vmatpush1.bf16.msk.msra.mxu0 %vm5761_vm2, %v5787_v10  ;;  %944 = vmatprep.mubr.f32.mxu0 %v5667_v0 }
  0x28   :  { %4820 = vmatprep.subr.msk.bf16.mxu0 %vm5761_vm2, %v5802_v14 }
  0x2a   :  { %4662 = vmatmul.mubr.msk.f32.vlgmr.msra.gmra.mrb[8].mxu0 %vm248_vm5, %v5891_v27 }
  0x2b   :  { %4823 = vmatpush1.bf16.msk.msra.mxu0 %vm5761_vm2, %v5812_v16  ;;  %1018 = vmatprep.mubr.f32.mxu0 %v5667_v0 }
  0x2c   :  { %4838 = vmatprep.subr.msk.bf16.mxu0 %vm5761_vm2, %v5779_v7 }
  0x32   :  { %4665 = vmatmul.mubr.msk.f32.vlgmr.msra.gmra.mrb[8].mxu0 %vm248_vm5, %v5908_v28 }
  0x33   :  { %4841 = vmatpush1.bf16.msk.msra.mxu0 %vm5761_vm2, %v5787_v10  ;;  %1252 = vmatprep.mubr.f32.mxu0 %v5667_v0 }
  0x34   :  { %4844 = vmatprep.subr.msk.bf16.mxu0 %vm5761_vm2, %v5802_v14 }
  0x36   :  { %4674 = vmatmul.mubr.msk.f32.vlgmr.msra.gmra.mrb[10].mxu0 %vm248_vm5, %v5925_v31 }
  0x37   :  { %4847 = vmatpush1.bf16.msk.msra.mxu0 %vm5761_vm2, %v5812_v16  ;;  %1326 = vmatprep.mubr.f32.mxu0 %v5667_v0 }
  0x38   :  { %4861 = vmatprep.subr.bf16.mxu0 %v5930_v32 }
  0x3e   :  { %4677 = vmatmul.mubr.msk.f32.vlgmr.msra.gmra.mrb[10].mxu0 %vm248_vm5, %v414_v24 }
  0x3f   :  { %4863 = vmatpush1.bf16.msra.mxu0 %v5951_v37  ;;  %1577 = vmatprep.mubr.f32.mxu0 %v5667_v0 }
  0x40   :  { %4865 = vmatprep.subr.bf16.mxu0 %v5953_v38 }
  0x43   :  { %4867 = vmatpush1.bf16.msra.mxu0 %v5969_v43 }
  0x44   :  { %4869 = vmatprep.subr.bf16.mxu0 %v5973_v44 }
  0x47   :  { %4871 = vmatpush1.bf16.msra.mxu0 %v5988_v49 }
  0x48   :  { %4873 = vmatprep.subr.bf16.mxu0 %v5991_v50 }
  0x4b   :  { %4875 = vmatpush1.bf16.msra.mxu0 %v6000_v53 }
  0x4c   :  { %4893 = vmatprep.subr.bf16.mxu0 %v5930_v32 }
  0x4e   :  { %1578 = vmatmul.mubr.f32.vlgmr.msra.gmra.mrb[2].mxu0 %v5667_v0 }
  0x4f   :  { %4895 = vmatpush1.bf16.msra.mxu0 %v5951_v37  ;;  %1785 = vmatprep.mubr.f32.mxu0 %v5667_v0 }
  0x50   :  { %4897 = vmatprep.subr.bf16.mxu0 %v5953_v38 }
  0x53   :  { %4899 = vmatpush1.bf16.msra.mxu0 %v5969_v43 }
  0x54   :  { %4901 = vmatprep.subr.bf16.mxu0 %v5973_v44 }
  0x57   :  { %4903 = vmatpush1.bf16.msra.mxu0 %v5988_v49 }
  0x58   :  { %4905 = vmatprep.subr.bf16.mxu0 %v5991_v50 }
  0x5b   :  { %4907 = vmatpush1.bf16.msra.mxu0 %v6000_v53 }
  0x5c   :  { %4925 = vmatprep.subr.bf16.mxu0 %v5930_v32 }
  0xdd   :  { %v138_v61 = vpop.f32.mrb[0].mxu0 }
  0xde   :  { %v139_v62 = vadd.f32 %v4632_v60, %v138_v61  ;;  %v4755_v63 = vpop.f32.mrb[1].mxu0 }
  0xe0   :  { %v142_v1 = vmax.f32 %v139_v62, 0.0 }
  0xe2   :  { %4635 = vmatmul.mubr.msk.f32.vlgmr.msra.gmra.mrb[0].mxu1 %vm163_vm6, %v142_v1 }
  0xe3   :  { %4787 = vmatpush1.bf16.msk.msra.mxu1 %vm5761_vm2, %v5812_v16  ;;  %556 = vmatprep.mubr.f32.mxu1 %v5667_v0 }
  0xe4   :  { %4802 = vmatprep.subr.msk.bf16.mxu1 %vm5761_vm2, %v5779_v7 }
  0xe6   :  { %4647 = vmatmul.mubr.msk.f32.vlgmr.msra.gmra.mrb[2].mxu1 %vm248_vm5, %v5925_v31 }
  0xe7   :  { %4805 = vmatpush1.bf16.msk.msra.mxu1 %vm5761_vm2, %v5787_v10  ;;  %790 = vmatprep.mubr.f32.mxu1 %v5667_v0 }
  0xe8   :  { %4808 = vmatprep.subr.msk.bf16.mxu1 %vm5761_vm2, %v5802_v14 }
  0xea   :  { %4656 = vmatmul.mubr.msk.f32.vlgmr.msra.gmra.mrb[4].mxu1 %vm248_vm5, %v5908_v28 }
  0xeb   :  { %4811 = vmatpush1.bf16.msk.msra.mxu1 %vm5761_vm2, %v5812_v16  ;;  %864 = vmatprep.mubr.f32.mxu1 %v5667_v0 }
  0xec   :  { %4826 = vmatprep.subr.msk.bf16.mxu1 %vm5761_vm2, %v5779_v7 }
  0xed   :  { %v6058_v3 = vpop.f32.mrb[4].mxu0 }
  0xee   :  { %v6060_v4 = vpop.f32.mrb[5].mxu0 }
  0xf2   :  { %4659 = vmatmul.mubr.msk.f32.vlgmr.msra.gmra.mrb[4].mxu1 %vm248_vm5, %v5891_v27 }
  0xf3   :  { %4829 = vmatpush1.bf16.msk.msra.mxu1 %vm5761_vm2, %v5787_v10  ;;  %1098 = vmatprep.mubr.f32.mxu1 %v5667_v0 }
  0xf4   :  { %4832 = vmatprep.subr.msk.bf16.mxu1 %vm5761_vm2, %v5802_v14 }
  0xf6   :  { %4668 = vmatmul.mubr.msk.f32.vlgmr.msra.gmra.mrb[6].mxu1 %vm248_vm5, %v5880_v26 }
  0xf7   :  { %4835 = vmatpush1.bf16.msk.msra.mxu1 %vm5761_vm2, %v5812_v16  ;;  %1172 = vmatprep.mubr.f32.mxu1 %v5667_v0 }
  0xf8   :  { %4850 = vmatprep.subr.msk.bf16.mxu1 %vm5761_vm2, %v5779_v7  ;;  %v6107_v7 = vshrl.u32 %v153_v6, 7 }
  0xfa   :  { %v155_v8 = vsub.s32 0, %v6107_v7 }
  0xfe   :  { %4671 = vmatmul.mubr.msk.f32.vlgmr.msra.gmra.mrb[6].mxu1 %vm248_vm5, %v5863_v25 }
  0xff   :  { %4853 = vmatpush1.bf16.msk.msra.mxu1 %vm5761_vm2, %v5787_v10  ;;  %1406 = vmatprep.mubr.f32.mxu1 %v5667_v0  ;;  %v156_v10 = vrot.slane %v151_v9, %v155_v8 }
 0x100   :  { %4856 = vmatprep.subr.msk.bf16.mxu1 %vm5761_vm2, %v5802_v14  ;;  %v159_v14 = vsub.s32 1, %v6107_v7 }
 0x102   :  { %4680 = vmatmul.mubr.msk.f32.vlgmr.msra.gmra.mrb[8].mxu1 %vm248_vm5, %v5841_v21  ;;  %v160_v17 = vrot.slane %v151_v9, %v159_v14 }
 0x103   :  { %4859 = vmatpush1.bf16.msk.msra.mxu1 %vm5761_vm2, %v5812_v16  ;;  %1480 = vmatprep.mubr.f32.mxu1 %v5667_v0 }
 0x104   :  { %4877 = vmatprep.subr.bf16.mxu1 %v5930_v32 }
 0x10a   :  { %4683 = vmatmul.mubr.msk.f32.vlgmr.msra.gmra.mrb[8].mxu1 %vm248_vm5, %v5810_v15 }
 0x10b   :  { %4879 = vmatpush1.bf16.msra.mxu1 %v5951_v37  ;;  %1681 = vmatprep.mubr.f32.mxu1 %v5667_v0 }
 0x10c   :  { %4881 = vmatprep.subr.bf16.mxu1 %v5953_v38 }
 0x10f   :  { %4883 = vmatpush1.bf16.msra.mxu1 %v5969_v43 }
 0x110   :  { %4885 = vmatprep.subr.bf16.mxu1 %v5973_v44 }
 0x113   :  { %4887 = vmatpush1.bf16.msra.mxu1 %v5988_v49 }
 0x114   :  { %4889 = vmatprep.subr.bf16.mxu1 %v5991_v50 }
 0x117   :  { %4891 = vmatpush1.bf16.msra.mxu1 %v6000_v53 }
 0x118   :  { %4909 = vmatprep.subr.bf16.mxu1 %v5930_v32 }
 0x121   :  { %v1579_v2 = vpop.f32.mrb[2].mxu0 }
 0x122   :  { %v1581_v5 = vpop.f32.mrb[3].mxu0 }
 0x1b5   :  { %v233_v11 = vpop.f32.mrb[0].mxu1 }
 0x1b6   :  { %v6115_v12 = vadd.f32 %v233_v11, %v156_v10  ;;  %v235_v13 = vpop.f32.mrb[1].mxu1 }
 0x1b7   :  { %v6121_v18 = vadd.f32 %v235_v13, %v160_v17 }
 0x1b8   :  { %v5372_v15 = vadd.f32 %v1579_v2, %v6115_v12  ;;  %v5374_v36 = vadd.f32 %v6058_v3, %v6115_v12 }
 0x1b9   :  { %v5373_v19 = vadd.f32 %v1581_v5, %v6121_v18  ;;  %v5376_v40 = vadd.f32 %v6060_v4, %v6121_v18 }
 0x1ba   :  { %v4684_v16 = vmul.f32 -1.442695, %v5372_v15 }
 0x1bb   :  { %v4685_v25 = vmul.f32 -1.442695, %v5373_v19 }
 0x1bc   :  { %5475 = vpow2.f32 %v4684_v16 }
 0x1bd   :  { %5477 = vtanh.f32 %v5373_v19 }
 0x1c6   :  { %v5476_v20 = vpop.eup %5475 }
 0x1c7   :  { %v1589_v21 = vadd.f32 1.0, %v5476_v20  ;;  %v5478_v22 = vpop.eup %5477 }
 0x1c9   :  { %5479 = vrcp.f32 %v1589_v21 }
 0x1ca   :  { %5481 = vpow2.f32 %v4685_v25 }
 0x1d3   :  { %v5480_v23 = vpop.eup %5479 }
 0x1d4   :  { %v1600_v24 = vmul.f32 %v5480_v23, %v5478_v22  ;;  %v5482_v26 = vpop.eup %5481  ;;  %v1599_v28 = vmul.f32 0.0, %v5480_v23 }
 0x1d5   :  { %v1596_v27 = vadd.f32 1.0, %v5482_v26 }
 0x1d6   :  { %1602 = vrot.lane.b32.xlu0 %v1600_v24, %s5670_s7 }
 0x1d7   :  { %5483 = vrcp.f32 %v1596_v27 }
 0x1e1   :  { %v5484_v31 = vpop.eup %5483 }
 0x248   :  { %v1603_v29 = vpop.permute.xlu0 %1602 }
 0x249   :  { %v1605_v30 = vadd.f32 %v1603_v29, %v1599_v28 }
 0x24b   :  { %5485 = vtanh.f32 %v1605_v30 }
 0x255   :  { %v5486_v33 = vpop.eup %5485 }
 0x256   :  { %v1607_v34 = vmul.f32 %v5486_v33, %v5484_v31 }
 0x258   :  { %1609 = vrot.lane.b32.xlu0 %v1607_v34, %s5670_s7 }
 0x2ca   :  { %v1610_v35 = vpop.permute.xlu0 %1609 }
 0x2cb   :  { %1612 = vst.msk [vmem:[#allocation3] sm:$0xff] %vm1509_vm7, %v1610_v35  ;;  %4686 = vmatmul.mubr.msk.f32.vlgmr.msra.gmra.mrb[2].mxu1 %vm1509_vm7, %v1610_v35 }
 0x2cc   :  { %4911 = vmatpush1.bf16.msra.mxu1 %v5951_v37  ;;  %1889 = vmatprep.mubr.f32.mxu1 %v5667_v0 }
 0x2cd   :  { %4913 = vmatprep.subr.bf16.mxu1 %v5953_v38 }
 0x2d0   :  { %4915 = vmatpush1.bf16.msra.mxu1 %v5969_v43 }
 0x2d1   :  { %4917 = vmatprep.subr.bf16.mxu1 %v5973_v44 }
 0x2d4   :  { %4919 = vmatpush1.bf16.msra.mxu1 %v5988_v49 }
 0x2d5   :  { %4921 = vmatprep.subr.bf16.mxu1 %v5991_v50 }
 0x2d8   :  { %4923 = vmatpush1.bf16.msra.mxu1 %v6000_v53 }
 0x2d9   :  { %4941 = vmatprep.subr.bf16.mxu1 %v5930_v32 }
 0x39e   :  { %v1683_v39 = vpop.f32.mrb[2].mxu1 }
 0x39f   :  { %v5375_v41 = vadd.f32 %v5374_v36, %v1683_v39  ;;  %v1685_v42 = vpop.f32.mrb[3].mxu1 }
 0x3a0   :  { %v5377_v45 = vadd.f32 %v5376_v40, %v1685_v42 }
 0x3a1   :  { %v4687_v46 = vmul.f32 -1.442695, %v5375_v41 }
 0x3a2   :  { %v4688_v55 = vmul.f32 -1.442695, %v5377_v45 }
 0x3a3   :  { %5487 = vpow2.f32 %v4687_v46 }
 0x3a4   :  { %5489 = vtanh.f32 %v5377_v45 }
 0x3ad   :  { %v5488_v47 = vpop.eup %5487 }
 0x3ae   :  { %v1693_v48 = vadd.f32 1.0, %v5488_v47  ;;  %v5490_v51 = vpop.eup %5489 }
 0x3b0   :  { %5491 = vrcp.f32 %v1693_v48 }
 0x3b1   :  { %5493 = vpow2.f32 %v4688_v55 }
 0x3ba   :  { %v5492_v52 = vpop.eup %5491 }
 0x3bb   :  { %v1704_v54 = vmul.f32 %v5492_v52, %v5490_v51  ;;  %v5494_v56 = vpop.eup %5493  ;;  %v1703_v58 = vmul.f32 %v5492_v52, %v1605_v30 }
 0x3bc   :  { %v1700_v57 = vadd.f32 1.0, %v5494_v56 }
 0x3bd   :  { %1706 = vrot.lane.b32.xlu1 %v1704_v54, %s5670_s7 }
 0x3be   :  { %5495 = vrcp.f32 %v1700_v57 }
 0x3c8   :  { %v5496_v61 = vpop.eup %5495 }
 0x42f   :  { %v1707_v59 = vpop.permute.xlu1 %1706 }
 0x430   :  { %v1709_v60 = vadd.f32 %v1707_v59, %v1703_v58 }
 0x432   :  { %5497 = vtanh.f32 %v1709_v60 }
 0x43c   :  { %v5498_v62 = vpop.eup %5497 }
 0x43d   :  { %v1711_v63 = vmul.f32 %v5498_v62, %v5496_v61 }
 0x43f   :  { %1713 = vrot.lane.b32.xlu1 %v1711_v63, %s5670_s7 }
 0x4b1   :  { %v1714_v1 = vpop.permute.xlu1 %1713 }
 0x4b2   :  { %1716 = vst.msk [vmem:[#allocation3 + $0x8] sm:$0xff] %vm1509_vm7, %v1714_v1  ;;  %4689 = vmatmul.mubr.msk.f32.vlgmr.msra.gmra.mrb[6].mxu0 %vm1509_vm7, %v1714_v1 }
 0x4b3   :  { %4927 = vmatpush1.bf16.msra.mxu0 %v5951_v37  ;;  %1993 = vmatprep.mubr.f32.mxu0 %v5667_v0 }
 0x4b4   :  { %4929 = vmatprep.subr.bf16.mxu0 %v5953_v38 }
 0x4b7   :  { %4931 = vmatpush1.bf16.msra.mxu0 %v5969_v43 }
 0x4b8   :  { %4933 = vmatprep.subr.bf16.mxu0 %v5973_v44 }
 0x4bb   :  { %4935 = vmatpush1.bf16.msra.mxu0 %v5988_v49 }
 0x4bc   :  { %4937 = vmatprep.subr.bf16.mxu0 %v5991_v50 }
 0x4bf   :  { %4939 = vmatpush1.bf16.msra.mxu0 %v6000_v53 }
 0x4c0   :  { %4957 = vmatprep.subr.bf16.mxu0 %v5930_v32 }
 0x585   :  { %v1787_v3 = vpop.f32.mrb[6].mxu0 }
 0x586   :  { %v5378_v4 = vadd.f32 %v1787_v3, %v6115_v12  ;;  %v1789_v2 = vpop.f32.mrb[7].mxu0 }
 0x587   :  { %v5379_v6 = vadd.f32 %v1789_v2, %v6121_v18 }
 0x588   :  { %v4690_v5 = vmul.f32 -1.442695, %v5378_v4 }
 0x589   :  { %v4691_v16 = vmul.f32 -1.442695, %v5379_v6 }
 0x58a   :  { %5499 = vpow2.f32 %v4690_v5 }
 0x58b   :  { %5501 = vtanh.f32 %v5379_v6 }
 0x594   :  { %v5500_v9 = vpop.eup %5499 }
 0x595   :  { %v1797_v10 = vadd.f32 1.0, %v5500_v9  ;;  %v5502_v11 = vpop.eup %5501 }
 0x597   :  { %5503 = vrcp.f32 %v1797_v10 }
 0x598   :  { %5505 = vpow2.f32 %v4691_v16 }
 0x5a1   :  { %v5504_v13 = vpop.eup %5503 }
 0x5a2   :  { %v1808_v15 = vmul.f32 %v5504_v13, %v5502_v11  ;;  %v5506_v17 = vpop.eup %5505  ;;  %v1807_v20 = vmul.f32 %v5504_v13, %v1709_v60 }
 0x5a3   :  { %v1804_v19 = vadd.f32 1.0, %v5506_v17 }
 0x5a4   :  { %1810 = vrot.lane.b32.xlu0 %v1808_v15, %s5670_s7 }
 0x5a5   :  { %5507 = vrcp.f32 %v1804_v19 }
 0x5af   :  { %v5508_v23 = vpop.eup %5507 }
 0x616   :  { %v1811_v21 = vpop.permute.xlu0 %1810 }
 0x617   :  { %v1813_v22 = vadd.f32 %v1811_v21, %v1807_v20 }
 0x619   :  { %5509 = vtanh.f32 %v1813_v22 }
 0x623   :  { %v5510_v24 = vpop.eup %5509 }
 0x624   :  { %v1815_v25 = vmul.f32 %v5510_v24, %v5508_v23 }
 0x626   :  { %1817 = vrot.lane.b32.xlu1 %v1815_v25, %s5670_s7 }
 0x698   :  { %v1818_v26 = vpop.permute.xlu1 %1817 }
 0x699   :  { %1820 = vst.msk [vmem:[#allocation3 + $0x10] sm:$0xff] %vm1509_vm7, %v1818_v26  ;;  %4692 = vmatmul.mubr.msk.f32.vlgmr.msra.gmra.mrb[4].mxu1 %vm1509_vm7, %v1818_v26 }
 0x69a   :  { %4943 = vmatpush1.bf16.msra.mxu1 %v5951_v37  ;;  %2097 = vmatprep.mubr.f32.mxu1 %v5667_v0 }
 0x69b   :  { %4945 = vmatprep.subr.bf16.mxu1 %v5953_v38 }
 0x69e   :  { %4947 = vmatpush1.bf16.msra.mxu1 %v5969_v43 }
 0x69f   :  { %4949 = vmatprep.subr.bf16.mxu1 %v5973_v44 }
 0x6a2   :  { %4951 = vmatpush1.bf16.msra.mxu1 %v5988_v49 }
 0x6a3   :  { %4953 = vmatprep.subr.bf16.mxu1 %v5991_v50 }
 0x6a6   :  { %4955 = vmatpush1.bf16.msra.mxu1 %v6000_v53 }
 0x6a7   :  { %4973 = vmatprep.subr.bf16.mxu1 %v5930_v32 }
 0x76c   :  { %v1891_v27 = vpop.f32.mrb[4].mxu1 }
 0x76d   :  { %v5380_v28 = vadd.f32 %v1891_v27, %v6115_v12  ;;  %v1893_v29 = vpop.f32.mrb[5].mxu1 }
 0x76e   :  { %v5381_v31 = vadd.f32 %v1893_v29, %v6121_v18 }
 0x76f   :  { %v4693_v30 = vmul.f32 -1.442695, %v5380_v28 }
 0x770   :  { %v4694_v40 = vmul.f32 -1.442695, %v5381_v31 }
 0x771   :  { %5511 = vpow2.f32 %v4693_v30 }
 0x772   :  { %5513 = vtanh.f32 %v5381_v31 }
 0x77b   :  { %v5512_v33 = vpop.eup %5511 }
 0x77c   :  { %v1901_v34 = vadd.f32 1.0, %v5512_v33  ;;  %v5514_v35 = vpop.eup %5513 }
 0x77e   :  { %5515 = vrcp.f32 %v1901_v34 }
 0x77f   :  { %5517 = vpow2.f32 %v4694_v40 }
 0x788   :  { %v5516_v36 = vpop.eup %5515 }
 0x789   :  { %v1912_v39 = vmul.f32 %v5516_v36, %v5514_v35  ;;  %v5518_v32 = vpop.eup %5517  ;;  %v1911_v42 = vmul.f32 %v5516_v36, %v1813_v22 }
 0x78a   :  { %v1908_v41 = vadd.f32 1.0, %v5518_v32 }
 0x78b   :  { %1914 = vrot.lane.b32.xlu0 %v1912_v39, %s5670_s7 }
 0x78c   :  { %5519 = vrcp.f32 %v1908_v41  ;;  %v2358_v41 = vld [vmem:[%s6815_s10 + $0x8] sm:$0xff] }
 0x796   :  { %v5520_v47 = vpop.eup %5519 }
 0x7fd   :  { %v1915_v45 = vpop.permute.xlu0 %1914 }
 0x7fe   :  { %v1917_v46 = vadd.f32 %v1915_v45, %v1911_v42  ;;  %v2360_v42 = vld [vmem:[%s6815_s10 + $0x18] sm:$0xff] }
 0x7ff   :  { %v6213_v45 = vpack.c.bf16 %v2360_v42, %v2358_v41  ;;  %v6373_v42 = vld [vmem:[#allocation3 + $0x8] sm:$0xff] }
 0x800   :  { %5521 = vtanh.f32 %v1917_v46 }
 0x80a   :  { %v5522_v48 = vpop.eup %5521 }
 0x80b   :  { %v1919_v51 = vmul.f32 %v5522_v48, %v5520_v47 }
 0x80d   :  { %1921 = vrot.lane.b32.xlu1 %v1919_v51, %s5670_s7 }
 0x87f   :  { %v1922_v52 = vpop.permute.xlu1 %1921 }
 0x880   :  { %1924 = vst.msk [vmem:[#allocation3 + $0x18] sm:$0xff] %vm1509_vm7, %v1922_v52  ;;  %4695 = vmatmul.mubr.msk.f32.vlgmr.msra.gmra.mrb[8].mxu0 %vm1509_vm7, %v1922_v52 }
 0x881   :  { %4959 = vmatpush1.bf16.msra.mxu0 %v5951_v37  ;;  %2201 = vmatprep.mubr.f32.mxu0 %v5667_v0 }
 0x882   :  { %4961 = vmatprep.subr.bf16.mxu0 %v5953_v38 }
 0x885   :  { %4963 = vmatpush1.bf16.msra.mxu0 %v5969_v43 }
 0x886   :  { %4965 = vmatprep.subr.bf16.mxu0 %v5973_v44 }
 0x889   :  { %4967 = vmatpush1.bf16.msra.mxu0 %v5988_v49 }
 0x88a   :  { %4969 = vmatprep.subr.bf16.mxu0 %v5991_v50 }
 0x88d   :  { %4971 = vmatpush1.bf16.msra.mxu0 %v6000_v53 }
 0x88e   :  { %4989 = vmatprep.subr.bf16.mxu0 %v6213_v45 }
 0x953   :  { %v1995_v54 = vpop.f32.mrb[8].mxu0 }
 0x954   :  { %v5382_v55 = vadd.f32 %v1995_v54, %v6115_v12  ;;  %v1997_v56 = vpop.f32.mrb[9].mxu0  ;;  %v2357_v54 = vld [vmem:[%s6815_s10] sm:$0xff] }
 0x955   :  { %v5383_v58 = vadd.f32 %v1997_v56, %v6121_v18 }
 0x956   :  { %v4696_v57 = vmul.f32 -1.442695, %v5382_v55  ;;  %v2359_v55 = vld [vmem:[%s6815_s10 + $0x10] sm:$0xff] }
 0x957   :  { %v4697_v1 = vmul.f32 -1.442695, %v5383_v58 }
 0x958   :  { %5523 = vpow2.f32 %v4696_v57  ;;  %v6225_v57 = vpack.c.bf16 %v2359_v55, %v2357_v54 }
 0x959   :  { %5525 = vtanh.f32 %v5383_v58  ;;  %v2362_v58 = vld [vmem:[%s6815_s10 + $0x28] sm:$0xff] }
 0x962   :  { %v5524_v59 = vpop.eup %5523 }
 0x963   :  { %v2005_v60 = vadd.f32 1.0, %v5524_v59  ;;  %v5526_v61 = vpop.eup %5525  ;;  %v2364_v59 = vld [vmem:[%s6815_s10 + $0x38] sm:$0xff] }
 0x965   :  { %5527 = vrcp.f32 %v2005_v60  ;;  %v6235_v60 = vpack.c.bf16 %v2364_v59, %v2362_v58 }
 0x966   :  { %5529 = vpow2.f32 %v4697_v1  ;;  %v2366_v1 = vld [vmem:[%s6815_s10 + $0x48] sm:$0xff] }
 0x96f   :  { %v5528_v62 = vpop.eup %5527 }
 0x970   :  { %v2016_v63 = vmul.f32 %v5528_v62, %v5526_v61  ;;  %v5530_v3 = vpop.eup %5529  ;;  %v2015_v2 = vmul.f32 %v5528_v62, %v1917_v46  ;;  %v2361_v61 = vld [vmem:[%s6815_s10 + $0x20] sm:$0xff]  ;;  %v2363_v62 = vld [vmem:[%s6815_s10 + $0x30] sm:$0xff] }
 0x971   :  { %v2012_v4 = vadd.f32 1.0, %v5530_v3  ;;  %v2368_v3 = vld [vmem:[%s6815_s10 + $0x58] sm:$0xff] }
 0x972   :  { %2018 = vrot.lane.b32.xlu0 %v2016_v63, %s5670_s7  ;;  %v6243_v63 = vpack.c.bf16 %v2363_v62, %v2361_v61 }
 0x973   :  { %5531 = vrcp.f32 %v2012_v4  ;;  %v6253_v4 = vpack.c.bf16 %v2368_v3, %v2366_v1 }
 0x97d   :  { %v5532_v9 = vpop.eup %5531 }
 0x9e4   :  { %v2019_v5 = vpop.permute.xlu0 %2018 }
 0x9e5   :  { %v2021_v6 = vadd.f32 %v2019_v5, %v2015_v2  ;;  %v2365_v2 = vld [vmem:[%s6815_s10 + $0x40] sm:$0xff]  ;;  %v2367_v5 = vld [vmem:[%s6815_s10 + $0x50] sm:$0xff] }
 0x9e7   :  { %5533 = vtanh.f32 %v2021_v6 }
 0x9f1   :  { %v5534_v10 = vpop.eup %5533 }
 0x9f2   :  { %v2023_v11 = vmul.f32 %v5534_v10, %v5532_v9  ;;  %v2370_v10 = vld [vmem:[%s6815_s10 + $0x68] sm:$0xff] }
 0x9f4   :  { %2025 = vrot.lane.b32.xlu1 %v2023_v11, %s5670_s7  ;;  %v2372_v11 = vld [vmem:[%s6815_s10 + $0x78] sm:$0xff] }
 0xa66   :  { %v2026_v13 = vpop.permute.xlu1 %2025 }
 0xa67   :  { %2028 = vst.msk [vmem:[#allocation3 + $0x20] sm:$0xff] %vm1509_vm7, %v2026_v13  ;;  %4698 = vmatmul.mubr.msk.f32.vlgmr.msra.gmra.mrb[6].mxu1 %vm1509_vm7, %v2026_v13 }
 0xa68   :  { %4975 = vmatpush1.bf16.msra.mxu1 %v5951_v37  ;;  %2305 = vmatprep.mubr.f32.mxu1 %v5667_v0 }
 0xa69   :  { %4977 = vmatprep.subr.bf16.mxu1 %v5953_v38 }
 0xa6c   :  { %4979 = vmatpush1.bf16.msra.mxu1 %v5969_v43 }
 0xa6d   :  { %4981 = vmatprep.subr.bf16.mxu1 %v5973_v44 }
 0xa70   :  { %4983 = vmatpush1.bf16.msra.mxu1 %v5988_v49 }
 0xa71   :  { %4985 = vmatprep.subr.bf16.mxu1 %v5991_v50 }
 0xa74   :  { %4987 = vmatpush1.bf16.msra.mxu1 %v6000_v53 }
 0xa75   :  { %5021 = vmatprep.subr.bf16.mxu1 %v6213_v45 }
 0xb3a   :  { %v2099_v15 = vpop.f32.mrb[6].mxu1 }
 0xb3b   :  { %v5384_v16 = vadd.f32 %v2099_v15, %v6115_v12  ;;  %v2101_v17 = vpop.f32.mrb[7].mxu1  ;;  %v6271_v15 = vpack.c.bf16 %v2372_v11, %v2370_v10 }
 0xb3c   :  { %v5385_v37 = vadd.f32 %v2101_v17, %v6121_v18  ;;  %v2371_v17 = vld [vmem:[%s6815_s10 + $0x70] sm:$0xff] }
 0xb3d   :  { %v4699_v19 = vmul.f32 -1.442695, %v5384_v16  ;;  %v2369_v16 = vld [vmem:[%s6815_s10 + $0x60] sm:$0xff] }
 0xb3e   :  { %v4700_v49 = vmul.f32 -1.442695, %v5385_v37 }
 0xb3f   :  { %5535 = vpow2.f32 %v4699_v19 }
 0xb40   :  { %5537 = vtanh.f32 %v5385_v37  ;;  %v6279_v37 = vpack.c.bf16 %v2371_v17, %v2369_v16 }
 0xb49   :  { %v5536_v20 = vpop.eup %5535 }
 0xb4a   :  { %v2109_v38 = vadd.f32 1.0, %v5536_v20  ;;  %v5538_v43 = vpop.eup %5537  ;;  %v2342_v20 = vld [vmem:[%s6816_s9 + $0x8] sm:$0xff] }
 0xb4c   :  { %5539 = vrcp.f32 %v2109_v38  ;;  %v2344_v38 = vld [vmem:[%s6816_s9 + $0x18] sm:$0xff] }
 0xb4d   :  { %5541 = vpow2.f32 %v4700_v49  ;;  %v2343_v49 = vld [vmem:[%s6816_s9 + $0x10] sm:$0xff] }
 0xb56   :  { %v5540_v44 = vpop.eup %5539 }
 0xb57   :  { %v2120_v21 = vmul.f32 %v5540_v44, %v5538_v43  ;;  %v5542_v50 = vpop.eup %5541  ;;  %v2119_v22 = vmul.f32 %v5540_v44, %v2021_v6  ;;  %v6261_v6 = vpack.c.bf16 %v2367_v5, %v2365_v2  ;;  %v6290_v43 = vpack.c.bf16 %v2344_v38, %v2342_v20  ;;  %v3618_v20 = vld [vmem:[%s6817_s12 + $0x8] sm:$0xff]  ;;  %v3620_v38 = vld [vmem:[%s6817_s12 + $0x18] sm:$0xff] }
 0xb58   :  { %v2116_v53 = vadd.f32 1.0, %v5542_v50  ;;  %v2346_v50 = vld [vmem:[%s6816_s9 + $0x28] sm:$0xff] }
 0xb59   :  { %2122 = vrot.lane.b32.xlu0 %v2120_v21, %s5670_s7  ;;  %v2341_v21 = vld [vmem:[%s6816_s9] sm:$0xff] }
 0xb5a   :  { %5543 = vrcp.f32 %v2116_v53  ;;  %v2348_v53 = vld [vmem:[%s6816_s9 + $0x38] sm:$0xff] }
 0xb64   :  { %v5544_v25 = vpop.eup %5543 }
 0xbcb   :  { %v2123_v23 = vpop.permute.xlu0 %2122 }
 0xbcc   :  { %v2125_v24 = vadd.f32 %v2123_v23, %v2119_v22  ;;  %v6315_v22 = vpack.c.bf16 %v2343_v49, %v2341_v21  ;;  %v6318_v23 = vpack.c.bf16 %v2348_v53, %v2346_v50  ;;  %v3617_v21 = vld [vmem:[%s6817_s12] sm:$0xff]  ;;  %v3619_v49 = vld [vmem:[%s6817_s12 + $0x10] sm:$0xff]  ;;  %v3622_v50 = vld [vmem:[%s6817_s12 + $0x28] sm:$0xff] }
 0xbcd   :  { %v3624_v53 = vld [vmem:[%s6817_s12 + $0x38] sm:$0xff] }
 0xbce   :  { %5545 = vtanh.f32 %v2125_v24 }
 0xbd8   :  { %v5546_v26 = vpop.eup %5545 }
 0xbd9   :  { %v2127_v27 = vmul.f32 %v5546_v26, %v5544_v25  ;;  %v2347_v25 = vld [vmem:[%s6816_s9 + $0x30] sm:$0xff] }
 0xbdb   :  { %2129 = vrot.lane.b32.xlu1 %v2127_v27, %s5670_s7  ;;  %v2350_v27 = vld [vmem:[%s6816_s9 + $0x48] sm:$0xff] }
 0xc4d   :  { %v2130_v28 = vpop.permute.xlu1 %2129 }
 0xc4e   :  { %2132 = vst.msk [vmem:[#allocation3 + $0x28] sm:$0xff] %vm1509_vm7, %v2130_v28  ;;  %4701 = vmatmul.mubr.msk.f32.vlgmr.msra.gmra.mrb[10].mxu0 %vm1509_vm7, %v2130_v28  ;;  %v2352_v28 = vld [vmem:[%s6816_s9 + $0x58] sm:$0xff] }
 0xc4f   :  { %2443 = vmatprep.mubr.f32.mxu0 %v5667_v0  ;;  %4991 = vmatpush1.bf16.msra.mxu0 %v6225_v57 }
 0xc50   :  { %4993 = vmatprep.subr.bf16.mxu0 %v6235_v60 }
 0xc53   :  { %4995 = vmatpush1.bf16.msra.mxu0 %v6243_v63 }
 0xc54   :  { %4997 = vmatprep.subr.bf16.mxu0 %v6253_v4 }
 0xc57   :  { %4999 = vmatpush1.bf16.msra.mxu0 %v6261_v6 }
 0xc58   :  { %5001 = vmatprep.subr.bf16.mxu0 %v6271_v15 }
 0xc5b   :  { %5003 = vmatpush1.bf16.msra.mxu0 %v6279_v37 }
 0xc5c   :  { %5005 = vmatprep.subr.bf16.mxu0 %v6290_v43 }
 0xd21   :  { %v2203_v29 = vpop.f32.mrb[10].mxu0 }
 0xd22   :  { %v5386_v30 = vadd.f32 %v2203_v29, %v6115_v12  ;;  %v2205_v31 = vpop.f32.mrb[11].mxu0 }
 0xd23   :  { %v5387_v34 = vadd.f32 %v2205_v31, %v6121_v18  ;;  %v2349_v31 = vld [vmem:[%s6816_s9 + $0x40] sm:$0xff] }
 0xd24   :  { %v4702_v33 = vmul.f32 -1.442695, %v5386_v30  ;;  %v6341_v30 = vpack.c.bf16 %v2352_v28, %v2350_v27  ;;  %v6483_v27 = vpack.c.bf16 %v3624_v53, %v3622_v50  ;;  %v3621_v28 = vld [vmem:[%s6817_s12 + $0x20] sm:$0xff] }
 0xd25   :  { %v4703_v46 = vmul.f32 -1.442695, %v5387_v34 }
 0xd26   :  { %5547 = vpow2.f32 %v4702_v33  ;;  %v2351_v33 = vld [vmem:[%s6816_s9 + $0x50] sm:$0xff] }
 0xd27   :  { %5549 = vtanh.f32 %v5387_v34  ;;  %v2354_v34 = vld [vmem:[%s6816_s9 + $0x68] sm:$0xff] }
 0xd30   :  { %v5548_v35 = vpop.eup %5547 }
 0xd31   :  { %v2213_v36 = vadd.f32 1.0, %v5548_v35  ;;  %v5550_v39 = vpop.eup %5549  ;;  %v2356_v35 = vld [vmem:[%s6816_s9 + $0x78] sm:$0xff] }
 0xd33   :  { %5551 = vrcp.f32 %v2213_v36  ;;  %v6356_v36 = vpack.c.bf16 %v2351_v33, %v2349_v31  ;;  %v3623_v31 = vld [vmem:[%s6817_s12 + $0x30] sm:$0xff]  ;;  %v3626_v33 = vld [vmem:[%s6817_s12 + $0x48] sm:$0xff] }
 0xd34   :  { %5553 = vpow2.f32 %v4703_v46  ;;  %v6386_v46 = vld [vmem:[#allocation3 + $0x20] sm:$0xff] }
 0xd3d   :  { %v5552_v40 = vpop.eup %5551 }
 0xd3e   :  { %v2224_v32 = vmul.f32 %v5552_v40, %v5550_v39  ;;  %v5554_v47 = vpop.eup %5553  ;;  %v2223_v51 = vmul.f32 %v5552_v40, %v2125_v24  ;;  %v2345_v24 = vld [vmem:[%s6816_s9 + $0x20] sm:$0xff]  ;;  %v6359_v39 = vpack.c.bf16 %v2356_v35, %v2354_v34  ;;  %v3628_v34 = vld [vmem:[%s6817_s12 + $0x58] sm:$0xff]  ;;  %v6501_v35 = vpack.c.bf16 %v3623_v31, %v3621_v28 }
 0xd3f   :  { %v2220_v48 = vadd.f32 1.0, %v5554_v47  ;;  %v6337_v29 = vpack.c.bf16 %v2347_v25, %v2345_v24  ;;  %v2353_v40 = vld [vmem:[%s6816_s9 + $0x60] sm:$0xff]  ;;  %v6399_v47 = vld [vmem:[#allocation3 + $0x18] sm:$0xff]  ;;  %v6479_v25 = vpack.c.bf16 %v3619_v49, %v3617_v21 }
 0xd40   :  { %2226 = vrot.lane.b32.xlu0 %v2224_v32, %s5670_s7  ;;  %v2355_v32 = vld [vmem:[%s6816_s9 + $0x70] sm:$0xff] }
 0xd41   :  { %5555 = vrcp.f32 %v2220_v48  ;;  %v6368_v41 = vpack.c.bf16 %v2355_v32, %v2353_v40  ;;  %v6412_v48 = vld [vmem:[#allocation3 + $0x10] sm:$0xff]  ;;  %v6504_v40 = vpack.c.bf16 %v3628_v34, %v3626_v33  ;;  %v3625_v32 = vld [vmem:[%s6817_s12 + $0x40] sm:$0xff] }
 0xd4b   :  { %v5556_v9 = vpop.eup %5555 }
 0xdb2   :  { %v2227_v52 = vpop.permute.xlu0 %2226 }
 0xdb3   :  { %v6223_v56 = vadd.f32 %v2227_v52, %v2223_v51  ;;  %v6425_v51 = vld [vmem:[#allocation3 + $0x28] sm:$0xff]  ;;  %v6438_v52 = vld [vmem:[#allocation3] sm:$0xff] }
 0xdb5   :  { %5557 = vtanh.f32 %v6223_v56 }
 0xdbf   :  { %v5558_v13 = vpop.eup %5557 }
 0xdc0   :  { %v2231_v19 = vmul.f32 %v5558_v13, %v5556_v9 }
 0xdc2   :  { %2233 = vrot.lane.b32.xlu1 %v2231_v19, %s5670_s7 }
 0xe34   :  { %v2234_v44 = vpop.permute.xlu1 %2233 }
 0xe35   :  { %2236 = vst.msk [vmem:[#allocation3 + $0x30] sm:$0xff] %vm1509_vm7, %v2234_v44  ;;  %4704 = vmatmul.mubr.msk.f32.vlgmr.msra.gmra.mrb[8].mxu1 %vm1509_vm7, %v2234_v44  ;;  %v6461_v44 = vpack.c.bf16 %v3620_v38, %v3618_v20 }
 0xe36   :  { %5023 = vmatpush1.bf16.msra.mxu1 %v6225_v57  ;;  %2608 = vmatprep.mubr.f32.mxu1 %v5667_v0 }
 0xe37   :  { %5025 = vmatprep.subr.bf16.mxu1 %v6235_v60 }
 0xe3a   :  { %5027 = vmatpush1.bf16.msra.mxu1 %v6243_v63 }
 0xe3b   :  { %5029 = vmatprep.subr.bf16.mxu1 %v6253_v4 }
 0xe3c   :  { %v6326_v26 = vld [vmem:[#allocation3 + $0x30] sm:$0xff] }
 0xe3e   :  { %5031 = vmatpush1.bf16.msra.mxu1 %v6261_v6 }
 0xe3f   :  { %5033 = vmatprep.subr.bf16.mxu1 %v6271_v15 }
 0xe42   :  { %5035 = vmatpush1.bf16.msra.mxu1 %v6279_v37 }
 0xe43   :  { %5037 = vmatprep.subr.bf16.mxu1 %v6290_v43 }
 0xe45   :  { %4709 = vmatmul.mubr.msk.f32.vlgmr.msra.gmra.mrb[10].mxu1 %vm1509_vm7, %v6326_v26 }
 0xe46   :  { %5039 = vmatpush1.bf16.msra.mxu1 %v6315_v22  ;;  %2682 = vmatprep.mubr.f32.mxu1 %v5667_v0 }
 0xe47   :  { %5041 = vmatprep.subr.bf16.mxu1 %v6318_v23 }
 0xe4a   :  { %5043 = vmatpush1.bf16.msra.mxu1 %v6337_v29 }
 0xe4b   :  { %5045 = vmatprep.subr.bf16.mxu1 %v6341_v30 }
 0xe4e   :  { %5047 = vmatpush1.bf16.msra.mxu1 %v6356_v36 }
 0xe4f   :  { %5049 = vmatprep.subr.bf16.mxu1 %v6359_v39 }
 0xe52   :  { %5051 = vmatpush1.bf16.msra.mxu1 %v6368_v41 }
 0xe53   :  { %5085 = vmatprep.subr.bf16.mxu1 %v6213_v45 }
 0xe55   :  { %4710 = vmatmul.mubr.msk.f32.vlgmr.msra.gmra.mrb[10].mxu1 %vm1509_vm7, %v6373_v42 }
 0xe56   :  { %5087 = vmatpush1.bf16.msra.mxu1 %v6225_v57  ;;  %2916 = vmatprep.mubr.f32.mxu1 %v5667_v0 }
 0xe57   :  { %5089 = vmatprep.subr.bf16.mxu1 %v6235_v60 }
 0xe5a   :  { %5091 = vmatpush1.bf16.msra.mxu1 %v6243_v63 }
 0xe5b   :  { %5093 = vmatprep.subr.bf16.mxu1 %v6253_v4 }
 0xe5e   :  { %5095 = vmatpush1.bf16.msra.mxu1 %v6261_v6 }
 0xe5f   :  { %5097 = vmatprep.subr.bf16.mxu1 %v6271_v15 }
 0xe62   :  { %5099 = vmatpush1.bf16.msra.mxu1 %v6279_v37 }
 0xe63   :  { %5101 = vmatprep.subr.bf16.mxu1 %v6290_v43 }
 0xe65   :  { %4713 = vmatmul.mubr.msk.f32.vlgmr.msra.gmra.mrb[12].mxu1 %vm1509_vm7, %v6386_v46 }
 0xe66   :  { %5103 = vmatpush1.bf16.msra.mxu1 %v6315_v22  ;;  %2990 = vmatprep.mubr.f32.mxu1 %v5667_v0 }
 0xe67   :  { %5105 = vmatprep.subr.bf16.mxu1 %v6318_v23 }
 0xe6a   :  { %5107 = vmatpush1.bf16.msra.mxu1 %v6337_v29 }
 0xe6b   :  { %5109 = vmatprep.subr.bf16.mxu1 %v6341_v30 }
 0xe6e   :  { %5111 = vmatpush1.bf16.msra.mxu1 %v6356_v36 }
 0xe6f   :  { %5113 = vmatprep.subr.bf16.mxu1 %v6359_v39 }
 0xe72   :  { %5115 = vmatpush1.bf16.msra.mxu1 %v6368_v41 }
 0xe73   :  { %5149 = vmatprep.subr.bf16.mxu1 %v6213_v45 }
 0xe75   :  { %4714 = vmatmul.mubr.msk.f32.vlgmr.msra.gmra.mrb[12].mxu1 %vm1509_vm7, %v6399_v47 }
 0xe76   :  { %5151 = vmatpush1.bf16.msra.mxu1 %v6225_v57  ;;  %3224 = vmatprep.mubr.f32.mxu1 %v5667_v0 }
 0xe77   :  { %5153 = vmatprep.subr.bf16.mxu1 %v6235_v60 }
 0xe7a   :  { %5155 = vmatpush1.bf16.msra.mxu1 %v6243_v63 }
 0xe7b   :  { %5157 = vmatprep.subr.bf16.mxu1 %v6253_v4 }
 0xe7e   :  { %5159 = vmatpush1.bf16.msra.mxu1 %v6261_v6 }
 0xe7f   :  { %5161 = vmatprep.subr.bf16.mxu1 %v6271_v15 }
 0xe82   :  { %5163 = vmatpush1.bf16.msra.mxu1 %v6279_v37 }
 0xe83   :  { %5165 = vmatprep.subr.bf16.mxu1 %v6290_v43 }
 0xe85   :  { %4717 = vmatmul.mubr.msk.f32.vlgmr.msra.gmra.mrb[14].mxu1 %vm1509_vm7, %v6412_v48 }
 0xe86   :  { %5167 = vmatpush1.bf16.msra.mxu1 %v6315_v22  ;;  %3298 = vmatprep.mubr.f32.mxu1 %v5667_v0 }
 0xe87   :  { %5169 = vmatprep.subr.bf16.mxu1 %v6318_v23 }
 0xe8a   :  { %5171 = vmatpush1.bf16.msra.mxu1 %v6337_v29 }
 0xe8b   :  { %5173 = vmatprep.subr.bf16.mxu1 %v6341_v30 }
 0xe8e   :  { %5175 = vmatpush1.bf16.msra.mxu1 %v6356_v36 }
 0xe8f   :  { %5177 = vmatprep.subr.bf16.mxu1 %v6359_v39 }
 0xe92   :  { %5179 = vmatpush1.bf16.msra.mxu1 %v6368_v41 }
 0xe93   :  { %5213 = vmatprep.subr.bf16.mxu1 %v6213_v45 }
 0xe95   :  { %4718 = vmatmul.mubr.msk.f32.vlgmr.msra.gmra.mrb[14].mxu1 %vm1509_vm7, %v6425_v51 }
 0xe96   :  { %5215 = vmatpush1.bf16.msra.mxu1 %v6225_v57  ;;  %3532 = vmatprep.mubr.f32.mxu1 %v5667_v0 }
 0xe97   :  { %5217 = vmatprep.subr.bf16.mxu1 %v6235_v60 }
 0xe9a   :  { %5219 = vmatpush1.bf16.msra.mxu1 %v6243_v63 }
 0xe9b   :  { %5221 = vmatprep.subr.bf16.mxu1 %v6253_v4 }
 0xe9e   :  { %5223 = vmatpush1.bf16.msra.mxu1 %v6261_v6 }
 0xe9f   :  { %5225 = vmatprep.subr.bf16.mxu1 %v6271_v15 }
 0xea2   :  { %5227 = vmatpush1.bf16.msra.mxu1 %v6279_v37 }
 0xea3   :  { %5229 = vmatprep.subr.bf16.mxu1 %v6290_v43 }
 0xea5   :  { %4721 = vmatmul.mubr.msk.f32.vlgmr.msra.gmra.mrb[16].mxu1 %vm1509_vm7, %v6438_v52 }
 0xea6   :  { %5231 = vmatpush1.bf16.msra.mxu1 %v6315_v22  ;;  %3606 = vmatprep.mubr.f32.mxu1 %v5667_v0 }
 0xea7   :  { %5233 = vmatprep.subr.bf16.mxu1 %v6318_v23 }
 0xeaa   :  { %5235 = vmatpush1.bf16.msra.mxu1 %v6337_v29 }
 0xeab   :  { %5237 = vmatprep.subr.bf16.mxu1 %v6341_v30 }
 0xeae   :  { %5239 = vmatpush1.bf16.msra.mxu1 %v6356_v36 }
 0xeaf   :  { %5241 = vmatprep.subr.bf16.mxu1 %v6359_v39 }
 0xeb2   :  { %5243 = vmatpush1.bf16.msra.mxu1 %v6368_v41 }
 0xeb3   :  { %5261 = vmatprep.subr.bf16.mxu1 %v6461_v44 }
 0xf08   :  { %v2307_v54 = vpop.f32.mrb[8].mxu1 }
 0xf09   :  { %v5388_v55 = vadd.f32 %v2307_v54, %v6115_v12  ;;  %v2309_v58 = vpop.f32.mrb[9].mxu1  ;;  %v3627_v54 = vld [vmem:[%s6817_s12 + $0x50] sm:$0xff] }
 0xf0a   :  { %v5389_v61 = vadd.f32 %v2309_v58, %v6121_v18  ;;  %v3632_v58 = vld [vmem:[%s6817_s12 + $0x78] sm:$0xff] }
 0xf0b   :  { %v4705_v59 = vmul.f32 -1.442695, %v5388_v55  ;;  %v3630_v55 = vld [vmem:[%s6817_s12 + $0x68] sm:$0xff] }
 0xf0c   :  { %v4706_v9 = vmul.f32 -1.442695, %v5389_v61 }
 0xf0d   :  { %5559 = vpow2.f32 %v4705_v59  ;;  %v6521_v59 = vpack.c.bf16 %v3627_v54, %v3625_v32 }
 0xf0e   :  { %5561 = vtanh.f32 %v5389_v61  ;;  %v6524_v61 = vpack.c.bf16 %v3632_v58, %v3630_v55 }
 0xf17   :  { %v5560_v62 = vpop.eup %5559 }
 0xf18   :  { %v2317_v1 = vadd.f32 1.0, %v5560_v62  ;;  %v5562_v3 = vpop.eup %5561  ;;  %v3629_v62 = vld [vmem:[%s6817_s12 + $0x60] sm:$0xff] }
 0xf1a   :  { %5563 = vrcp.f32 %v2317_v1  ;;  %v3631_v1 = vld [vmem:[%s6817_s12 + $0x70] sm:$0xff] }
 0xf1b   :  { %5565 = vpow2.f32 %v4706_v9 }
 0xf24   :  { %v5564_v2 = vpop.eup %5563 }
 0xf25   :  { %v2328_v5 = vmul.f32 %v5564_v2, %v5562_v3  ;;  %v5566_v10 = vpop.eup %5565  ;;  %v2327_v12 = vmul.f32 %v5564_v2, %v6223_v56  ;;  %v6535_v3 = vpack.c.bf16 %v3631_v1, %v3629_v62 }
 0xf26   :  { %v2324_v11 = vadd.f32 1.0, %v5566_v10 }
 0xf27   :  { %2330 = vrot.lane.b32.xlu0 %v2328_v5, %s5670_s7 }
 0xf28   :  { %5567 = vrcp.f32 %v2324_v11 }
 0xf32   :  { %v5568_v18 = vpop.eup %5567 }
 0xf99   :  { %v2331_v13 = vpop.permute.xlu0 %2330 }
 0xf9a   :  { %v2333_v16 = vadd.f32 %v2331_v13, %v2327_v12 }
 0xf9c   :  { %5569 = vtanh.f32 %v2333_v16 }
 0xfa6   :  { %v5570_v17 = vpop.eup %5569 }
 0xfa7   :  { %v2335_v19 = vmul.f32 %v5570_v17, %v5568_v18 }
 0xfa9   :  { %2337 = vrot.lane.b32.xlu1 %v2335_v19, %s5670_s7 }
0x101b   :  { %v2338_v56 = vpop.permute.xlu1 %2337 }
0x101c   :  { %2340 = vst.msk [vmem:[#allocation3 + $0x38] sm:$0xff] %vm1509_vm7, %v2338_v56 }
0x1023   :  { %v2375_v24 = vld [vmem:[#allocation3 + $0x38] sm:$0xff] }
0x1024   :  { %4707 = vmatmul.mubr.msk.f32.vlgmr.msra.gmra.mrb[12].mxu0 %vm1509_vm7, %v2375_v24  ;;  %4722 = vmatmul.mubr.msk.f32.vlgmr.msra.gmra.mrb[16].mxu1 %vm1509_vm7, %v2375_v24 }
0x1025   :  { %5007 = vmatpush1.bf16.msra.mxu0 %v6315_v22  ;;  %2517 = vmatprep.mubr.f32.mxu0 %v5667_v0 }
0x1026   :  { %5009 = vmatprep.subr.bf16.mxu0 %v6318_v23  ;;  %5263 = vmatpush1.bf16.msra.mxu1 %v6479_v25 }
0x1027   :  { %5265 = vmatprep.subr.bf16.mxu1 %v6483_v27  ;;  %3803 = vmatprep.mubr.f32.mxu1 %v5667_v0 }
0x1029   :  { %5011 = vmatpush1.bf16.msra.mxu0 %v6337_v29 }
0x102a   :  { %5013 = vmatprep.subr.bf16.mxu0 %v6341_v30  ;;  %5267 = vmatpush1.bf16.msra.mxu1 %v6501_v35 }
0x102b   :  { %5269 = vmatprep.subr.bf16.mxu1 %v6504_v40 }
0x102d   :  { %5015 = vmatpush1.bf16.msra.mxu0 %v6356_v36 }
0x102e   :  { %5017 = vmatprep.subr.bf16.mxu0 %v6359_v39  ;;  %5271 = vmatpush1.bf16.msra.mxu1 %v6521_v59 }
0x102f   :  { %5273 = vmatprep.subr.bf16.mxu1 %v6524_v61 }
0x1031   :  { %5019 = vmatpush1.bf16.msra.mxu0 %v6368_v41 }
0x1032   :  { %5053 = vmatprep.subr.bf16.mxu0 %v6213_v45  ;;  %5275 = vmatpush1.bf16.msra.mxu1 %v6535_v3 }
0x1033   :  { %5293 = vmatprep.subr.bf16.mxu1 %v6461_v44 }
0x1034   :  { %4708 = vmatmul.mubr.msk.f32.vlgmr.msra.gmra.mrb[12].mxu0 %vm1509_vm7, %v6438_v52 }
0x1035   :  { %5055 = vmatpush1.bf16.msra.mxu0 %v6225_v57  ;;  %2762 = vmatprep.mubr.f32.mxu0 %v5667_v0 }
0x1036   :  { %5057 = vmatprep.subr.bf16.mxu0 %v6235_v60 }
0x1039   :  { %5059 = vmatpush1.bf16.msra.mxu0 %v6243_v63 }
0x103a   :  { %5061 = vmatprep.subr.bf16.mxu0 %v6253_v4 }
0x103d   :  { %5063 = vmatpush1.bf16.msra.mxu0 %v6261_v6 }
0x103e   :  { %5065 = vmatprep.subr.bf16.mxu0 %v6271_v15 }
0x1041   :  { %5067 = vmatpush1.bf16.msra.mxu0 %v6279_v37 }
0x1042   :  { %5069 = vmatprep.subr.bf16.mxu0 %v6290_v43 }
0x1044   :  { %4711 = vmatmul.mubr.msk.f32.vlgmr.msra.gmra.mrb[14].mxu0 %vm1509_vm7, %v6425_v51 }
0x1045   :  { %5071 = vmatpush1.bf16.msra.mxu0 %v6315_v22  ;;  %2836 = vmatprep.mubr.f32.mxu0 %v5667_v0 }
0x1046   :  { %5073 = vmatprep.subr.bf16.mxu0 %v6318_v23 }
0x1049   :  { %5075 = vmatpush1.bf16.msra.mxu0 %v6337_v29 }
0x104a   :  { %5077 = vmatprep.subr.bf16.mxu0 %v6341_v30 }
0x104d   :  { %5079 = vmatpush1.bf16.msra.mxu0 %v6356_v36 }
0x104e   :  { %5081 = vmatprep.subr.bf16.mxu0 %v6359_v39 }
0x1051   :  { %5083 = vmatpush1.bf16.msra.mxu0 %v6368_v41 }
0x1052   :  { %5117 = vmatprep.subr.bf16.mxu0 %v6213_v45 }
0x1054   :  { %4712 = vmatmul.mubr.msk.f32.vlgmr.msra.gmra.mrb[14].mxu0 %vm1509_vm7, %v6412_v48 }
0x1055   :  { %5119 = vmatpush1.bf16.msra.mxu0 %v6225_v57  ;;  %3070 = vmatprep.mubr.f32.mxu0 %v5667_v0 }
0x1056   :  { %5121 = vmatprep.subr.bf16.mxu0 %v6235_v60 }
0x1059   :  { %5123 = vmatpush1.bf16.msra.mxu0 %v6243_v63 }
0x105a   :  { %5125 = vmatprep.subr.bf16.mxu0 %v6253_v4 }
0x105d   :  { %5127 = vmatpush1.bf16.msra.mxu0 %v6261_v6 }
0x105e   :  { %5129 = vmatprep.subr.bf16.mxu0 %v6271_v15 }
0x1061   :  { %5131 = vmatpush1.bf16.msra.mxu0 %v6279_v37 }
0x1062   :  { %5133 = vmatprep.subr.bf16.mxu0 %v6290_v43 }
0x1064   :  { %4715 = vmatmul.mubr.msk.f32.vlgmr.msra.gmra.mrb[16].mxu0 %vm1509_vm7, %v6399_v47 }
0x1065   :  { %5135 = vmatpush1.bf16.msra.mxu0 %v6315_v22  ;;  %3144 = vmatprep.mubr.f32.mxu0 %v5667_v0 }
0x1066   :  { %5137 = vmatprep.subr.bf16.mxu0 %v6318_v23 }
0x1069   :  { %5139 = vmatpush1.bf16.msra.mxu0 %v6337_v29 }
0x106a   :  { %5141 = vmatprep.subr.bf16.mxu0 %v6341_v30 }
0x106d   :  { %5143 = vmatpush1.bf16.msra.mxu0 %v6356_v36 }
0x106e   :  { %5145 = vmatprep.subr.bf16.mxu0 %v6359_v39 }
0x1071   :  { %5147 = vmatpush1.bf16.msra.mxu0 %v6368_v41 }
0x1072   :  { %5181 = vmatprep.subr.bf16.mxu0 %v6213_v45  ;;  %v2373_v45 = vld [vmem:[%s6818_s11] sm:$0x3] }
0x1074   :  { %4716 = vmatmul.mubr.msk.f32.vlgmr.msra.gmra.mrb[16].mxu0 %vm1509_vm7, %v6386_v46 }
0x1075   :  { %5183 = vmatpush1.bf16.msra.mxu0 %v6225_v57  ;;  %3378 = vmatprep.mubr.f32.mxu0 %v5667_v0  ;;  %v6633_v57 = vrot.slane %v2373_v45, %v155_v8 }
0x1076   :  { %5185 = vmatprep.subr.bf16.mxu0 %v6235_v60 }
0x1079   :  { %5187 = vmatpush1.bf16.msra.mxu0 %v6243_v63 }
0x107a   :  { %5189 = vmatprep.subr.bf16.mxu0 %v6253_v4 }
0x107d   :  { %5191 = vmatpush1.bf16.msra.mxu0 %v6261_v6 }
0x107e   :  { %5193 = vmatprep.subr.bf16.mxu0 %v6271_v15  ;;  %v6638_v15 = vrot.slane %v2373_v45, %v159_v14 }
0x1081   :  { %5195 = vmatpush1.bf16.msra.mxu0 %v6279_v37 }
0x1082   :  { %5197 = vmatprep.subr.bf16.mxu0 %v6290_v43 }
0x1084   :  { %4719 = vmatmul.mubr.msk.f32.vlgmr.msra.gmra.mrb[18].mxu0 %vm1509_vm7, %v6373_v42 }
0x1085   :  { %5199 = vmatpush1.bf16.msra.mxu0 %v6315_v22  ;;  %3452 = vmatprep.mubr.f32.mxu0 %v5667_v0 }
0x1086   :  { %5201 = vmatprep.subr.bf16.mxu0 %v6318_v23 }
0x1089   :  { %5203 = vmatpush1.bf16.msra.mxu0 %v6337_v29 }
0x108a   :  { %5205 = vmatprep.subr.bf16.mxu0 %v6341_v30 }
0x108d   :  { %5207 = vmatpush1.bf16.msra.mxu0 %v6356_v36 }
0x108e   :  { %5209 = vmatprep.subr.bf16.mxu0 %v6359_v39 }
0x1091   :  { %5211 = vmatpush1.bf16.msra.mxu0 %v6368_v41 }
0x1092   :  { %5245 = vmatprep.subr.bf16.mxu0 %v6461_v44 }
0x1094   :  { %4720 = vmatmul.mubr.msk.f32.vlgmr.msra.gmra.mrb[18].mxu0 %vm1509_vm7, %v6326_v26 }
0x1095   :  { %5247 = vmatpush1.bf16.msra.mxu0 %v6479_v25  ;;  %3699 = vmatprep.mubr.f32.mxu0 %v5667_v0 }
0x1096   :  { %5249 = vmatprep.subr.bf16.mxu0 %v6483_v27 }
0x1099   :  { %5251 = vmatpush1.bf16.msra.mxu0 %v6501_v35 }
0x109a   :  { %5253 = vmatprep.subr.bf16.mxu0 %v6504_v40 }
0x109d   :  { %5255 = vmatpush1.bf16.msra.mxu0 %v6521_v59 }
0x109e   :  { %5257 = vmatprep.subr.bf16.mxu0 %v6524_v61 }
0x10a1   :  { %5259 = vmatpush1.bf16.msra.mxu0 %v6535_v3 }
0x10a2   :  { %5277 = vmatprep.subr.bf16.mxu0 %v6461_v44 }
0x10a4   :  { %3700 = vmatmul.mubr.f32.vlgmr.msra.gmra.mrb[12].mxu0 %v5667_v0 }
0x10a5   :  { %5279 = vmatpush1.bf16.msra.mxu0 %v6479_v25  ;;  %3907 = vmatprep.mubr.f32.mxu0 %v5667_v0 }
0x10a6   :  { %5281 = vmatprep.subr.bf16.mxu0 %v6483_v27 }
0x10a9   :  { %5283 = vmatpush1.bf16.msra.mxu0 %v6501_v35 }
0x10aa   :  { %5285 = vmatprep.subr.bf16.mxu0 %v6504_v40 }
0x10ad   :  { %5287 = vmatpush1.bf16.msra.mxu0 %v6521_v59 }
0x10ae   :  { %5289 = vmatprep.subr.bf16.mxu0 %v6524_v61 }
0x10b1   :  { %5291 = vmatpush1.bf16.msra.mxu0 %v6535_v3 }
0x10b2   :  { %5309 = vmatprep.subr.bf16.mxu0 %v6461_v44 }
0x1177   :  { %v3701_v60 = vpop.f32.mrb[12].mxu0 }
0x1178   :  { %v5390_v63 = vadd.f32 %v3701_v60, %v6633_v57  ;;  %v3703_v4 = vpop.f32.mrb[13].mxu0 }
0x1179   :  { %v5391_v37 = vadd.f32 %v3703_v4, %v6638_v15 }
0x117a   :  { %v4723_v6 = vmul.f32 -1.442695, %v5390_v63 }
0x117b   :  { %v4724_v29 = vmul.f32 -1.442695, %v5391_v37 }
0x117c   :  { %5571 = vpow2.f32 %v4723_v6 }
0x117d   :  { %5573 = vtanh.f32 %v5391_v37 }
0x1186   :  { %v5572_v43 = vpop.eup %5571 }
0x1187   :  { %v3711_v22 = vadd.f32 1.0, %v5572_v43  ;;  %v5574_v23 = vpop.eup %5573 }
0x1189   :  { %5575 = vrcp.f32 %v3711_v22 }
0x118a   :  { %5577 = vpow2.f32 %v4724_v29 }
0x1193   :  { %v5576_v26 = vpop.eup %5575 }
0x1194   :  { %v3722_v8 = vmul.f32 %v5576_v26, %v5574_v23  ;;  %v5578_v30 = vpop.eup %5577  ;;  %v3721_v39 = vmul.f32 0.0, %v5576_v26 }
0x1195   :  { %v3718_v36 = vadd.f32 1.0, %v5578_v30 }
0x1196   :  { %3724 = vrot.lane.b32.xlu0 %v3722_v8, %s5670_s7 }
0x1197   :  { %5579 = vrcp.f32 %v3718_v36 }
0x11a1   :  { %v5580_v14 = vpop.eup %5579 }
0x1208   :  { %v3725_v41 = vpop.permute.xlu0 %3724 }
0x1209   :  { %v3727_v7 = vadd.f32 %v3725_v41, %v3721_v39 }
0x120b   :  { %5581 = vtanh.f32 %v3727_v7 }
0x1215   :  { %v5582_v42 = vpop.eup %5581 }
0x1216   :  { %v3729_v46 = vmul.f32 %v5582_v42, %v5580_v14 }
0x1218   :  { %3731 = vrot.lane.b32.xlu1 %v3729_v46, %s5670_s7 }
0x128a   :  { %v3732_v47 = vpop.permute.xlu1 %3731 }
0x128b   :  { %3734 = vst.msk [vmem:[#allocation4] sm:$0xff] %vm1509_vm7, %v3732_v47  ;;  %4725 = vmatmul.mubr.msk.f32.vlgmr.msra.gmra.mrb[10].mxu1 %vm1509_vm7, %v3732_v47 }
0x128c   :  { %5295 = vmatpush1.bf16.msra.mxu1 %v6479_v25  ;;  %4011 = vmatprep.mubr.f32.mxu1 %v5667_v0 }
0x128d   :  { %5297 = vmatprep.subr.bf16.mxu1 %v6483_v27 }
0x1290   :  { %5299 = vmatpush1.bf16.msra.mxu1 %v6501_v35 }
0x1291   :  { %5301 = vmatprep.subr.bf16.mxu1 %v6504_v40 }
0x1294   :  { %5303 = vmatpush1.bf16.msra.mxu1 %v6521_v59 }
0x1295   :  { %5305 = vmatprep.subr.bf16.mxu1 %v6524_v61 }
0x1298   :  { %5307 = vmatpush1.bf16.msra.mxu1 %v6535_v3 }
0x1299   :  { %5325 = vmatprep.subr.bf16.mxu1 %v6461_v44 }
0x135e   :  { %v3805_v48 = vpop.f32.mrb[10].mxu1 }
0x135f   :  { %v5392_v51 = vadd.f32 %v3805_v48, %v6633_v57  ;;  %v3807_v52 = vpop.f32.mrb[11].mxu1 }
0x1360   :  { %v5393_v5 = vadd.f32 %v3807_v52, %v6638_v15 }
0x1361   :  { %v4726_v2 = vmul.f32 -1.442695, %v5392_v51 }
0x1362   :  { %v4727_v16 = vmul.f32 -1.442695, %v5393_v5 }
0x1363   :  { %5583 = vpow2.f32 %v4726_v2 }
0x1364   :  { %5585 = vtanh.f32 %v5393_v5 }
0x136d   :  { %v5584_v9 = vpop.eup %5583 }
0x136e   :  { %v3815_v10 = vadd.f32 1.0, %v5584_v9  ;;  %v5586_v11 = vpop.eup %5585 }
0x1370   :  { %5587 = vrcp.f32 %v3815_v10 }
0x1371   :  { %5589 = vpow2.f32 %v4727_v16 }
0x137a   :  { %v5588_v12 = vpop.eup %5587 }
0x137b   :  { %v3826_v13 = vmul.f32 %v5588_v12, %v5586_v11  ;;  %v5590_v18 = vpop.eup %5589  ;;  %v3825_v19 = vmul.f32 %v5588_v12, %v3727_v7 }
0x137c   :  { %v3822_v17 = vadd.f32 1.0, %v5590_v18 }
0x137d   :  { %3828 = vrot.lane.b32.xlu0 %v3826_v13, %s5670_s7 }
0x137e   :  { %5591 = vrcp.f32 %v3822_v17 }
0x1388   :  { %v5592_v56 = vpop.eup %5591 }
0x13ef   :  { %v3829_v20 = vpop.permute.xlu0 %3828 }
0x13f0   :  { %v3831_v38 = vadd.f32 %v3829_v20, %v3825_v19 }
0x13f2   :  { %5593 = vtanh.f32 %v3831_v38 }
0x13fc   :  { %v5594_v21 = vpop.eup %5593 }
0x13fd   :  { %v3833_v49 = vmul.f32 %v5594_v21, %v5592_v56 }
0x13ff   :  { %3835 = vrot.lane.b32.xlu1 %v3833_v49, %s5670_s7 }
0x1471   :  { %v3836_v50 = vpop.permute.xlu1 %3835 }
0x1472   :  { %3838 = vst.msk [vmem:[#allocation4 + $0x8] sm:$0xff] %vm1509_vm7, %v3836_v50  ;;  %4728 = vmatmul.mubr.msk.f32.vlgmr.msra.gmra.mrb[14].mxu0 %vm1509_vm7, %v3836_v50 }
0x1473   :  { %5311 = vmatpush1.bf16.msra.mxu0 %v6479_v25  ;;  %4115 = vmatprep.mubr.f32.mxu0 %v5667_v0 }
0x1474   :  { %5313 = vmatprep.subr.bf16.mxu0 %v6483_v27 }
0x1477   :  { %5315 = vmatpush1.bf16.msra.mxu0 %v6501_v35 }
0x1478   :  { %5317 = vmatprep.subr.bf16.mxu0 %v6504_v40 }
0x147b   :  { %5319 = vmatpush1.bf16.msra.mxu0 %v6521_v59 }
0x147c   :  { %5321 = vmatprep.subr.bf16.mxu0 %v6524_v61 }
0x147f   :  { %5323 = vmatpush1.bf16.msra.mxu0 %v6535_v3 }
0x1480   :  { %5341 = vmatprep.subr.bf16.mxu0 %v6461_v44 }
0x1545   :  { %v3909_v53 = vpop.f32.mrb[14].mxu0 }
0x1546   :  { %v5394_v24 = vadd.f32 %v3909_v53, %v6633_v57  ;;  %v3911_v28 = vpop.f32.mrb[15].mxu0 }
0x1547   :  { %v5395_v33 = vadd.f32 %v3911_v28, %v6638_v15 }
0x1548   :  { %v4729_v31 = vmul.f32 -1.442695, %v5394_v24 }
0x1549   :  { %v4730_v62 = vmul.f32 -1.442695, %v5395_v33 }
0x154a   :  { %5595 = vpow2.f32 %v4729_v31 }
0x154b   :  { %5597 = vtanh.f32 %v5395_v33 }
0x1554   :  { %v5596_v34 = vpop.eup %5595 }
0x1555   :  { %v3919_v32 = vadd.f32 1.0, %v5596_v34  ;;  %v5598_v54 = vpop.eup %5597 }
0x1557   :  { %5599 = vrcp.f32 %v3919_v32 }
0x1558   :  { %5601 = vpow2.f32 %v4730_v62 }
0x1561   :  { %v5600_v55 = vpop.eup %5599 }
0x1562   :  { %v3930_v58 = vmul.f32 %v5600_v55, %v5598_v54  ;;  %v5602_v1 = vpop.eup %5601  ;;  %v3929_v60 = vmul.f32 %v5600_v55, %v3831_v38 }
0x1563   :  { %v3926_v45 = vadd.f32 1.0, %v5602_v1 }
0x1564   :  { %3932 = vrot.lane.b32.xlu0 %v3930_v58, %s5670_s7 }
0x1565   :  { %5603 = vrcp.f32 %v3926_v45 }
0x156f   :  { %v5604_v6 = vpop.eup %5603 }
0x15d6   :  { %v3933_v63 = vpop.permute.xlu0 %3932 }
0x15d7   :  { %v3935_v4 = vadd.f32 %v3933_v63, %v3929_v60 }
0x15d9   :  { %5605 = vtanh.f32 %v3935_v4 }
0x15e3   :  { %v5606_v37 = vpop.eup %5605 }
0x15e4   :  { %v3937_v43 = vmul.f32 %v5606_v37, %v5604_v6 }
0x15e6   :  { %3939 = vrot.lane.b32.xlu1 %v3937_v43, %s5670_s7 }
0x1658   :  { %v3940_v22 = vpop.permute.xlu1 %3939 }
0x1659   :  { %3942 = vst.msk [vmem:[#allocation4 + $0x10] sm:$0xff] %vm1509_vm7, %v3940_v22  ;;  %4731 = vmatmul.mubr.msk.f32.vlgmr.msra.gmra.mrb[12].mxu1 %vm1509_vm7, %v3940_v22 }
0x165a   :  { %5327 = vmatpush1.bf16.msra.mxu1 %v6479_v25  ;;  %4219 = vmatprep.mubr.f32.mxu1 %v5667_v0 }
0x165b   :  { %5329 = vmatprep.subr.bf16.mxu1 %v6483_v27 }
0x165e   :  { %5331 = vmatpush1.bf16.msra.mxu1 %v6501_v35 }
0x165f   :  { %5333 = vmatprep.subr.bf16.mxu1 %v6504_v40 }
0x1662   :  { %5335 = vmatpush1.bf16.msra.mxu1 %v6521_v59 }
0x1663   :  { %5337 = vmatprep.subr.bf16.mxu1 %v6524_v61 }
0x1666   :  { %5339 = vmatpush1.bf16.msra.mxu1 %v6535_v3 }
0x1667   :  { %5357 = vmatprep.subr.bf16.mxu1 %v6461_v44 }
0x172c   :  { %v4013_v23 = vpop.f32.mrb[12].mxu1 }
0x172d   :  { %v5396_v26 = vadd.f32 %v4013_v23, %v6633_v57  ;;  %v4015_v8 = vpop.f32.mrb[13].mxu1 }
0x172e   :  { %v5397_v30 = vadd.f32 %v4015_v8, %v6638_v15 }
0x172f   :  { %v4732_v29 = vmul.f32 -1.442695, %v5396_v26 }
0x1730   :  { %v4733_v42 = vmul.f32 -1.442695, %v5397_v30 }
0x1731   :  { %5607 = vpow2.f32 %v4732_v29 }
0x1732   :  { %5609 = vtanh.f32 %v5397_v30 }
0x173b   :  { %v5608_v36 = vpop.eup %5607 }
0x173c   :  { %v4023_v39 = vadd.f32 1.0, %v5608_v36  ;;  %v5610_v41 = vpop.eup %5609 }
0x173e   :  { %5611 = vrcp.f32 %v4023_v39 }
0x173f   :  { %5613 = vpow2.f32 %v4733_v42 }
0x1748   :  { %v5612_v7 = vpop.eup %5611 }
0x1749   :  { %v4034_v14 = vmul.f32 %v5612_v7, %v5610_v41  ;;  %v5614_v44 = vpop.eup %5613  ;;  %v4033_v47 = vmul.f32 %v5612_v7, %v3935_v4 }
0x174a   :  { %v4030_v46 = vadd.f32 1.0, %v5614_v44 }
0x174b   :  { %4036 = vrot.lane.b32.xlu0 %v4034_v14, %s5670_s7 }
0x174c   :  { %5615 = vrcp.f32 %v4030_v46 }
0x1756   :  { %v5616_v52 = vpop.eup %5615 }
0x17bd   :  { %v4037_v48 = vpop.permute.xlu0 %4036 }
0x17be   :  { %v4039_v51 = vadd.f32 %v4037_v48, %v4033_v47 }
0x17c0   :  { %5617 = vtanh.f32 %v4039_v51 }
0x17ca   :  { %v5618_v2 = vpop.eup %5617 }
0x17cb   :  { %v4041_v5 = vmul.f32 %v5618_v2, %v5616_v52 }
0x17cd   :  { %4043 = vrot.lane.b32.xlu1 %v4041_v5, %s5670_s7 }
0x183f   :  { %v4044_v9 = vpop.permute.xlu1 %4043 }
0x1840   :  { %4046 = vst.msk [vmem:[#allocation4 + $0x18] sm:$0xff] %vm1509_vm7, %v4044_v9  ;;  %4734 = vmatmul.mubr.msk.f32.vlgmr.msra.gmra.mrb[16].mxu0 %vm1509_vm7, %v4044_v9 }
0x1841   :  { %5343 = vmatpush1.bf16.msra.mxu0 %v6479_v25  ;;  %4323 = vmatprep.mubr.f32.mxu0 %v5667_v0 }
0x1842   :  { %5345 = vmatprep.subr.bf16.mxu0 %v6483_v27 }
0x1845   :  { %5347 = vmatpush1.bf16.msra.mxu0 %v6501_v35 }
0x1846   :  { %5349 = vmatprep.subr.bf16.mxu0 %v6504_v40 }
0x1849   :  { %5351 = vmatpush1.bf16.msra.mxu0 %v6521_v59 }
0x184a   :  { %5353 = vmatprep.subr.bf16.mxu0 %v6524_v61 }
0x184d   :  { %5355 = vmatpush1.bf16.msra.mxu0 %v6535_v3 }
0x1913   :  { %v4117_v10 = vpop.f32.mrb[16].mxu0 }
0x1914   :  { %v5398_v11 = vadd.f32 %v4117_v10, %v6633_v57  ;;  %v4119_v12 = vpop.f32.mrb[17].mxu0 }
0x1915   :  { %v5399_v16 = vadd.f32 %v4119_v12, %v6638_v15 }
0x1916   :  { %v4735_v13 = vmul.f32 -1.442695, %v5398_v11 }
0x1917   :  { %v4736_v56 = vmul.f32 -1.442695, %v5399_v16 }
0x1918   :  { %5619 = vpow2.f32 %v4735_v13 }
0x1919   :  { %5621 = vtanh.f32 %v5399_v16 }
0x1922   :  { %v5620_v18 = vpop.eup %5619 }
0x1923   :  { %v4127_v17 = vadd.f32 1.0, %v5620_v18  ;;  %v5622_v19 = vpop.eup %5621 }
0x1925   :  { %5623 = vrcp.f32 %v4127_v17 }
0x1926   :  { %5625 = vpow2.f32 %v4736_v56  ;;  %v6742_v56 = vld [vmem:[%s6820_s14] ss:$0 sm:$0xff] }
0x192f   :  { %v5624_v20 = vpop.eup %5623 }
0x1930   :  { %v4138_v38 = vmul.f32 %v5624_v20, %v5622_v19  ;;  %v5626_v21 = vpop.eup %5625  ;;  %v4137_v50 = vmul.f32 %v5624_v20, %v4039_v51  ;;  %v6733_v20 = vld [vmem:[%s6819_s13] ss:$0 sm:$0xff] }
0x1931   :  { %v4134_v49 = vadd.f32 1.0, %v5626_v21 }
0x1932   :  { %4140 = vrot.lane.b32.xlu0 %v4138_v38, %s5670_s7 }
0x1933   :  { %5627 = vrcp.f32 %v4134_v49 }
0x193d   :  { %v5628_v28 = vpop.eup %5627 }
0x19a4   :  { %v4141_v53 = vpop.permute.xlu0 %4140 }
0x19a5   :  { %v4143_v24 = vadd.f32 %v4141_v53, %v4137_v50  ;;  %v4538_v50 = vld [vmem:[#allocation4 + $0x18] sm:$0xff] }
0x19a7   :  { %5629 = vtanh.f32 %v4143_v24 }
0x19b1   :  { %v5630_v31 = vpop.eup %5629 }
0x19b2   :  { %v4145_v33 = vmul.f32 %v5630_v31, %v5628_v28 }
0x19b4   :  { %4147 = vrot.lane.b32.xlu1 %v4145_v33, %s5670_s7 }
0x1a26   :  { %v4148_v34 = vpop.permute.xlu1 %4147 }
0x1a27   :  { %4150 = vst.msk [vmem:[#allocation4 + $0x20] sm:$0xff] %vm1509_vm7, %v4148_v34  ;;  %4737 = vmatmul.mubr.msk.f32.vlgmr.msra.gmra.mrb[14].mxu1 %vm1509_vm7, %v4148_v34 }
0x1a28   :  { %5359 = vmatpush1.bf16.msra.mxu1 %v6479_v25  ;;  %4427 = vmatprep.mubr.f32.mxu1 %v5667_v0 }
0x1a29   :  { %5361 = vmatprep.subr.bf16.mxu1 %v6483_v27 }
0x1a2c   :  { %5363 = vmatpush1.bf16.msra.mxu1 %v6501_v35 }
0x1a2d   :  { %5365 = vmatprep.subr.bf16.mxu1 %v6504_v40 }
0x1a2e   :  { %v4543_v28 = vld [vmem:[#allocation4 + $0x20] sm:$0xff] }
0x1a2f   :  { %v4544_v33 = vmul.f32 %v6742_v56, %v4543_v28 }
0x1a30   :  { %5367 = vmatpush1.bf16.msra.mxu1 %v6521_v59 }
0x1a31   :  { %5369 = vmatprep.subr.bf16.mxu1 %v6524_v61  ;;  %v4545_v34 = vsel %vm1509_vm7, %v4544_v33, 0.0 }
0x1a34   :  { %5371 = vmatpush1.bf16.msra.mxu1 %v6535_v3 }
0x1afa   :  { %v4221_v32 = vpop.f32.mrb[14].mxu1 }
0x1afb   :  { %v5400_v54 = vadd.f32 %v4221_v32, %v6633_v57  ;;  %v4223_v55 = vpop.f32.mrb[15].mxu1  ;;  %v4562_v32 = vmul.f32 %v6742_v56, %v4538_v50 }
0x1afc   :  { %v5401_v0 = vadd.f32 %v4223_v55, %v6638_v15 }
0x1afd   :  { %v4738_v58 = vmul.f32 -1.442695, %v5400_v54  ;;  %v4563_v54 = vsel %vm1509_vm7, %v4562_v32, 0.0 }
0x1afe   :  { %v4739_v59 = vmul.f32 -1.442695, %v5401_v0 }
0x1aff   :  { %5631 = vpow2.f32 %v4738_v58 }
0x1b00   :  { %5633 = vtanh.f32 %v5401_v0 }
0x1b09   :  { %v5632_v25 = vpop.eup %5631 }
0x1b0a   :  { %v4231_v27 = vadd.f32 1.0, %v5632_v25  ;;  %v5634_v35 = vpop.eup %5633 }
0x1b0c   :  { %5635 = vrcp.f32 %v4231_v27  ;;  %v21_v27 = vstv %s6821_s15 }
0x1b0d   :  { %5637 = vpow2.f32 %v4739_v59  ;;  %22 = vst [vmem:[#allocation5] sm:$0x1] %v21_v27 }
0x1b16   :  { %v5636_v40 = vpop.eup %5635 }
0x1b17   :  { %v4242_v62 = vmul.f32 %v5636_v40, %v5634_v35  ;;  %v5638_v61 = vpop.eup %5637  ;;  %v4241_v1 = vmul.f32 %v5636_v40, %v4143_v24  ;;  %v4539_v24 = vmul.f32 %v6733_v20, %v4538_v50  ;;  %v4597_v35 = vld [vmem:[#allocation4 + $0x8] sm:$0xff] }
0x1b18   :  { %v4238_v3 = vadd.f32 1.0, %v5638_v61 }
0x1b19   :  { %4244 = vrot.lane.b32.xlu0 %v4242_v62, %s5670_s7  ;;  %v4540_v31 = vsel %vm1509_vm7, %v4539_v24, 0.0  ;;  %v4598_v62 = vmul.f32 %v6742_v56, %v4597_v35 }
0x1b1a   :  { %5639 = vrcp.f32 %v4238_v3 }
0x1b1b   :  { %v4599_v59 = vsel %vm1509_vm7, %v4598_v62, 0.0 }
0x1b24   :  { %v5640_v63 = vpop.eup %5639 }
0x1b8b   :  { %v4245_v45 = vpop.permute.xlu0 %4244 }
0x1b8c   :  { %v4247_v60 = vadd.f32 %v4245_v45, %v4241_v1 }
0x1b8e   :  { %5641 = vtanh.f32 %v4247_v60 }
0x1b98   :  { %v5642_v4 = vpop.eup %5641 }
0x1b99   :  { %v4249_v6 = vmul.f32 %v5642_v4, %v5640_v63 }
0x1b9b   :  { %4251 = vrot.lane.b32.xlu1 %v4249_v6, %s5670_s7 }
0x1c0d   :  { %v4252_v37 = vpop.permute.xlu1 %4251 }
0x1c0e   :  { %4254 = vst.msk [vmem:[#allocation4 + $0x28] sm:$0xff] %vm1509_vm7, %v4252_v37  ;;  %4740 = vmatmul.mubr.msk.f32.vlgmr.msra.gmra.mrb[18].mxu0 %vm1509_vm7, %v4252_v37 }
0x1ce1   :  { %v4325_v43 = vpop.f32.mrb[18].mxu0 }
0x1ce2   :  { %v5402_v22 = vadd.f32 %v4325_v43, %v6633_v57  ;;  %v4327_v23 = vpop.f32.mrb[19].mxu0  ;;  %v5671_v43 = vmov 0  }
0x1ce3   :  { %v5403_v8 = vadd.f32 %v4327_v23, %v6638_v15  ;;  %5474 = vset.pattern.permute.xlu0 %v5671_v43  ;;  %5473 = vset.pattern.permute.xlu1 %v5671_v43 }
0x1ce4   :  { %v4741_v26 = vmul.f32 -1.442695, %v5402_v22  ;;  %v4503_v22 = vmul.f32 %v6733_v20, %v4597_v35 }
0x1ce5   :  { %v4742_v7 = vmul.f32 -1.442695, %v5403_v8 }
0x1ce6   :  { %5643 = vpow2.f32 %v4741_v26  ;;  %v4504_v23 = vsel %vm1509_vm7, %v4503_v22, 0.0 }
0x1ce7   :  { %5645 = vtanh.f32 %v5403_v8  ;;  %v4520_v8 = vld [vmem:[#allocation4 + $0x10] sm:$0xff] }
0x1cf0   :  { %v5644_v29 = vpop.eup %5643 }
0x1cf1   :  { %v4335_v30 = vadd.f32 1.0, %v5644_v29  ;;  %v5646_v36 = vpop.eup %5645 }
0x1cf3   :  { %5647 = vrcp.f32 %v4335_v30  ;;  %v4521_v30 = vmul.f32 %v6733_v20, %v4520_v8 }
0x1cf4   :  { %5649 = vpow2.f32 %v4742_v7 }
0x1cfd   :  { %v5648_v39 = vpop.eup %5647 }
0x1cfe   :  { %v4346_v41 = vmul.f32 %v5648_v39, %v5646_v36  ;;  %v5650_v14 = vpop.eup %5649  ;;  %v4345_v44 = vmul.f32 %v5648_v39, %v4247_v60  ;;  %v4522_v36 = vsel %vm1509_vm7, %v4521_v30, 0.0  ;;  %v4557_v39 = vmul.f32 %v6733_v20, %v4543_v28 }
0x1cff   :  { %v4342_v42 = vadd.f32 1.0, %v5650_v14 }
0x1d00   :  { %4348 = vrot.lane.b32.xlu0 %v4346_v41, %s5670_s7  ;;  %v4558_v41 = vsel %vm1509_vm7, %v4557_v39, 0.0 }
0x1d01   :  { %5651 = vrcp.f32 %v4342_v42 }
0x1d0b   :  { %v5652_v48 = vpop.eup %5651 }
0x1d72   :  { %v4349_v46 = vpop.permute.xlu0 %4348 }
0x1d73   :  { %v6721_v47 = vadd.f32 %v4349_v46, %v4345_v44 }
0x1d75   :  { %5653 = vtanh.f32 %v6721_v47 }
0x1d7f   :  { %v5654_v51 = vpop.eup %5653 }
0x1d80   :  { %v4353_v52 = vmul.f32 %v5654_v51, %v5652_v48  ;;  %v4580_v51 = vmul.f32 %v6742_v56, %v4520_v8 }
0x1d82   :  { %4355 = vrot.lane.b32.xlu1 %v4353_v52, %s5670_s7 }
0x1df4   :  { %v4356_v2 = vpop.permute.xlu1 %4355 }
0x1df5   :  { %4358 = vst.msk [vmem:[#allocation4 + $0x30] sm:$0xff] %vm1509_vm7, %v4356_v2  ;;  %4743 = vmatmul.mubr.msk.f32.vlgmr.msra.gmra.mrb[16].mxu1 %vm1509_vm7, %v4356_v2  ;;  %v4581_v2 = vsel %vm1509_vm7, %v4580_v51, 0.0 }
0x1dfc   :  { %v4592_v58 = vld [vmem:[#allocation4 + $0x30] sm:$0xff] }
0x1dfd   :  { %v4593_v25 = vmul.f32 %v6733_v20, %v4592_v58  ;;  %v4508_v26 = vmul.f32 %v6742_v56, %v4592_v58 }
0x1dff   :  { %v4594_v40 = vsel %vm1509_vm7, %v4593_v25, 0.0  ;;  %v4509_v29 = vsel %vm1509_vm7, %v4508_v26, 0.0 }
0x1ec8   :  { %v4429_v5 = vpop.f32.mrb[16].mxu1 }
0x1ec9   :  { %v5404_v9 = vadd.f32 %v4429_v5, %v6633_v57  ;;  %v4431_v10 = vpop.f32.mrb[17].mxu1  ;;  %v6735_v57 = vld [vmem:[#allocation4] sm:$0xff] }
0x1eca   :  { %v5405_v12 = vadd.f32 %v4431_v10, %v6638_v15  ;;  %v4473_v38 = vmul.f32 %v6733_v20, %v6735_v57  ;;  %v4525_v15 = vld [vmem:[#allocation4 + $0x28] sm:$0xff]  ;;  %v4616_v52 = vmul.f32 %v6742_v56, %v6735_v57 }
0x1ecb   :  { %v4744_v11 = vmul.f32 -1.442695, %v5404_v9  ;;  %v4526_v49 = vmul.f32 %v6742_v56, %v4525_v15  ;;  %v4575_v55 = vmul.f32 %v6733_v20, %v4525_v15 }
0x1ecc   :  { %v4474_v21 = vsel %vm1509_vm7, %v4473_v38, 0.0  ;;  %v4745_v61 = vmul.f32 -1.442695, %v5405_v12  ;;  %v4617_v5 = vsel %vm1509_vm7, %v4616_v52, 0.0 }
0x1ecd   :  { %5655 = vpow2.f32 %v4744_v11  ;;  %v4527_v53 = vsel %vm1509_vm7, %v4526_v49, 0.0  ;;  %v4576_v0 = vsel %vm1509_vm7, %v4575_v55, 0.0 }
0x1ece   :  { %5657 = vtanh.f32 %v5405_v12 }
0x1ed7   :  { %v5656_v13 = vpop.eup %5655 }
0x1ed8   :  { %v4439_v16 = vadd.f32 1.0, %v5656_v13  ;;  %v5658_v18 = vpop.eup %5657  ;;  %v4748_v13 = vld [vmem:[#allocation5] ss:$0 sm:$0xff] }
0x1eda   :  { %5659 = vrcp.f32 %v4439_v16 }
0x1edb   :  { %5661 = vpow2.f32 %v4745_v61 }
0x1ee4   :  { %v5660_v17 = vpop.eup %5659 }
0x1ee5   :  { %v4450_v19 = vmul.f32 %v5660_v17, %v5658_v18  ;;  %v5662_v3 = vpop.eup %5661  ;;  %v4449_v45 = vmul.f32 %v5660_v17, %v6721_v47 }
0x1ee6   :  { %v4446_v1 = vadd.f32 1.0, %v5662_v3 }
0x1ee7   :  { %4452 = vrot.lane.b32.xlu0 %v4450_v19, %s5670_s7 }
0x1ee8   :  { %5663 = vrcp.f32 %v4446_v1 }
0x1ef2   :  { %v5664_v4 = vpop.eup %5663 }
0x1f06   :  { %4475 = vadd.xlane.f32.xlu0 %v4474_v21 }
0x1f0a   :  { %4528 = vadd.xlane.f32.xlu0 %v4527_v53 }
0x1f0e   :  { %4541 = vadd.xlane.f32.xlu0 %v4540_v31 }
0x1f12   :  { %4546 = vadd.xlane.f32.xlu0 %v4545_v34 }
0x1f16   :  { %4564 = vadd.xlane.f32.xlu0 %v4563_v54 }
0x1f1a   :  { %4577 = vadd.xlane.f32.xlu0 %v4576_v0 }
0x1f1e   :  { %4595 = vadd.xlane.f32.xlu0 %v4594_v40 }
0x1f22   :  { %4600 = vadd.xlane.f32.xlu0 %v4599_v59 }
0x1f59   :  { %v4453_v60 = vpop.permute.xlu0 %4452 }
0x1f5a   :  { %v4455_v63 = vadd.f32 %v4453_v60, %v4449_v45 }
0x1f5c   :  { %5665 = vtanh.f32 %v4455_v63 }
0x1f66   :  { %v5666_v6 = vpop.eup %5665 }
0x1f67   :  { %v4457_v37 = vmul.f32 %v5666_v6, %v5664_v4 }
0x1f69   :  { %4459 = vrot.lane.b32.xlu1 %v4457_v37, %s5670_s7 }
0x1f8d   :  { %4505 = vadd.xlane.f32.xlu1 %v4504_v23 }
0x1f91   :  { %4510 = vadd.xlane.f32.xlu1 %v4509_v29 }
0x1f93   :  { %v4476_v46 = vpop.xlane.xlu0 %4475 }
0x1f95   :  { %4523 = vadd.xlane.f32.xlu1 %v4522_v36 }
0x1f97   :  { %v4529_v9 = vpop.xlane.xlu0 %4528 }
0x1f99   :  { %4559 = vadd.xlane.f32.xlu1 %v4558_v41 }
0x1f9b   :  { %v4542_v10 = vpop.xlane.xlu0 %4541 }
0x1f9f   :  { %v4547_v11 = vpop.xlane.xlu0 %4546 }
0x1fa0   :  { %v4548_v12 = vadd.f32 %v4547_v11, %v4542_v10 }
0x1fa2   :  { %v4549_v16 = vadd.f32 %v4748_v13, %v4548_v12 }
0x1fa3   :  { %v4565_v18 = vpop.xlane.xlu0 %4564 }
0x1fa7   :  { %v4578_v17 = vpop.xlane.xlu0 %4577 }
0x1fab   :  { %v4596_v38 = vpop.xlane.xlu0 %4595 }
0x1faf   :  { %v4601_v50 = vpop.xlane.xlu0 %4600 }
0x1fb0   :  { %v4602_v28 = vadd.f32 %v4601_v50, %v4596_v38 }
0x1fb2   :  { %v4603_v33 = vadd.f32 %v4748_v13, %v4602_v28 }
0x1fdb   :  { %v4460_v7 = vpop.permute.xlu1 %4459 }
0x1fdc   :  { %4462 = vst.msk [vmem:[#allocation4 + $0x38] sm:$0xff] %vm1509_vm7, %v4460_v7 }
0x1fe3   :  { %v4477_v14 = vld [vmem:[#allocation4 + $0x38] sm:$0xff] }
0x1fe4   :  { %v4484_v42 = vmul.f32 %v6742_v56, %v4477_v14  ;;  %v4611_v44 = vmul.f32 %v6733_v20, %v4477_v14 }
0x1fe6   :  { %v4485_v47 = vsel %vm1509_vm7, %v4484_v42, 0.0  ;;  %v4612_v48 = vsel %vm1509_vm7, %v4611_v44, 0.0 }
0x1fe7   :  { %4486 = vadd.xlane.f32.xlu1 %v4485_v47  ;;  %4613 = vadd.xlane.f32.xlu0 %v4612_v48 }
0x1feb   :  { %4582 = vadd.xlane.f32.xlu1 %v4581_v2  ;;  %4618 = vadd.xlane.f32.xlu0 %v4617_v5 }
0x2001   :  { %4552 = vperm.xlu0 %5474, %v4549_v16  }
0x201a   :  { %v4506_v19 = vpop.xlane.xlu1 %4505 }
0x201e   :  { %v4511_v20 = vpop.xlane.xlu1 %4510 }
0x201f   :  { %v4512_v57 = vadd.f32 %v4511_v20, %v4506_v19 }
0x2021   :  { %v4513_v15 = vadd.f32 %v4748_v13, %v4512_v57 }
0x2022   :  { %v4524_v56 = vpop.xlane.xlu1 %4523 }
0x2023   :  { %v4530_v21 = vadd.f32 %v4529_v9, %v4524_v56  ;;  %4516 = vperm.xlu1 %5473, %v4513_v15  }
0x2025   :  { %v4531_v49 = vadd.f32 %v4748_v13, %v4530_v21 }
0x2026   :  { %v4560_v53 = vpop.xlane.xlu1 %4559 }
0x2027   :  { %v4566_v24 = vadd.f32 %v4565_v18, %v4560_v53  ;;  %4534 = vperm.xlu1 %5473, %v4531_v49  }
0x2029   :  { %v4567_v31 = vadd.f32 %v4748_v13, %v4566_v24 }
0x202b   :  { %4570 = vperm.xlu1 %5473, %v4567_v31  }
0x202f   :  { %4606 = vperm.xlu1 %5473, %v4603_v33  }
0x2074   :  { %v4487_v34 = vpop.xlane.xlu1 %4486  ;;  %v4614_v32 = vpop.xlane.xlu0 %4613 }
0x2075   :  { %v4488_v58 = vadd.f32 %v4487_v34, %v4476_v46 }
0x2077   :  { %v4495_v27 = vadd.f32 %v4748_v13, %v4488_v58 }
0x2078   :  { %v4583_v54 = vpop.xlane.xlu1 %4582  ;;  %v4619_v25 = vpop.xlane.xlu0 %4618 }
0x2079   :  { %v4584_v55 = vadd.f32 %v4583_v54, %v4578_v17  ;;  %v4620_v35 = vadd.f32 %v4619_v25, %v4614_v32 }
0x207b   :  { %v4585_v0 = vadd.f32 %v4748_v13, %v4584_v55  ;;  %v4621_v62 = vadd.f32 %v4748_v13, %v4620_v35 }
0x207d   :  { %4588 = vperm.xlu0 %5474, %v4585_v0  }
0x2080   :  { %v4553_v40 = vpop.permute.xlu0 %4552 }
0x2081   :  { %4555 = vst [vmem:[%s6822_s16 + $0x18] sm:$0xff] %v4553_v40  ;;  %4498 = vperm.xlu0 %5474, %v4495_v27  }
0x2085   :  { %4624 = vperm.xlu0 %5474, %v4621_v62  }
0x20a2   :  { %v4517_v59 = vpop.permute.xlu1 %4516 }
0x20a3   :  { %4519 = vst [vmem:[%s6822_s16 + $0x8] sm:$0xff] %v4517_v59 }
0x20a6   :  { %v4535_v61 = vpop.permute.xlu1 %4534 }
0x20a7   :  { %4537 = vst [vmem:[%s6822_s16 + $0x10] sm:$0xff] %v4535_v61 }
0x20aa   :  { %v4571_v3 = vpop.permute.xlu1 %4570 }
0x20ab   :  { %4573 = vst [vmem:[%s6822_s16 + $0x20] sm:$0xff] %v4571_v3 }
0x20ae   :  { %v4607_v1 = vpop.permute.xlu1 %4606 }
0x20af   :  { %4609 = vst [vmem:[%s6822_s16 + $0x30] sm:$0xff] %v4607_v1 }
0x20fc   :  { %v4589_v45 = vpop.permute.xlu0 %4588 }
0x20fd   :  { %4591 = vst [vmem:[%s6822_s16 + $0x28] sm:$0xff] %v4589_v45 }
0x2100   :  { %v4499_v60 = vpop.permute.xlu0 %4498 }
0x2101   :  { %4501 = vst [vmem:[%s6822_s16] sm:$0xff] %v4499_v60 }
0x2104   :  { %v4625_v63 = vpop.permute.xlu0 %4624 }
0x2105   :  { %4627 = vst [vmem:[%s6822_s16 + $0x38] sm:$0xff] %v4625_v63 }

</bundles_post_ra>
